<compile_context>
chip_gen: v7x
topology: tpu7x:2x2x1
jax: 0.10.0
libtpu: 0.0.40
codegen_flags: <defaults>
</compile_context>

<pallas_src>
import jax
import jax.numpy as jnp
from jax.experimental import pallas as pl
from jax.experimental.pallas import tpu as pltpu


def _resnet_block_kernel(xpad_ref, w1_ref, b1_ref, w2_ref, b2_ref, o_ref,
                         col_ref, pad2_ref):
    # xpad_ref: (1, H+2, W+2, Cp) f32   spatially + channel zero-padded input
    # w*_ref:   (9*Cp, Cp)        cdt   taps flattened in (dy, dx, cin) order
    # b*_ref:   (1, Cp)           f32
    # o_ref:    (1, H, W, Cp)     f32
    # col_ref:  (H*W, 9*Cp)       cdt   im2col scratch (reused for both convs)
    # pad2_ref: (H+2, W+2, Cp)    cdt   zero-padded relu(conv1) scratch
    H = o_ref.shape[1]
    W = o_ref.shape[2]
    Cp = o_ref.shape[3]
    cdt = col_ref.dtype

    xpad = xpad_ref[0]                                     # (H+2, W+2, Cp) f32

    # ---- act1 + im2col for conv1 (input already zero-padded by wrapper) ----
    a1 = jnp.maximum(xpad, 0.0).astype(cdt)
    for dy in range(3):
        for dx in range(3):
            t = dy * 3 + dx
            col_ref[:, t * Cp:(t + 1) * Cp] = (
                a1[dy:dy + H, dx:dx + W, :].reshape(H * W, Cp))

    out1 = jnp.dot(col_ref[...], w1_ref[...],
                   preferred_element_type=jnp.float32) + b1_ref[...]  # (H*W, Cp)

    # ---- act2 into the zero-padded buffer for conv2 ----
    # Only the 1-wide border strips are zeroed (interior fully overwritten
    # every step); no full-buffer zero pass.
    pad2_ref[0:1, :, :] = jnp.zeros((1, W + 2, Cp), cdt)
    pad2_ref[H + 1:H + 2, :, :] = jnp.zeros((1, W + 2, Cp), cdt)
    pad2_ref[:, 0:1, :] = jnp.zeros((H + 2, 1, Cp), cdt)
    pad2_ref[:, W + 1:W + 2, :] = jnp.zeros((H + 2, 1, Cp), cdt)
    pad2_ref[1:H + 1, 1:W + 1, :] = (
        jnp.maximum(out1, 0.0).astype(cdt).reshape(H, W, Cp))

    # ---- im2col for conv2 (reuses col_ref) ----
    for dy in range(3):
        for dx in range(3):
            t = dy * 3 + dx
            col_ref[:, t * Cp:(t + 1) * Cp] = (
                pad2_ref[dy:dy + H, dx:dx + W, :].reshape(H * W, Cp))

    out2 = jnp.dot(col_ref[...], w2_ref[...],
                   preferred_element_type=jnp.float32) + b2_ref[...]

    # ---- residual add with the original (unpadded, un-relu'd) x ----
    x_res = xpad[1:H + 1, 1:W + 1, :].reshape(H * W, Cp)
    o_ref[0] = (out2 + x_res).reshape(H, W, Cp).astype(o_ref.dtype)


def resnet_block(x_nchw, w1_oihw, b1, w2_oihw, b2, *, use_bf16=False):
    """ResnetBlock forward. x_nchw: (B,C,H,W); w*: (C,C,3,3) OIHW; b*: (C,).

    Returns (B, C, H, W). `use_bf16` feeds the MXU bf16 operands (f32 accum);
    default f32 keeps reference-level numerics.
    """
    B, C, H, W = x_nchw.shape
    Cp = ((C + 127) // 128) * 128                     # lane-dense channel pad
    cdt = jnp.bfloat16 if use_bf16 else jnp.float32

    # NCHW -> NHWC, zero-pad channels to Cp and space by 1 on each side.
    x = jnp.transpose(x_nchw, (0, 2, 3, 1)).astype(jnp.float32)
    x_pad = jnp.pad(x, ((0, 0), (1, 1), (1, 1), (0, Cp - C)))   # (B,H+2,W+2,Cp)

    def prep_w(w_oihw):
        w = jnp.transpose(w_oihw, (2, 3, 1, 0)).astype(jnp.float32)  # (kh,kw,Ci,Co)
        w = jnp.pad(w, ((0, 0), (0, 0), (0, Cp - C), (0, Cp - C)))
        return w.reshape(9 * Cp, Cp).astype(cdt)      # row index = (dy, dx, cin)

    w1p = prep_w(w1_oihw)
    w2p = prep_w(w2_oihw)
    b1p = jnp.pad(b1.astype(jnp.float32), (0, Cp - C)).reshape(1, Cp)
    b2p = jnp.pad(b2.astype(jnp.float32), (0, Cp - C)).reshape(1, Cp)

    # Explicit VMEM budget: double-buffered in/out blocks + weights + scratch.
    csz = jnp.dtype(cdt).itemsize
    est = (2 * (H + 2) * (W + 2) * Cp * 4             # x_pad block (dbl buf)
           + 2 * H * W * Cp * 4                       # out block   (dbl buf)
           + 2 * 2 * 9 * Cp * Cp * csz                # w1, w2
           + 2 * 2 * Cp * 4                           # b1, b2
           + H * W * 9 * Cp * csz                     # im2col scratch
           + (H + 2) * (W + 2) * Cp * csz)            # pad scratch
    vmem_limit = int(min(max(2 * est, 32 * 2 ** 20), 64 * 2 ** 20))

    out_nhwc = pl.pallas_call(
        _resnet_block_kernel,
        out_shape=jax.ShapeDtypeStruct((B, H, W, Cp), jnp.float32),
        grid_spec=pltpu.PrefetchScalarGridSpec(
            num_scalar_prefetch=0,
            grid=(B,),
            in_specs=[
                pl.BlockSpec((1, H + 2, W + 2, Cp), lambda b: (b, 0, 0, 0)),
                pl.BlockSpec((9 * Cp, Cp), lambda b: (0, 0)),
                pl.BlockSpec((1, Cp), lambda b: (0, 0)),
                pl.BlockSpec((9 * Cp, Cp), lambda b: (0, 0)),
                pl.BlockSpec((1, Cp), lambda b: (0, 0)),
            ],
            out_specs=pl.BlockSpec((1, H, W, Cp), lambda b: (b, 0, 0, 0)),
            scratch_shapes=[
                pltpu.VMEM((H * W, 9 * Cp), cdt),
                pltpu.VMEM((H + 2, W + 2, Cp), cdt),
            ],
        ),
        compiler_params=pltpu.CompilerParams(
            dimension_semantics=("parallel",),        # batch items independent
            vmem_limit_bytes=vmem_limit,
        ),
    )(x_pad, w1p, b1p, w2p, b2p)

    return jnp.transpose(out_nhwc[..., :C], (0, 3, 1, 2))        # NCHW, orig C


def _reference(x, w1, b1, w2, b2):
    """Plain-JAX reference matching the PyTorch forward semantics."""
    dn = jax.lax.conv_dimension_numbers(x.shape, w1.shape,
                                        ('NCHW', 'OIHW', 'NCHW'))
    a = jax.nn.relu(x)
    a = jax.lax.conv_general_dilated(a, w1, (1, 1), ((1, 1), (1, 1)),
                                     dimension_numbers=dn) + b1.reshape(1, -1, 1, 1)
    a = jax.nn.relu(a)
    a = jax.lax.conv_general_dilated(a, w2, (1, 1), ((1, 1), (1, 1)),
                                     dimension_numbers=dn) + b2.reshape(1, -1, 1, 1)
    return a + x


if __name__ == "__main__":
    key = jax.random.PRNGKey(0)
    kx, kw1, kb1, kw2, kb2 = jax.random.split(key, 5)

    B, C, H, W = 2, 4, 16, 16
    x = jax.random.normal(kx, (B, C, H, W), dtype=jnp.float32)

    # torch Conv2d-shaped parameters: OIHW weights + per-channel bias.
    fan_in = C * 3 * 3
    bound = 1.0 / jnp.sqrt(fan_in)
    w1 = jax.random.uniform(kw1, (C, C, 3, 3), jnp.float32, -bound, bound)
    b1 = jax.random.uniform(kb1, (C,), jnp.float32, -bound, bound)
    w2 = jax.random.uniform(kw2, (C, C, 3, 3), jnp.float32, -bound, bound)
    b2 = jax.random.uniform(kb2, (C,), jnp.float32, -bound, bound)

    out = resnet_block(x, w1, b1, w2, b2)
    out = jax.block_until_ready(out)

    ref = _reference(x, w1, b1, w2, b2)
    assert out.shape == (B, C, H, W)
    assert jnp.allclose(out, ref, atol=1e-5, rtol=1e-5), "mismatch vs reference"

    print("KERNEL_OK")
</pallas_src>

<mosaic_0001>
module attributes {stable_mosaic.version = 11 : i64} {
  func.func @_resnet_block_kernel(%arg0: i32, %arg1: memref<1x18x18x128xf32, #tpu.memory_space<vmem>>, %arg2: memref<1152x128xf32, #tpu.memory_space<vmem>>, %arg3: memref<1x128xf32, #tpu.memory_space<vmem>>, %arg4: memref<1152x128xf32, #tpu.memory_space<vmem>>, %arg5: memref<1x128xf32, #tpu.memory_space<vmem>>, %arg6: memref<1x16x16x128xf32, #tpu.memory_space<vmem>>, %arg7: memref<256x1152xf32, #tpu.memory_space<vmem>>, %arg8: memref<18x18x128xf32, #tpu.memory_space<vmem>>) attributes {dimension_semantics = [#tpu.dimension_semantics<parallel>], iteration_bounds = array<i64: 2>, scalar_prefetch = 0 : i64, scratch_operands = 2 : i64, tpu.core_type = #tpu.core_type<tc>, window_params = [{transform_indices = @transform_0, window_bounds = array<i64: 1, 18, 18, 128>}, {pipeline_mode = #tpu.pipeline_mode<synchronous>, transform_indices = @transform_1, window_bounds = array<i64: 1152, 128>}, {pipeline_mode = #tpu.pipeline_mode<synchronous>, transform_indices = @transform_2, window_bounds = array<i64: 1, 128>}, {pipeline_mode = #tpu.pipeline_mode<synchronous>, transform_indices = @transform_3, window_bounds = array<i64: 1152, 128>}, {pipeline_mode = #tpu.pipeline_mode<synchronous>, transform_indices = @transform_4, window_bounds = array<i64: 1, 128>}, {transform_indices = @transform_5, window_bounds = array<i64: 1, 16, 16, 128>}]} {
    %c0 = arith.constant 0 : index
    %c0_0 = arith.constant 0 : index
    %c0_1 = arith.constant 0 : index
    %c0_2 = arith.constant 0 : index
    %0 = vector.load %arg1[%c0, %c0_0, %c0_1, %c0_2] : memref<1x18x18x128xf32, #tpu.memory_space<vmem>>, vector<1x18x18x128xf32>
    %1 = vector.shape_cast %0 : vector<1x18x18x128xf32> to vector<18x18x128xf32>
    %cst = arith.constant 0.000000e+00 : f32
    %2 = vector.broadcast %cst : f32 to vector<18x18x128xf32>
    %3 = arith.maximumf %1, %2 : vector<18x18x128xf32>
    %4 = vector.extract_strided_slice %3 {offsets = [0, 0, 0], sizes = [16, 16, 128], strides = [1, 1, 1]} : vector<18x18x128xf32> to vector<16x16x128xf32>
    %5 = vector.shape_cast %4 : vector<16x16x128xf32> to vector<256x128xf32>
    %c0_3 = arith.constant 0 : index
    %c0_4 = arith.constant 0 : index
    %6 = vector.load %arg7[%c0_3, %c0_4] : memref<256x1152xf32, #tpu.memory_space<vmem>>, vector<256x128xf32>
    tpu.vector_store %arg7[%c0_3, %c0_4], %5 {strides = array<i32>} : memref<256x1152xf32, #tpu.memory_space<vmem>>, vector<256x128xf32>,
    %7 = vector.extract_strided_slice %3 {offsets = [0, 1, 0], sizes = [16, 16, 128], strides = [1, 1, 1]} : vector<18x18x128xf32> to vector<16x16x128xf32>
    %8 = vector.shape_cast %7 : vector<16x16x128xf32> to vector<256x128xf32>
    %c0_5 = arith.constant 0 : index
    %c128 = arith.constant 128 : index
    %9 = vector.load %arg7[%c0_5, %c128] : memref<256x1152xf32, #tpu.memory_space<vmem>>, vector<256x128xf32>
    tpu.vector_store %arg7[%c0_5, %c128], %8 {strides = array<i32>} : memref<256x1152xf32, #tpu.memory_space<vmem>>, vector<256x128xf32>,
    %10 = vector.extract_strided_slice %3 {offsets = [0, 2, 0], sizes = [16, 16, 128], strides = [1, 1, 1]} : vector<18x18x128xf32> to vector<16x16x128xf32>
    %11 = vector.shape_cast %10 : vector<16x16x128xf32> to vector<256x128xf32>
    %c0_6 = arith.constant 0 : index
    %c256 = arith.constant 256 : index
    %12 = vector.load %arg7[%c0_6, %c256] : memref<256x1152xf32, #tpu.memory_space<vmem>>, vector<256x128xf32>
    tpu.vector_store %arg7[%c0_6, %c256], %11 {strides = array<i32>} : memref<256x1152xf32, #tpu.memory_space<vmem>>, vector<256x128xf32>,
    %13 = vector.extract_strided_slice %3 {offsets = [1, 0, 0], sizes = [16, 16, 128], strides = [1, 1, 1]} : vector<18x18x128xf32> to vector<16x16x128xf32>
    %14 = vector.shape_cast %13 : vector<16x16x128xf32> to vector<256x128xf32>
    %c0_7 = arith.constant 0 : index
    %c384 = arith.constant 384 : index
    %15 = vector.load %arg7[%c0_7, %c384] : memref<256x1152xf32, #tpu.memory_space<vmem>>, vector<256x128xf32>
    tpu.vector_store %arg7[%c0_7, %c384], %14 {strides = array<i32>} : memref<256x1152xf32, #tpu.memory_space<vmem>>, vector<256x128xf32>,
    %16 = vector.extract_strided_slice %3 {offsets = [1, 1, 0], sizes = [16, 16, 128], strides = [1, 1, 1]} : vector<18x18x128xf32> to vector<16x16x128xf32>
    %17 = vector.shape_cast %16 : vector<16x16x128xf32> to vector<256x128xf32>
    %c0_8 = arith.constant 0 : index
    %c512 = arith.constant 512 : index
    %18 = vector.load %arg7[%c0_8, %c512] : memref<256x1152xf32, #tpu.memory_space<vmem>>, vector<256x128xf32>
    tpu.vector_store %arg7[%c0_8, %c512], %17 {strides = array<i32>} : memref<256x1152xf32, #tpu.memory_space<vmem>>, vector<256x128xf32>,
    %19 = vector.extract_strided_slice %3 {offsets = [1, 2, 0], sizes = [16, 16, 128], strides = [1, 1, 1]} : vector<18x18x128xf32> to vector<16x16x128xf32>
    %20 = vector.shape_cast %19 : vector<16x16x128xf32> to vector<256x128xf32>
    %c0_9 = arith.constant 0 : index
    %c640 = arith.constant 640 : index
    %21 = vector.load %arg7[%c0_9, %c640] : memref<256x1152xf32, #tpu.memory_space<vmem>>, vector<256x128xf32>
    tpu.vector_store %arg7[%c0_9, %c640], %20 {strides = array<i32>} : memref<256x1152xf32, #tpu.memory_space<vmem>>, vector<256x128xf32>,
    %22 = vector.extract_strided_slice %3 {offsets = [2, 0, 0], sizes = [16, 16, 128], strides = [1, 1, 1]} : vector<18x18x128xf32> to vector<16x16x128xf32>
    %23 = vector.shape_cast %22 : vector<16x16x128xf32> to vector<256x128xf32>
    %c0_10 = arith.constant 0 : index
    %c768 = arith.constant 768 : index
    %24 = vector.load %arg7[%c0_10, %c768] : memref<256x1152xf32, #tpu.memory_space<vmem>>, vector<256x128xf32>
    tpu.vector_store %arg7[%c0_10, %c768], %23 {strides = array<i32>} : memref<256x1152xf32, #tpu.memory_space<vmem>>, vector<256x128xf32>,
    %25 = vector.extract_strided_slice %3 {offsets = [2, 1, 0], sizes = [16, 16, 128], strides = [1, 1, 1]} : vector<18x18x128xf32> to vector<16x16x128xf32>
    %26 = vector.shape_cast %25 : vector<16x16x128xf32> to vector<256x128xf32>
    %c0_11 = arith.constant 0 : index
    %c896 = arith.constant 896 : index
    %27 = vector.load %arg7[%c0_11, %c896] : memref<256x1152xf32, #tpu.memory_space<vmem>>, vector<256x128xf32>
    tpu.vector_store %arg7[%c0_11, %c896], %26 {strides = array<i32>} : memref<256x1152xf32, #tpu.memory_space<vmem>>, vector<256x128xf32>,
    %28 = vector.extract_strided_slice %3 {offsets = [2, 2, 0], sizes = [16, 16, 128], strides = [1, 1, 1]} : vector<18x18x128xf32> to vector<16x16x128xf32>
    %29 = vector.shape_cast %28 : vector<16x16x128xf32> to vector<256x128xf32>
    %c0_12 = arith.constant 0 : index
    %c1024 = arith.constant 1024 : index
    %30 = vector.load %arg7[%c0_12, %c1024] : memref<256x1152xf32, #tpu.memory_space<vmem>>, vector<256x128xf32>
    tpu.vector_store %arg7[%c0_12, %c1024], %29 {strides = array<i32>} : memref<256x1152xf32, #tpu.memory_space<vmem>>, vector<256x128xf32>,
    %c0_13 = arith.constant 0 : index
    %c0_14 = arith.constant 0 : index
    %31 = vector.load %arg7[%c0_13, %c0_14] : memref<256x1152xf32, #tpu.memory_space<vmem>>, vector<256x1152xf32>
    %c0_15 = arith.constant 0 : index
    %c0_16 = arith.constant 0 : index
    %32 = vector.load %arg2[%c0_15, %c0_16] : memref<1152x128xf32, #tpu.memory_space<vmem>>, vector<1152x128xf32>
    %cst_17 = arith.constant dense<0.000000e+00> : vector<256x128xf32>
    %33 = tpu.matmul %31, %32, %cst_17 {dimension_numbers = #tpu.dot_dimension_numbers<[1], [0], [0], [1], [0, 0, 1, 1], [], []>} : vector<256x1152xf32>, vector<1152x128xf32>, vector<256x128xf32> -> vector<256x128xf32>
    %c0_18 = arith.constant 0 : index
    %c0_19 = arith.constant 0 : index
    %34 = vector.load %arg3[%c0_18, %c0_19] : memref<1x128xf32, #tpu.memory_space<vmem>>, vector<1x128xf32>
    %35 = vector.broadcast %34 : vector<1x128xf32> to vector<256x128xf32>
    %36 = arith.addf %33, %35 : vector<256x128xf32>
    %cst_20 = arith.constant 0.000000e+00 : f32
    %37 = vector.broadcast %cst_20 : f32 to vector<1x18x128xf32>
    %c0_21 = arith.constant 0 : index
    %c0_22 = arith.constant 0 : index
    %c0_23 = arith.constant 0 : index
    %38 = vector.load %arg8[%c0_21, %c0_22, %c0_23] : memref<18x18x128xf32, #tpu.memory_space<vmem>>, vector<1x18x128xf32>
    tpu.vector_store %arg8[%c0_21, %c0_22, %c0_23], %37 {strides = array<i32>} : memref<18x18x128xf32, #tpu.memory_space<vmem>>, vector<1x18x128xf32>,
    %cst_24 = arith.constant 0.000000e+00 : f32
    %39 = vector.broadcast %cst_24 : f32 to vector<1x18x128xf32>
    %c17 = arith.constant 17 : index
    %c0_25 = arith.constant 0 : index
    %c0_26 = arith.constant 0 : index
    %40 = vector.load %arg8[%c17, %c0_25, %c0_26] : memref<18x18x128xf32, #tpu.memory_space<vmem>>, vector<1x18x128xf32>
    tpu.vector_store %arg8[%c17, %c0_25, %c0_26], %39 {strides = array<i32>} : memref<18x18x128xf32, #tpu.memory_space<vmem>>, vector<1x18x128xf32>,
    %cst_27 = arith.constant 0.000000e+00 : f32
    %41 = vector.broadcast %cst_27 : f32 to vector<18x1x128xf32>
    %c0_28 = arith.constant 0 : index
    %c0_29 = arith.constant 0 : index
    %c0_30 = arith.constant 0 : index
    %42 = vector.load %arg8[%c0_28, %c0_29, %c0_30] : memref<18x18x128xf32, #tpu.memory_space<vmem>>, vector<18x1x128xf32>
    tpu.vector_store %arg8[%c0_28, %c0_29, %c0_30], %41 {strides = array<i32>} : memref<18x18x128xf32, #tpu.memory_space<vmem>>, vector<18x1x128xf32>,
    %cst_31 = arith.constant 0.000000e+00 : f32
    %43 = vector.broadcast %cst_31 : f32 to vector<18x1x128xf32>
    %c0_32 = arith.constant 0 : index
    %c17_33 = arith.constant 17 : index
    %c0_34 = arith.constant 0 : index
    %44 = vector.load %arg8[%c0_32, %c17_33, %c0_34] : memref<18x18x128xf32, #tpu.memory_space<vmem>>, vector<18x1x128xf32>
    tpu.vector_store %arg8[%c0_32, %c17_33, %c0_34], %43 {strides = array<i32>} : memref<18x18x128xf32, #tpu.memory_space<vmem>>, vector<18x1x128xf32>,
    %cst_35 = arith.constant 0.000000e+00 : f32
    %45 = vector.broadcast %cst_35 : f32 to vector<256x128xf32>
    %46 = arith.maximumf %36, %45 : vector<256x128xf32>
    %47 = vector.shape_cast %46 : vector<256x128xf32> to vector<16x16x128xf32>
    %c1 = arith.constant 1 : index
    %c1_36 = arith.constant 1 : index
    %c0_37 = arith.constant 0 : index
    %48 = vector.load %arg8[%c1, %c1_36, %c0_37] : memref<18x18x128xf32, #tpu.memory_space<vmem>>, vector<16x16x128xf32>
    tpu.vector_store %arg8[%c1, %c1_36, %c0_37], %47 {strides = array<i32>} : memref<18x18x128xf32, #tpu.memory_space<vmem>>, vector<16x16x128xf32>,
    %c0_38 = arith.constant 0 : index
    %c0_39 = arith.constant 0 : index
    %c0_40 = arith.constant 0 : index
    %49 = vector.load %arg8[%c0_38, %c0_39, %c0_40] : memref<18x18x128xf32, #tpu.memory_space<vmem>>, vector<16x16x128xf32>
    %50 = vector.shape_cast %49 : vector<16x16x128xf32> to vector<256x128xf32>
    %c0_41 = arith.constant 0 : index
    %c0_42 = arith.constant 0 : index
    %51 = vector.load %arg7[%c0_41, %c0_42] : memref<256x1152xf32, #tpu.memory_space<vmem>>, vector<256x128xf32>
    tpu.vector_store %arg7[%c0_41, %c0_42], %50 {strides = array<i32>} : memref<256x1152xf32, #tpu.memory_space<vmem>>, vector<256x128xf32>,
    %c0_43 = arith.constant 0 : index
    %c1_44 = arith.constant 1 : index
    %c0_45 = arith.constant 0 : index
    %52 = vector.load %arg8[%c0_43, %c1_44, %c0_45] : memref<18x18x128xf32, #tpu.memory_space<vmem>>, vector<16x16x128xf32>
    %53 = vector.shape_cast %52 : vector<16x16x128xf32> to vector<256x128xf32>
    %c0_46 = arith.constant 0 : index
    %c128_47 = arith.constant 128 : index
    %54 = vector.load %arg7[%c0_46, %c128_47] : memref<256x1152xf32, #tpu.memory_space<vmem>>, vector<256x128xf32>
    tpu.vector_store %arg7[%c0_46, %c128_47], %53 {strides = array<i32>} : memref<256x1152xf32, #tpu.memory_space<vmem>>, vector<256x128xf32>,
    %c0_48 = arith.constant 0 : index
    %c2 = arith.constant 2 : index
    %c0_49 = arith.constant 0 : index
    %55 = vector.load %arg8[%c0_48, %c2, %c0_49] : memref<18x18x128xf32, #tpu.memory_space<vmem>>, vector<16x16x128xf32>
    %56 = vector.shape_cast %55 : vector<16x16x128xf32> to vector<256x128xf32>
    %c0_50 = arith.constant 0 : index
    %c256_51 = arith.constant 256 : index
    %57 = vector.load %arg7[%c0_50, %c256_51] : memref<256x1152xf32, #tpu.memory_space<vmem>>, vector<256x128xf32>
    tpu.vector_store %arg7[%c0_50, %c256_51], %56 {strides = array<i32>} : memref<256x1152xf32, #tpu.memory_space<vmem>>, vector<256x128xf32>,
    %c1_52 = arith.constant 1 : index
    %c0_53 = arith.constant 0 : index
    %c0_54 = arith.constant 0 : index
    %58 = vector.load %arg8[%c1_52, %c0_53, %c0_54] : memref<18x18x128xf32, #tpu.memory_space<vmem>>, vector<16x16x128xf32>
    %59 = vector.shape_cast %58 : vector<16x16x128xf32> to vector<256x128xf32>
    %c0_55 = arith.constant 0 : index
    %c384_56 = arith.constant 384 : index
    %60 = vector.load %arg7[%c0_55, %c384_56] : memref<256x1152xf32, #tpu.memory_space<vmem>>, vector<256x128xf32>
    tpu.vector_store %arg7[%c0_55, %c384_56], %59 {strides = array<i32>} : memref<256x1152xf32, #tpu.memory_space<vmem>>, vector<256x128xf32>,
    %c1_57 = arith.constant 1 : index
    %c1_58 = arith.constant 1 : index
    %c0_59 = arith.constant 0 : index
    %61 = vector.load %arg8[%c1_57, %c1_58, %c0_59] : memref<18x18x128xf32, #tpu.memory_space<vmem>>, vector<16x16x128xf32>
    %62 = vector.shape_cast %61 : vector<16x16x128xf32> to vector<256x128xf32>
    %c0_60 = arith.constant 0 : index
    %c512_61 = arith.constant 512 : index
    %63 = vector.load %arg7[%c0_60, %c512_61] : memref<256x1152xf32, #tpu.memory_space<vmem>>, vector<256x128xf32>
    tpu.vector_store %arg7[%c0_60, %c512_61], %62 {strides = array<i32>} : memref<256x1152xf32, #tpu.memory_space<vmem>>, vector<256x128xf32>,
    %c1_62 = arith.constant 1 : index
    %c2_63 = arith.constant 2 : index
    %c0_64 = arith.constant 0 : index
    %64 = vector.load %arg8[%c1_62, %c2_63, %c0_64] : memref<18x18x128xf32, #tpu.memory_space<vmem>>, vector<16x16x128xf32>
    %65 = vector.shape_cast %64 : vector<16x16x128xf32> to vector<256x128xf32>
    %c0_65 = arith.constant 0 : index
    %c640_66 = arith.constant 640 : index
    %66 = vector.load %arg7[%c0_65, %c640_66] : memref<256x1152xf32, #tpu.memory_space<vmem>>, vector<256x128xf32>
    tpu.vector_store %arg7[%c0_65, %c640_66], %65 {strides = array<i32>} : memref<256x1152xf32, #tpu.memory_space<vmem>>, vector<256x128xf32>,
    %c2_67 = arith.constant 2 : index
    %c0_68 = arith.constant 0 : index
    %c0_69 = arith.constant 0 : index
    %67 = vector.load %arg8[%c2_67, %c0_68, %c0_69] : memref<18x18x128xf32, #tpu.memory_space<vmem>>, vector<16x16x128xf32>
    %68 = vector.shape_cast %67 : vector<16x16x128xf32> to vector<256x128xf32>
    %c0_70 = arith.constant 0 : index
    %c768_71 = arith.constant 768 : index
    %69 = vector.load %arg7[%c0_70, %c768_71] : memref<256x1152xf32, #tpu.memory_space<vmem>>, vector<256x128xf32>
    tpu.vector_store %arg7[%c0_70, %c768_71], %68 {strides = array<i32>} : memref<256x1152xf32, #tpu.memory_space<vmem>>, vector<256x128xf32>,
    %c2_72 = arith.constant 2 : index
    %c1_73 = arith.constant 1 : index
    %c0_74 = arith.constant 0 : index
    %70 = vector.load %arg8[%c2_72, %c1_73, %c0_74] : memref<18x18x128xf32, #tpu.memory_space<vmem>>, vector<16x16x128xf32>
    %71 = vector.shape_cast %70 : vector<16x16x128xf32> to vector<256x128xf32>
    %c0_75 = arith.constant 0 : index
    %c896_76 = arith.constant 896 : index
    %72 = vector.load %arg7[%c0_75, %c896_76] : memref<256x1152xf32, #tpu.memory_space<vmem>>, vector<256x128xf32>
    tpu.vector_store %arg7[%c0_75, %c896_76], %71 {strides = array<i32>} : memref<256x1152xf32, #tpu.memory_space<vmem>>, vector<256x128xf32>,
    %c2_77 = arith.constant 2 : index
    %c2_78 = arith.constant 2 : index
    %c0_79 = arith.constant 0 : index
    %73 = vector.load %arg8[%c2_77, %c2_78, %c0_79] : memref<18x18x128xf32, #tpu.memory_space<vmem>>, vector<16x16x128xf32>
    %74 = vector.shape_cast %73 : vector<16x16x128xf32> to vector<256x128xf32>
    %c0_80 = arith.constant 0 : index
    %c1024_81 = arith.constant 1024 : index
    %75 = vector.load %arg7[%c0_80, %c1024_81] : memref<256x1152xf32, #tpu.memory_space<vmem>>, vector<256x128xf32>
    tpu.vector_store %arg7[%c0_80, %c1024_81], %74 {strides = array<i32>} : memref<256x1152xf32, #tpu.memory_space<vmem>>, vector<256x128xf32>,
    %c0_82 = arith.constant 0 : index
    %c0_83 = arith.constant 0 : index
    %76 = vector.load %arg7[%c0_82, %c0_83] : memref<256x1152xf32, #tpu.memory_space<vmem>>, vector<256x1152xf32>
    %c0_84 = arith.constant 0 : index
    %c0_85 = arith.constant 0 : index
    %77 = vector.load %arg4[%c0_84, %c0_85] : memref<1152x128xf32, #tpu.memory_space<vmem>>, vector<1152x128xf32>
    %cst_86 = arith.constant dense<0.000000e+00> : vector<256x128xf32>
    %78 = tpu.matmul %76, %77, %cst_86 {dimension_numbers = #tpu.dot_dimension_numbers<[1], [0], [0], [1], [0, 0, 1, 1], [], []>} : vector<256x1152xf32>, vector<1152x128xf32>, vector<256x128xf32> -> vector<256x128xf32>
    %c0_87 = arith.constant 0 : index
    %c0_88 = arith.constant 0 : index
    %79 = vector.load %arg5[%c0_87, %c0_88] : memref<1x128xf32, #tpu.memory_space<vmem>>, vector<1x128xf32>
    %80 = vector.broadcast %79 : vector<1x128xf32> to vector<256x128xf32>
    %81 = arith.addf %78, %80 : vector<256x128xf32>
    %82 = vector.extract_strided_slice %1 {offsets = [1, 1, 0], sizes = [16, 16, 128], strides = [1, 1, 1]} : vector<18x18x128xf32> to vector<16x16x128xf32>
    %83 = vector.shape_cast %82 : vector<16x16x128xf32> to vector<256x128xf32>
    %84 = arith.addf %81, %83 : vector<256x128xf32>
    %85 = vector.shape_cast %84 : vector<256x128xf32> to vector<16x16x128xf32>
    %c0_89 = arith.constant 0 : index
    %c0_90 = arith.constant 0 : index
    %c0_91 = arith.constant 0 : index
    %c0_92 = arith.constant 0 : index
    %86 = vector.load %arg6[%c0_89, %c0_90, %c0_91, %c0_92] : memref<1x16x16x128xf32, #tpu.memory_space<vmem>>, vector<1x16x16x128xf32>
    %87 = vector.shape_cast %86 : vector<1x16x16x128xf32> to vector<16x16x128xf32>
    %88 = vector.shape_cast %85 : vector<16x16x128xf32> to vector<1x16x16x128xf32>
    tpu.vector_store %arg6[%c0_89, %c0_90, %c0_91, %c0_92], %88 {strides = array<i32>} : memref<1x16x16x128xf32, #tpu.memory_space<vmem>>, vector<1x16x16x128xf32>,
    return
  }
  func.func @transform_0(%arg0: i32) -> (i32, i32, i32, i32) {
    %c0_i32 = arith.constant 0 : i32
    %c0_i32_0 = arith.constant 0 : i32
    %c0_i32_1 = arith.constant 0 : i32
    %c0_i32_2 = arith.constant 0 : i32
    return %arg0, %c0_i32, %c0_i32_0, %c0_i32_1 : i32, i32, i32, i32
  }
  func.func @transform_1(%arg0: i32) -> (i32, i32) {
    %c0_i32 = arith.constant 0 : i32
    %c0_i32_0 = arith.constant 0 : i32
    %c0_i32_1 = arith.constant 0 : i32
    return %c0_i32, %c0_i32_0 : i32, i32
  }
  func.func @transform_2(%arg0: i32) -> (i32, i32) {
    %c0_i32 = arith.constant 0 : i32
    %c0_i32_0 = arith.constant 0 : i32
    %c0_i32_1 = arith.constant 0 : i32
    return %c0_i32, %c0_i32_0 : i32, i32
  }
  func.func @transform_3(%arg0: i32) -> (i32, i32) {
    %c0_i32 = arith.constant 0 : i32
    %c0_i32_0 = arith.constant 0 : i32
    %c0_i32_1 = arith.constant 0 : i32
    return %c0_i32, %c0_i32_0 : i32, i32
  }
  func.func @transform_4(%arg0: i32) -> (i32, i32) {
    %c0_i32 = arith.constant 0 : i32
    %c0_i32_0 = arith.constant 0 : i32
    %c0_i32_1 = arith.constant 0 : i32
    return %c0_i32, %c0_i32_0 : i32, i32
  }
  func.func @transform_5(%arg0: i32) -> (i32, i32, i32, i32) {
    %c0_i32 = arith.constant 0 : i32
    %c0_i32_0 = arith.constant 0 : i32
    %c0_i32_1 = arith.constant 0 : i32
    %c0_i32_2 = arith.constant 0 : i32
    return %arg0, %c0_i32, %c0_i32_0, %c0_i32_1 : i32, i32, i32, i32
  }
}

</mosaic_0001>

<bundles_post_ra>
// kernel: tpu_custom_call.1
= control target key start
LH: loop header
LB: loop body
LE: loop exit
PB: predicated region body
PF: predicated region fallthrough
CT: control target
= control target key end

     0   :  { %10 = vsyncpa [#allocation5], 0  ;;  %s8837_s0 = inlined_call_operand.vmem [shape: f32[2,18,18,128], index: 0, kind: input, shape index: {}]   ;;  %s8838_s1 = inlined_call_operand.vmem [shape: f32[1152,128], index: 1, kind: input, shape index: {}]   ;;  %s8839_s2 = inlined_call_operand.vmem [shape: f32[1,128], index: 2, kind: input, shape index: {}]   ;;  %s8840_s3 = inlined_call_operand.hbm [shape: f32[1152,128], index: 3, kind: input, shape index: {}]   ;;  %s8841_s4 = inlined_call_operand.vmem [shape: f32[1,128], index: 4, kind: input, shape index: {}]   ;;  %s8842_s5 = inlined_call_operand.hbm [shape: f32[2,16,16,128], index: 5, kind: output, shape index: {}]  }
   0x1   :  { %11 = vsyncpa [#allocation6], 0 }
   0x2   :  { %13 = vsyncpa [#allocation6 + $0x1], 0  ;;  %s6491_s18 = smov 0   ;;  %s6493_s19 = smov 0  }
   0x3   :  { %s6495_s20 = smov 0   ;;  %s6497_s21 = smov 0  }
   0x4 LB: > { %s6512_s22 = sadd.s32 4294967295, %s6451_s21   ;;  %s5067_s23 = sadd.s32 4294967294, %s6451_s21   ;;  %s6451_s21 = sphi %s6497_s21, %s9091_s21   ;;  %s6447_s20 = sphi %s6495_s20, %s9090_s20   ;;  %s6443_s19 = sphi %s6493_s19, %s9089_s19   ;;  %s6439_s18 = sphi %s6491_s18, %s9088_s18  }
   0x5   : > { %s6516_s24 = sadd.s32 1, %s6451_s21   ;;  %s136_s25 = sadd.s32 1, %s6447_s20 }
   0x6   : > { %s133_s26 = ssub.s32 %s6451_s21, %s6516_s24  ;;  %p146_p0 = scmp.ne.s32.totalorder %s6447_s20, %s6443_s19 }
   0x7   : > { %p134_p1 = scmp.eq.s32.totalorder %s133_s26, 0  ;;  %p147_p2 = scmp.eq.s32.totalorder %s6512_s22, 1 }
   0x8   : > { %p152_p3 = scmp.ne.s32.totalorder %s6443_s19, %s6439_s18  ;;  %p153_p4 = scmp.eq.s32.totalorder %s5067_s23, 1 }
   0x9   : > { %s6527_s27 = scalar_select %p134_p1, %s6447_s20, %s136_s25  }
   0xa   : > { %p6529_p5 = por %p147_p2, %p146_p0  ;;  %p6533_p6 = por %p153_p4, %p152_p3 }
   0xb   : > { %p5068_p7 = scmp.ge.s32.totalorder %s6451_s21, 1  ;;  %p160_p8 = scmp.lt.s32.totalorder %s6451_s21, 3 }
   0xc   : > { %s8953_s28 = scalar_select %p6529_p5, 1, 0 }
   0xd   : > { %s8954_s29 = scalar_select %p6533_p6, 1, 0 }
   0xe   : > { %p8843_p9 = scmp.eq.s32.totalorder %s6512_s22, 0  ;;  %p6540_p10 = pnand %p5068_p7, %p160_p8 }
   0xf   : > { %s6453_s6 = smov [#allocation4]   ;;  %s6357_s11 = scalar_lea.hbm %s8840_s3, 18432 }
  0x10   : > { %s8955_s30 = scalar_select %p6540_p10, 1, 0 }
  0x11   : > { %s178_s7 = sshll.u32 %s6453_s6, 4  ;;  %p6258_p11 = pneg %p6540_p10  ;;  %s179_s7 = int_to_ptr.vmem [resolvable:$true] %s178_s7 }
  0x12   : > { %p6358_p13 = scmp.ne.s32.totalorder %s8840_s3, %s6357_s11  ;;  %p6364_p3 = scmp.lt.u32.totalorder %s6357_s11, %s8840_s3 }
  0x13   : > { %p6548_p12 = pnand %p8843_p9, %p6258_p11 }
  0x15   : > { %p6359_p0 = pneg %p6548_p12 }
  0x17   : > { %p6360_p1 = pnand %p6359_p0, %p6358_p13 }
  0x19   : > { %p6361_p2 = pneg %p6360_p1 }
  0x1b   : > { %p6366_p4 = pnand %p6364_p3, %p6361_p2 }
  0x1d   : > { %6369 = shalt.err (!%p6366_p4)
}
  0x1e   : > { %s6370_s16 = scalar_lea.vmem %s179_s7, 18432  ;;  %p6378_p9 = scmp.lt.s32.totalorder %s179_s7, %s179_s7 }
  0x1f   : > { %p6371_p7 = scmp.ne.s32.totalorder %s179_s7, %s6370_s16  ;;  %p6379_p6 = scmp.lt.s32.totalorder %s6370_s16, %s6370_s16 }
  0x21   : > { %p6373_p8 = pnand %p6371_p7, %p6359_p0  ;;  %p6380_p5 = por %p6379_p6, %p6378_p9 }
  0x23   : > { %p6374_p11 = pneg %p6373_p8 }
  0x25   : > { %p6381_p10 = pnand %p6380_p5, %p6374_p11 }
  0x27   : > { %6384 = shalt.err (!%p6381_p10)
}
  0x28   : > { %s6454_s17 = smov 128   ;;  %s6455_s23 = smov 8  }
  0x29   : > { %6261 = dma.hbm_to_vmem [thread:$0]  (!%p6548_p12), %s8840_s3, 18432, %s179_s7, [#allocation5], %s6454_s17, %s6454_s17, %s6455_s23  }
  0x2a   : > { %p8957_p13 = scmp.ne.s32.totalorder %s8955_s30, 0 }
  0x2c   : > { %205 = sbr.rel (%p8957_p13) target bundleno = 1480 (0x5c8), region = 40 }
  0x33   : > { %p8958_p1 = scmp.eq.s32.totalorder %s6512_s22, 0 }
  0x35   : > { %6430 = dma.done.wait (%p8958_p1), [#allocation5], 18432   ;;  %p8959_p0 = pmov %p8958_p1 }
  0x36   : > { %v8855_v0 = vmov 0.0|0.0   ;;  %p233_p5 = scmp.lt.s32.totalorder %s6512_s22, 1  ;;  %v1230_v1 = vld [vmem:[%s8838_s1] sm:$0xff]  ;;  %v1231_v2 = vld [vmem:[%s8838_s1 + $0x8] sm:$0xff]  ;;  %v1232_v3 = vld [vmem:[%s8838_s1 + $0x10] sm:$0xff]  ;;  %vm426_vm0 = vcmask 1046528  }
  0x37   : > { %6432 = vsyncadd (%p8959_p0), [#allocation5], 4294948864  ;;  %5339 = vmatprep.subr.bf16.mxu0 %v8855_v0  ;;  %v5340_v4 = vpack.c.bf16 %v1231_v2, %v1230_v1  ;;  %v1233_v5 = vld [vmem:[%s8838_s1 + $0x18] sm:$0xff]  ;;  %v1234_v7 = vld [vmem:[%s8838_s1 + $0x20] sm:$0xff]  ;;  %vm571_vm1 = vcmask 1045504   ;;  %s5082_s25 = sshll.u32 %s6512_s22, 12 }
  0x38   : > { %s234_s6 = scalar_select %p233_p5, %s6512_s22, 1  ;;  %v5343_v6 = vpack.c.bf16 %v1233_v5, %v1232_v3  ;;  %v1235_v8 = vld [vmem:[%s8838_s1 + $0x28] sm:$0xff]  ;;  %v1236_v10 = vld [vmem:[%s8838_s1 + $0x30] sm:$0xff]  ;;  %v1237_v11 = vld [vmem:[%s8838_s1 + $0x38] sm:$0xff] }
  0x39   : > { %5341 = vmatpush1.bf16.msra.mxu0 %v5340_v4  ;;  %v5346_v9 = vpack.c.bf16 %v1235_v8, %v1234_v7  ;;  %v5349_v13 = vpack.c.bf16 %v1237_v11, %v1236_v10  ;;  %v1238_v16 = vld [vmem:[%s8838_s1 + $0x40] sm:$0xff]  ;;  %v1239_v17 = vld [vmem:[%s8838_s1 + $0x48] sm:$0xff]  ;;  %v1240_v22 = vld [vmem:[%s8838_s1 + $0x50] sm:$0xff]  ;;  %s8788_s9 = scalar_lea.hbm %s8842_s5, %s5082_s25  ;;  %p9086_p9 = scmp.ne.s32.totalorder %s8953_s28, 0 }
  0x3a   : > { %s6251_s14 = smul.u32 432, %s234_s6  ;;  %5342 = vmatprep.subr.bf16.mxu0 %v8855_v0  ;;  %v5352_v21 = vpack.c.bf16 %v1239_v17, %v1238_v16  ;;  %v1241_v23 = vld [vmem:[%s8838_s1 + $0x58] sm:$0xff]  ;;  %v1242_v26 = vld [vmem:[%s8838_s1 + $0x60] sm:$0xff]  ;;  %v1243_v27 = vld [vmem:[%s8838_s1 + $0x68] sm:$0xff]  ;;  %s6458_s30 = smov [#allocation7]  }
  0x3b   : > { %v5355_v25 = vpack.c.bf16 %v1241_v23, %v1240_v22  ;;  %v5358_v28 = vpack.c.bf16 %v1243_v27, %v1242_v26  ;;  %v1244_v29 = vld [vmem:[%s8838_s1 + $0x70] sm:$0xff]  ;;  %v1245_v30 = vld [vmem:[%s8838_s1 + $0x78] sm:$0xff]  ;;  %v1246_v32 = vld [vmem:[%s8838_s1 + $0x80] sm:$0xff]  ;;  %s6389_s10 = sshll.u32 %s6458_s30, 4  ;;  %s6390_s10 = int_to_ptr.vmem [resolvable:$false] %s6389_s10 }
  0x3c   : > { %s6599_s8 = scalar_lea.vmem %s8837_s0, %s6251_s14  ;;  %v5361_v31 = vpack.c.bf16 %v1245_v30, %v1244_v29  ;;  %v1247_v33 = vld [vmem:[%s8838_s1 + $0x88] sm:$0xff]  ;;  %v1248_v35 = vld [vmem:[%s8838_s1 + $0x90] sm:$0xff]  ;;  %v1249_v36 = vld [vmem:[%s8838_s1 + $0x98] sm:$0xff]  ;;  %s230_s14 = sand.u32 1, %s6443_s19  }
  0x3d   : > { %5344 = vmatpush1.bf16.msra.mxu0 %v5343_v6  ;;  %v238_v12 = vld [vmem:[%s6599_s8] sm:$0xff]  ;;  %v239_v14 = vld [vmem:[%s6599_s8 + $0x8] sm:$0xff]  ;;  %v5364_v34 = vpack.c.bf16 %v1247_v33, %v1246_v32  ;;  %v5367_v37 = vpack.c.bf16 %v1249_v36, %v1248_v35  ;;  %v1252_v41 = vld [vmem:[%s8838_s1 + $0xb0] sm:$0xff]  ;;  %s5073_s17 = sshll.u32 %s230_s14, 8  ;;  %s8796_s22 = scalar_lea.sflag [#allocation6], %s230_s14 }
  0x3e   : > { %5345 = vmatprep.subr.bf16.mxu0 %v8855_v0  ;;  %v6610_v15 = vmax.f32 %v238_v12, 0.0  ;;  %v6619_v18 = vmax.f32 %v239_v14, 0.0  ;;  %v1250_v38 = vld [vmem:[%s8838_s1 + $0xa0] sm:$0xff]  ;;  %v1251_v39 = vld [vmem:[%s8838_s1 + $0xa8] sm:$0xff]  ;;  %v1253_v42 = vld [vmem:[%s8838_s1 + $0xb8] sm:$0xff]  ;;  %s8625_s23 = scalar_lea.vmem [#allocation7], %s5073_s17 }
  0x3f   : > { %v5370_v40 = vpack.c.bf16 %v1251_v39, %v1250_v38  ;;  %v5373_v43 = vpack.c.bf16 %v1253_v42, %v1252_v41  ;;  %v1254_v44 = vld [vmem:[%s8838_s1 + $0xc0] sm:$0xff]  ;;  %v1255_v45 = vld [vmem:[%s8838_s1 + $0xc8] sm:$0xff]  ;;  %v1256_v47 = vld [vmem:[%s8838_s1 + $0xd0] sm:$0xff]  ;;  %s4993_s26 = sshll.u32 %s8625_s23, 4  ;;  %s6391_s11 = scalar_lea.vmem %s6390_s10, 8192  ;;  %s8790_s26 = int_to_ptr.vmem [resolvable:$true] %s4993_s26 }
  0x40   : > { %v427_v19 = vrot.slane %v6610_v15, 1  ;;  %v428_v20 = vrot.slane %v6619_v18, 1  ;;  %v5376_v46 = vpack.c.bf16 %v1255_v45, %v1254_v44  ;;  %v1257_v48 = vld [vmem:[%s8838_s1 + $0xd8] sm:$0xff]  ;;  %v1258_v50 = vld [vmem:[%s8838_s1 + $0xe0] sm:$0xff]  ;;  %v1259_v51 = vld [vmem:[%s8838_s1 + $0xe8] sm:$0xff]  ;;  %v572_v4 = vrot.slane %v6610_v15, 2  ;;  %p6392_p2 = scmp.lt.s32.totalorder %s8790_s26, %s6390_s10 }
  0x41   : > { %5347 = vmatpush1.bf16.msra.mxu0 %v5346_v9  ;;  %v5379_v49 = vpack.c.bf16 %v1257_v48, %v1256_v47  ;;  %v240_v52 = vld [vmem:[%s6599_s8 + $0x10] sm:$0x3]  ;;  %v5382_v53 = vpack.c.bf16 %v1259_v51, %v1258_v50  ;;  %v1261_v55 = vld [vmem:[%s8838_s1 + $0xf8] sm:$0xff]  ;;  %v242_v58 = vld [vmem:[%s6599_s8 + $0x20] sm:$0xff]  ;;  %v573_v5 = vrot.slane %v6619_v18, 2  ;;  %s6385_s7 = scalar_lea.vmem %s8790_s26, 4096 }
  0x42   : > { %5348 = vmatprep.subr.bf16.mxu0 %v8855_v0  ;;  %v429_v24 = vsel %vm426_vm0, %v427_v19, %v428_v20  ;;  %v1260_v54 = vld [vmem:[%s8838_s1 + $0xf0] sm:$0xff]  ;;  %v294_v56 = vmax.f32 %v240_v52, 0.0  ;;  %v241_v57 = vld [vmem:[%s6599_s8 + $0x18] sm:$0xff]  ;;  %v1262_v60 = vld [vmem:[%s8838_s1 + $0x100] sm:$0xff]  ;;  %v6715_v1 = vmax.f32 %v242_v58, 0.0  ;;  %p6386_p6 = scmp.ne.s32.totalorder %s8790_s26, %s6385_s7  ;;  %p6393_p3 = scmp.lt.s32.totalorder %s6391_s11, %s6385_s7 }
  0x43   : > { %1445 = vmatprep.mubr.f32.mxu0 %v429_v24  ;;  %v5385_v59 = vpack.c.bf16 %v1261_v55, %v1260_v54  ;;  %v1263_v61 = vld [vmem:[%s8838_s1 + $0x108] sm:$0xff]  ;;  %v6713_v63 = vmax.f32 %v241_v57, 0.0  ;;  %v1264_v9 = vld [vmem:[%s8838_s1 + $0x110] sm:$0xff]  ;;  %v1265_v10 = vld [vmem:[%s8838_s1 + $0x118] sm:$0xff]  ;;  %v6738_v14 = vsel %vm571_vm1, %v572_v4, %v573_v5 }
  0x44   : > { %v430_v62 = vrot.slane %v294_v56, 1  ;;  %v6718_v2 = vld [vmem:[%s6599_s8 + $0x28] sm:$0x3]  ;;  %v5388_v3 = vpack.c.bf16 %v1263_v61, %v1262_v60  ;;  %v433_v8 = vrot.slane %v6715_v1, 1  ;;  %v244_v12 = vld [vmem:[%s6599_s8 + $0x30] sm:$0xff]  ;;  %v5391_v16 = vpack.c.bf16 %v1265_v10, %v1264_v9  ;;  %v1270_v39 = vld [vmem:[%s8838_s1 + $0x140] sm:$0xff]  ;;  %p6387_p10 = pnand %p6386_p6, %p9086_p9  ;;  %p6394_p4 = por %p6393_p3, %p6392_p2 }
  0x45   : > { %5350 = vmatpush1.bf16.msra.mxu0 %v5349_v13  ;;  %v432_v7 = vrot.slane %v6713_v63, 1  ;;  %v8853_v11 = vmax.f32 %v6718_v2, 0.0  ;;  %v245_v13 = vld [vmem:[%s6599_s8 + $0x38] sm:$0xff]  ;;  %v575_v17 = vrot.slane %v294_v56, 2  ;;  %v1267_v23 = vld [vmem:[%s8838_s1 + $0x128] sm:$0xff]  ;;  %v248_v33 = vld [vmem:[%s6599_s8 + $0x50] sm:$0xff] }
  0x46   : > { %5351 = vmatprep.subr.bf16.mxu0 %v8855_v0  ;;  %v431_v6 = vsel %vm426_vm0, %v428_v20, %v430_v62  ;;  %v6749_v22 = vmax.f32 %v245_v13, 0.0  ;;  %v246_v24 = vld [vmem:[%s6599_s8 + $0x40] sm:$0x3]  ;;  %v247_v32 = vld [vmem:[%s6599_s8 + $0x48] sm:$0xff]  ;;  %v6784_v38 = vmax.f32 %v248_v33, 0.0  ;;  %v1273_v50 = vld [vmem:[%s8838_s1 + $0x158] sm:$0xff]  ;;  %p6388_p12 = pneg %p6387_p10 }
  0x47   : > { %v6742_v19 = vsel %vm426_vm0, %v432_v7, %v433_v8  ;;  %v435_v20 = vrot.slane %v8853_v11, 1  ;;  %v300_v30 = vmax.f32 %v246_v24, 0.0  ;;  %v6794_v41 = vld [vmem:[%s6599_s8 + $0x58] sm:$0x3]  ;;  %v250_v51 = vld [vmem:[%s6599_s8 + $0x60] sm:$0xff]  ;;  %v251_v52 = vld [vmem:[%s6599_s8 + $0x68] sm:$0xff] }
  0x48   : > { %v438_v29 = vrot.slane %v6749_v22, 1  ;;  %v583_v44 = vrot.slane %v6749_v22, 2  ;;  %v443_v47 = vrot.slane %v6784_v38, 1  ;;  %v8852_v48 = vmax.f32 %v6794_v41, 0.0  ;;  %v1274_v60 = vld [vmem:[%s8838_s1 + $0x160] sm:$0xff]  ;;  %v1275_v61 = vld [vmem:[%s8838_s1 + $0x168] sm:$0xff]  ;;  %p6395_p7 = pnand %p6394_p4, %p6388_p12 }
  0x49   : > { %5353 = vmatpush1.bf16.msra.mxu0 %v5352_v21  ;;  %v6747_v21 = vmax.f32 %v244_v12, 0.0  ;;  %v6764_v27 = vsel %vm426_vm0, %v433_v8, %v435_v20  ;;  %v440_v36 = vrot.slane %v300_v30, 1  ;;  %v585_v55 = vrot.slane %v300_v30, 2  ;;  %v6838_v62 = vld [vmem:[%s6599_s8 + $0x70] sm:$0x3]  ;;  %v1277_v10 = vld [vmem:[%s8838_s1 + $0x178] sm:$0xff] }
  0x4a   : > { %5354 = vmatprep.subr.bf16.mxu0 %v8855_v0  ;;  %v445_v57 = vrot.slane %v8852_v48, 1  ;;  %v6826_v58 = vmax.f32 %v250_v51, 0.0  ;;  %v5406_v4 = vpack.c.bf16 %v1275_v61, %v1274_v60  ;;  %v8851_v8 = vmax.f32 %v6838_v62, 0.0  ;;  %v1276_v9 = vld [vmem:[%s8838_s1 + $0x170] sm:$0xff]  ;;  %v253_v12 = vld [vmem:[%s6599_s8 + $0x78] sm:$0xff]  ;;  %v254_v13 = vld [vmem:[%s6599_s8 + $0x80] sm:$0xff] }
  0x4b   : > { %v6801_v45 = vsel %vm426_vm0, %v438_v29, %v440_v36  ;;  %v1278_v24 = vld [vmem:[%s8838_s1 + $0x180] sm:$0xff]  ;;  %v1280_v33 = vld [vmem:[%s8838_s1 + $0x190] sm:$0xff]  ;;  %v1285_v61 = vld [vmem:[%s8838_s1 + $0x1b8] sm:$0xff] }
  0x4c   : > { %v450_v20 = vrot.slane %v8851_v8, 1  ;;  %v256_v36 = vld [vmem:[%s6599_s8 + $0x90] sm:$0xff]  ;;  %v7074_v8 = vld [vmem:[%s6599_s8 + $0x118] sm:$0x3] }
  0x4d   : > { %5356 = vmatpush1.bf16.msra.mxu0 %v5355_v25  ;;  %v6759_v25 = vsel %vm571_vm1, %v573_v5, %v575_v17  ;;  %v6846_v5 = vsel %vm426_vm0, %v443_v47, %v445_v57  ;;  %v1284_v60 = vld [vmem:[%s8838_s1 + $0x1b0] sm:$0xff] }
  0x4e   : > { %5357 = vmatprep.subr.bf16.mxu0 %v8855_v0 }
  0x51   : > { %5359 = vmatpush1.bf16.msra.mxu0 %v5358_v28  ;;  %v437_v28 = vrot.slane %v6747_v21, 1 }
  0x52   : > { %5360 = vmatprep.subr.bf16.mxu0 %v8855_v0 }
  0x53   : > { %v6780_v35 = vsel %vm426_vm0, %v437_v28, %v438_v29  ;;  %v6879_v28 = vld [vmem:[%s6599_s8 + $0x88] sm:$0x3] }
  0x55   : > { %5362 = vmatpush1.bf16.msra.mxu0 %v5361_v31  ;;  %v1268_v31 = vld [vmem:[%s8838_s1 + $0x130] sm:$0xff] }
  0x56   : > { %5363 = vmatprep.subr.bf16.mxu0 %v8855_v0 }
  0x59   : > { %5365 = vmatpush1.bf16.msra.mxu0 %v5364_v34 }
  0x5a   : > { %5366 = vmatprep.subr.bf16.mxu0 %v8855_v0 }
  0x5d   : > { %5368 = vmatpush1.bf16.msra.mxu0 %v5367_v37  ;;  %v6782_v37 = vmax.f32 %v247_v32, 0.0  ;;  %v8850_v32 = vmax.f32 %v6879_v28, 0.0 }
  0x5e   : > { %5369 = vmatprep.subr.bf16.mxu0 %v8855_v0 }
  0x61   : > { %5371 = vmatpush1.bf16.msra.mxu0 %v5370_v40  ;;  %v1271_v40 = vld [vmem:[%s8838_s1 + $0x148] sm:$0xff] }
  0x62   : > { %5372 = vmatprep.subr.bf16.mxu0 %v8855_v0  ;;  %v5400_v42 = vpack.c.bf16 %v1271_v40, %v1270_v39  ;;  %v257_v39 = vld [vmem:[%s6599_s8 + $0x98] sm:$0xff] }
  0x65   : > { %5374 = vmatpush1.bf16.msra.mxu0 %v5373_v43  ;;  %v582_v43 = vrot.slane %v6747_v21, 2 }
  0x66   : > { %5375 = vmatprep.subr.bf16.mxu0 %v8855_v0 }
  0x69   : > { %5377 = vmatpush1.bf16.msra.mxu0 %v5376_v46  ;;  %v442_v46 = vrot.slane %v6782_v37, 1 }
  0x6a   : > { %5378 = vmatprep.subr.bf16.mxu0 %v8855_v0 }
  0x6b   : > { %v6822_v56 = vsel %vm426_vm0, %v442_v46, %v443_v47  ;;  %v6907_v46 = vmax.f32 %v257_v39, 0.0  ;;  %v1282_v47 = vld [vmem:[%s8838_s1 + $0x1a0] sm:$0xff] }
  0x6c   : > { %v262_v39 = vld [vmem:[%s6599_s8 + $0xc0] sm:$0xff] }
  0x6d   : > { %5380 = vmatpush1.bf16.msra.mxu0 %v5379_v49  ;;  %v1272_v49 = vld [vmem:[%s8838_s1 + $0x150] sm:$0xff]  ;;  %8965 = vst [vmem:[#allocation15_spill] sm:$0xff] %v6907_v46 }
  0x6e   : > { %5381 = vmatprep.subr.bf16.mxu0 %v8855_v0  ;;  %v5403_v54 = vpack.c.bf16 %v1273_v50, %v1272_v49  ;;  %v1283_v49 = vld [vmem:[%s8838_s1 + $0x1a8] sm:$0xff]  ;;  %v6917_v50 = vld [vmem:[%s6599_s8 + $0xa0] sm:$0x3] }
  0x6f   : > { %v5418_v51 = vpack.c.bf16 %v1283_v49, %v1282_v47  ;;  %v8849_v57 = vmax.f32 %v6917_v50, 0.0 }
  0x71   : > { %5383 = vmatpush1.bf16.msra.mxu0 %v5382_v53  ;;  %v6816_v53 = vsel %vm571_vm1, %v582_v43, %v583_v44  ;;  %v455_v43 = vrot.slane %v8850_v32, 1 }
  0x72   : > { %5384 = vmatprep.subr.bf16.mxu0 %v8855_v0  ;;  %5211 = vmatprep.mubr.f32.mxu1 %v6816_v53 }
  0x75   : > { %5386 = vmatpush1.bf16.msra.mxu0 %v5385_v59  ;;  %v6828_v59 = vmax.f32 %v251_v52, 0.0 }
  0x76   : > { %5387 = vmatprep.subr.bf16.mxu0 %v8855_v0 }
  0x77   : > { %8960 = vst [vmem:[#allocation10_spill] sm:$0xff] %v6828_v59  ;;  %v448_v7 = vrot.slane %v6828_v59, 1 }
  0x78   : > { %1446 = vmatmul.mubr.f32.vlgmr.msra.gmra.mrb[0].mxu0 %v6610_v15  ;;  %v1266_v15 = vld [vmem:[%s8838_s1 + $0x120] sm:$0xff] }
  0x79   : > { %5389 = vmatpush1.bf16.msra.mxu0 %v5388_v3  ;;  %1450 = vmatprep.mubr.f32.mxu0 %v431_v6  ;;  %v5394_v26 = vpack.c.bf16 %v1267_v23, %v1266_v15  ;;  %v6841_v3 = vsel %vm571_vm1, %v583_v44, %v585_v55  ;;  %v447_v6 = vrot.slane %v6826_v58, 1  ;;  %v6867_v15 = vmax.f32 %v253_v12, 0.0 }
  0x7a   : > { %5390 = vmatprep.subr.bf16.mxu0 %v8855_v0  ;;  %v6869_v23 = vmax.f32 %v254_v13, 0.0  ;;  %v6884_v30 = vsel %vm426_vm0, %v448_v7, %v450_v20  ;;  %v6905_v44 = vmax.f32 %v256_v36, 0.0  ;;  %v458_v55 = vrot.slane %v6907_v46, 1  ;;  %v1287_v20 = vld [vmem:[%s8838_s1 + $0x1c8] sm:$0xff]  ;;  %v1289_v36 = vld [vmem:[%s8838_s1 + $0x1d8] sm:$0xff] }
  0x7b   : > { %v6863_v17 = vsel %vm426_vm0, %v447_v6, %v448_v7  ;;  %8963 = vst [vmem:[#allocation13_spill] sm:$0xff] %v6884_v30  ;;  %v260_v6 = vld [vmem:[%s6599_s8 + $0xb0] sm:$0xff]  ;;  %v5421_v7 = vpack.c.bf16 %v1285_v61, %v1284_v60  ;;  %v1291_v60 = vld [vmem:[%s8838_s1 + $0x1e8] sm:$0xff] }
  0x7c   : > { %1451 = vmatmul.mubr.f32.gmra.mrb[2].mxu0 %v6619_v18  ;;  %v1269_v18 = vld [vmem:[%s8838_s1 + $0x138] sm:$0xff]  ;;  %8961 = vst [vmem:[#allocation11_spill] sm:$0xff] %v6863_v17  ;;  %8962 = vst [vmem:[#allocation12_spill] sm:$0xff] %v6869_v23  ;;  %v6945_v13 = vmax.f32 %v260_v6, 0.0  ;;  %v6993_v61 = vld [vmem:[%s6599_s8 + $0xd0] sm:$0x3] }
  0x7d   : > { %1455 = vmatprep.mubr.f32.mxu0 %v6742_v19  ;;  %5392 = vmatpush1.bf16.msra.mxu0 %v5391_v16  ;;  %v5397_v34 = vpack.c.bf16 %v1269_v18, %v1268_v31  ;;  %v5409_v16 = vpack.c.bf16 %v1277_v10, %v1276_v9  ;;  %v452_v31 = vrot.slane %v6867_v15, 1  ;;  %v453_v18 = vrot.slane %v6869_v23, 1 }
  0x7e   : > { %5393 = vmatprep.subr.bf16.mxu0 %v8855_v0  ;;  %v460_v10 = vrot.slane %v8849_v57, 1  ;;  %8969 = vst [vmem:[#allocation19_spill] sm:$0xff] %v6945_v13 }
  0x7f   : > { %v6922_v52 = vsel %vm426_vm0, %v453_v18, %v455_v43 }
  0x80   : > { %1456 = vmatmul.mubr.f32.gmra.mrb[4].mxu0 %v6713_v63  ;;  %8966 = vst [vmem:[#allocation16_spill] sm:$0xff] %v6922_v52 }
  0x81   : > { %1460 = vmatprep.mubr.f32.mxu0 %v6764_v27  ;;  %5395 = vmatpush1.bf16.msra.mxu0 %v5394_v26  ;;  %v1279_v26 = vld [vmem:[%s8838_s1 + $0x188] sm:$0xff] }
  0x82   : > { %5396 = vmatprep.subr.bf16.mxu0 %v8855_v0  ;;  %v5412_v29 = vpack.c.bf16 %v1279_v26, %v1278_v24  ;;  %v6955_v24 = vld [vmem:[%s6599_s8 + $0xb8] sm:$0x3] }
  0x84   : > { %1461 = vmatmul.mubr.f32.gmra.mrb[6].mxu0 %v6715_v1 }
  0x85   : > { %1465 = vmatprep.mubr.f32.mxu0 %v6780_v35  ;;  %5398 = vmatpush1.bf16.msra.mxu0 %v5397_v34  ;;  %v1281_v34 = vld [vmem:[%s8838_s1 + $0x198] sm:$0xff] }
  0x86   : > { %5399 = vmatprep.subr.bf16.mxu0 %v8855_v0  ;;  %v5415_v40 = vpack.c.bf16 %v1281_v34, %v1280_v33  ;;  %v8847_v33 = vmax.f32 %v6955_v24, 0.0  ;;  %v1288_v34 = vld [vmem:[%s8838_s1 + $0x1d0] sm:$0xff] }
  0x87   : > { %v5427_v43 = vpack.c.bf16 %v1289_v36, %v1288_v34 }
  0x88   : > { %1466 = vmatmul.mubr.f32.gmra.mrb[8].mxu0 %v6747_v21  ;;  %v465_v49 = vrot.slane %v8847_v33, 1 }
  0x89   : > { %1470 = vmatprep.mubr.f32.mxu0 %v6801_v45  ;;  %5401 = vmatpush1.bf16.msra.mxu0 %v5400_v42  ;;  %v6901_v42 = vsel %vm426_vm0, %v452_v31, %v453_v18  ;;  %v463_v18 = vrot.slane %v6945_v13, 1 }
  0x8a   : > { %5402 = vmatprep.subr.bf16.mxu0 %v8855_v0  ;;  %8964 = vst [vmem:[#allocation14_spill] sm:$0xff] %v6901_v42 }
  0x8b   : > { %v6998_v6 = vsel %vm426_vm0, %v463_v18, %v465_v49  ;;  %v7025_v49 = vld [vmem:[%s6599_s8 + $0xe8] sm:$0x3] }
  0x8c   : > { %1471 = vmatmul.mubr.f32.gmra.mrb[10].mxu0 %v6749_v22  ;;  %8972 = vst [vmem:[#allocation22_spill] sm:$0xff] %v6998_v6 }
  0x8d   : > { %1475 = vmatprep.mubr.f32.mxu0 %v6822_v56  ;;  %5404 = vmatpush1.bf16.msra.mxu0 %v5403_v54  ;;  %v457_v54 = vrot.slane %v6905_v44, 1 }
  0x8e   : > { %5405 = vmatprep.subr.bf16.mxu0 %v8855_v0 }
  0x8f   : > { %v6939_v9 = vsel %vm426_vm0, %v457_v54, %v458_v55 }
  0x90   : > { %1476 = vmatmul.mubr.f32.gmra.mrb[12].mxu0 %v6782_v37  ;;  %8967 = vst [vmem:[#allocation17_spill] sm:$0xff] %v6939_v9 }
  0x91   : > { %1480 = vmatprep.mubr.f32.mxu0 %v6846_v5  ;;  %5407 = vmatpush1.bf16.msra.mxu0 %v5406_v4  ;;  %v259_v4 = vld [vmem:[%s6599_s8 + $0xa8] sm:$0xff] }
  0x92   : > { %5408 = vmatprep.subr.bf16.mxu0 %v8855_v0  ;;  %v6943_v12 = vmax.f32 %v259_v4, 0.0 }
  0x94   : > { %1481 = vmatmul.mubr.f32.gmra.mrb[14].mxu0 %v6784_v38  ;;  %8968 = vst [vmem:[#allocation18_spill] sm:$0xff] %v6943_v12  ;;  %v462_v31 = vrot.slane %v6943_v12, 1 }
  0x95   : > { %1485 = vmatprep.mubr.f32.mxu0 %v6863_v17  ;;  %5410 = vmatpush1.bf16.msra.mxu0 %v5409_v16  ;;  %v1286_v16 = vld [vmem:[%s8838_s1 + $0x1c0] sm:$0xff] }
  0x96   : > { %5411 = vmatprep.subr.bf16.mxu0 %v8855_v0  ;;  %v5424_v26 = vpack.c.bf16 %v1287_v20, %v1286_v16  ;;  %v6977_v47 = vsel %vm426_vm0, %v462_v31, %v463_v18  ;;  %v8846_v16 = vmax.f32 %v6993_v61, 0.0  ;;  %v1292_v20 = vld [vmem:[%s8838_s1 + $0x1f0] sm:$0xff]  ;;  %v265_v31 = vld [vmem:[%s6599_s8 + $0xd8] sm:$0xff]  ;;  %v266_v18 = vld [vmem:[%s6599_s8 + $0xe0] sm:$0xff] }
  0x97   : > { %8971 = vst [vmem:[#allocation21_spill] sm:$0xff] %v6977_v47 }
  0x98   : > { %1486 = vmatmul.mubr.f32.gmra.mrb[16].mxu0 %v6826_v58 }
  0x99   : > { %1490 = vmatprep.mubr.f32.mxu0 %v6884_v30  ;;  %5413 = vmatpush1.bf16.msra.mxu0 %v5412_v29  ;;  %v6960_v29 = vsel %vm426_vm0, %v458_v55, %v460_v10  ;;  %v1290_v55 = vld [vmem:[%s8838_s1 + $0x1e0] sm:$0xff] }
  0x9a   : > { %5414 = vmatprep.subr.bf16.mxu0 %v8855_v0  ;;  %8970 = vst [vmem:[#allocation20_spill] sm:$0xff] %v6960_v29  ;;  %v5430_v4 = vpack.c.bf16 %v1291_v60, %v1290_v55 }
  0x9c   : > { %1491 = vmatmul.mubr.f32.gmra.mrb[18].mxu0 %v6828_v59 }
  0x9d   : > { %1495 = vmatprep.mubr.f32.mxu0 %v6901_v42  ;;  %5416 = vmatpush1.bf16.msra.mxu0 %v5415_v40  ;;  %v263_v40 = vld [vmem:[%s6599_s8 + $0xc8] sm:$0xff]  ;;  %v7170_v42 = vld [vmem:[%s6599_s8 + $0x178] sm:$0x3] }
  0x9e   : > { %5417 = vmatprep.subr.bf16.mxu0 %v8855_v0  ;;  %v6983_v54 = vmax.f32 %v263_v40, 0.0  ;;  %v7019_v40 = vmax.f32 %v265_v31, 0.0  ;;  %v8900_v17 = vmax.f32 %v7170_v42, 0.0 }
  0xa0   : > { %1496 = vmatmul.mubr.f32.gmra.mrb[20].mxu0 %v6867_v15  ;;  %v468_v10 = vrot.slane %v6983_v54, 1  ;;  %v472_v60 = vrot.slane %v7019_v40, 1 }
  0xa1   : > { %1500 = vmatprep.mubr.f32.mxu0 %v6922_v52  ;;  %5419 = vmatpush1.bf16.msra.mxu0 %v5418_v51  ;;  %v6981_v51 = vmax.f32 %v262_v39, 0.0  ;;  %v470_v39 = vrot.slane %v8846_v16, 1  ;;  %v284_v52 = vld [vmem:[%s6599_s8 + $0x170] sm:$0xff] }
  0xa2   : > { %5420 = vmatprep.subr.bf16.mxu0 %v8855_v0 }
  0xa3   : > { %v7030_v55 = vsel %vm426_vm0, %v468_v10, %v470_v39  ;;  %v7050_v39 = vld [vmem:[%s6599_s8 + $0x100] sm:$0x3] }
  0xa4   : > { %1501 = vmatmul.mubr.f32.gmra.mrb[22].mxu0 %v6869_v23  ;;  %8974 = vst [vmem:[#allocation24_spill] sm:$0xff] %v7030_v55 }
  0xa5   : > { %1505 = vmatprep.mubr.f32.mxu0 %v6939_v9  ;;  %5422 = vmatpush1.bf16.msra.mxu0 %v5421_v7  ;;  %v467_v7 = vrot.slane %v6981_v51, 1 }
  0xa6   : > { %5423 = vmatprep.subr.bf16.mxu0 %v8855_v0 }
  0xa7   : > { %v7015_v36 = vsel %vm426_vm0, %v467_v7, %v468_v10  ;;  %v8848_v7 = vmax.f32 %v7025_v49, 0.0 }
  0xa8   : > { %1506 = vmatmul.mubr.f32.gmra.mrb[24].mxu0 %v6905_v44  ;;  %8973 = vst [vmem:[#allocation23_spill] sm:$0xff] %v7015_v36 }
  0xa9   : > { %1510 = vmatprep.mubr.f32.mxu0 %v6960_v29  ;;  %5425 = vmatpush1.bf16.msra.mxu0 %v5424_v26  ;;  %v1293_v26 = vld [vmem:[%s8838_s1 + $0x1f8] sm:$0xff]  ;;  %v475_v10 = vrot.slane %v8848_v7, 1  ;;  %v8854_v7 = vmax.f32 %v7050_v39, 0.0  ;;  %v7146_v29 = vld [vmem:[%s6599_s8 + $0x160] sm:$0x3] }
  0xaa   : > { %5426 = vmatprep.subr.bf16.mxu0 %v8855_v0  ;;  %v5433_v34 = vpack.c.bf16 %v1293_v26, %v1292_v20  ;;  %v268_v20 = vld [vmem:[%s6599_s8 + $0xf0] sm:$0xff]  ;;  %v269_v26 = vld [vmem:[%s6599_s8 + $0xf8] sm:$0xff] }
  0xac   : > { %1511 = vmatmul.mubr.f32.gmra.mrb[26].mxu0 %v6907_v46 }
  0xad   : > { %1515 = vmatprep.mubr.f32.mxu0 %v6977_v47  ;;  %5428 = vmatpush1.bf16.msra.mxu0 %v5427_v43  ;;  %v7021_v43 = vmax.f32 %v266_v18, 0.0  ;;  %v7045_v18 = vmax.f32 %v268_v20, 0.0  ;;  %v271_v20 = vld [vmem:[%s6599_s8 + $0x108] sm:$0xff] }
  0xae   : > { %5429 = vmatprep.subr.bf16.mxu0 %v8855_v0 }
  0xb0   : > { %1516 = vmatmul.mubr.f32.gmra.mrb[28].mxu0 %v6943_v12 }
  0xb1   : > { %1520 = vmatprep.mubr.f32.mxu0 %v6998_v6  ;;  %5431 = vmatpush1.bf16.msra.mxu0 %v5430_v4  ;;  %v473_v4 = vrot.slane %v7021_v43, 1 }
  0xb2   : > { %5432 = vmatprep.subr.bf16.mxu0 %v8855_v0 }
  0xb3   : > { %v7041_v31 = vsel %vm426_vm0, %v472_v60, %v473_v4  ;;  %v7055_v16 = vsel %vm426_vm0, %v473_v4, %v475_v10  ;;  %v477_v60 = vrot.slane %v7045_v18, 1  ;;  %v480_v4 = vrot.slane %v8854_v7, 1 }
  0xb4   : > { %1521 = vmatmul.mubr.f32.gmra.mrb[30].mxu0 %v6945_v13  ;;  %8975 = vst [vmem:[#allocation25_spill] sm:$0xff] %v7041_v31  ;;  %8976 = vst [vmem:[#allocation26_spill] sm:$0xff] %v7055_v16  ;;  %v7069_v10 = vmax.f32 %v271_v20, 0.0  ;;  %v8865_v7 = vmax.f32 %v7074_v8, 0.0  ;;  %v274_v20 = vld [vmem:[%s6599_s8 + $0x120] sm:$0xff] }
  0xb5   : > { %1525 = vmatprep.mubr.f32.mxu0 %v7015_v36  ;;  %5434 = vmatpush1.bf16.msra.mxu0 %v5433_v34  ;;  %v7047_v34 = vmax.f32 %v269_v26, 0.0  ;;  %v272_v26 = vld [vmem:[%s6599_s8 + $0x110] sm:$0xff]  ;;  %v7122_v36 = vld [vmem:[%s6599_s8 + $0x148] sm:$0x3] }
  0xb6   : > { %5435 = vmatprep.subr.bf16.mxu0 %v8855_v0  ;;  %v7071_v32 = vmax.f32 %v272_v26, 0.0  ;;  %v275_v26 = vld [vmem:[%s6599_s8 + $0x128] sm:$0xff] }
  0xb7   : > { %v478_v33 = vrot.slane %v7047_v34, 1 }
  0xb8   : > { %1526 = vmatmul.mubr.f32.gmra.mrb[32].mxu0 %v6981_v51  ;;  %8978 = vst [vmem:[#allocation28_spill] sm:$0xff] %v7071_v32  ;;  %v483_v11 = vrot.slane %v7071_v32, 1 }
  0xb9   : > { %1530 = vmatprep.mubr.f32.mxu0 %v7030_v55  ;;  %v7065_v57 = vsel %vm426_vm0, %v477_v60, %v478_v33  ;;  %v7079_v48 = vsel %vm426_vm0, %v478_v33, %v480_v4  ;;  %v482_v60 = vrot.slane %v7069_v10, 1  ;;  %v485_v33 = vrot.slane %v8865_v7, 1 }
  0xba   : > { %8977 = vst [vmem:[#allocation27_spill] sm:$0xff] %v7065_v57  ;;  %8979 = vst [vmem:[#allocation29_spill] sm:$0xff] %v7079_v48  ;;  %v7093_v4 = vmax.f32 %v274_v20, 0.0  ;;  %v277_v20 = vld [vmem:[%s6599_s8 + $0x138] sm:$0xff] }
  0xbb   : > { %v7089_v0 = vsel %vm426_vm0, %v482_v60, %v483_v11 }
  0xbc   : > { %1531 = vmatmul.mubr.f32.gmra.mrb[34].mxu0 %v6983_v54  ;;  %8980 = vst [vmem:[#allocation30_spill] sm:$0xff] %v7089_v0  ;;  %8981 = vst [vmem:[#allocation31_spill] sm:$0xff] %v7093_v4  ;;  %v487_v60 = vrot.slane %v7093_v4, 1 }
  0xbd   : > { %1535 = vmatprep.mubr.f32.mxu0 %v7041_v31  ;;  %v7103_v31 = vsel %vm426_vm0, %v483_v11, %v485_v33  ;;  %v7117_v33 = vmax.f32 %v277_v20, 0.0  ;;  %v280_v20 = vld [vmem:[%s6599_s8 + $0x150] sm:$0xff] }
  0xbe   : > { %8983 = vst [vmem:[#allocation33_spill] sm:$0xff] %v7103_v31 }
  0xbf   : > { %8985 = vst [vmem:[#allocation35_spill] sm:$0xff] %v7117_v33 }
  0xc0   : > { %1536 = vmatmul.mubr.f32.gmra.mrb[36].mxu0 %v7019_v40 }
  0xc1   : > { %1540 = vmatprep.mubr.f32.mxu0 %v7055_v16  ;;  %v7098_v16 = vld [vmem:[%s6599_s8 + $0x130] sm:$0x3] }
  0xc2   : > { %v8876_v7 = vmax.f32 %v7098_v16, 0.0 }
  0xc4   : > { %1541 = vmatmul.mubr.f32.gmra.mrb[38].mxu0 %v7021_v43  ;;  %v490_v11 = vrot.slane %v8876_v7, 1  ;;  %v8887_v7 = vmax.f32 %v7122_v36, 0.0 }
  0xc5   : > { %1545 = vmatprep.mubr.f32.mxu0 %v7065_v57  ;;  %v7095_v57 = vmax.f32 %v275_v26, 0.0  ;;  %v278_v26 = vld [vmem:[%s6599_s8 + $0x140] sm:$0xff] }
  0xc7   : > { %8982 = vst [vmem:[#allocation32_spill] sm:$0xff] %v7095_v57 }
  0xc8   : > { %1546 = vmatmul.mubr.f32.gmra.mrb[40].mxu0 %v7045_v18 }
  0xc9   : > { %1550 = vmatprep.mubr.f32.mxu0 %v7079_v48  ;;  %v488_v48 = vrot.slane %v7095_v57, 1 }
  0xcb   : > { %v7113_v55 = vsel %vm426_vm0, %v487_v60, %v488_v48  ;;  %v7127_v6 = vsel %vm426_vm0, %v488_v48, %v490_v11  ;;  %v492_v60 = vrot.slane %v7117_v33, 1  ;;  %v495_v48 = vrot.slane %v8887_v7, 1 }
  0xcc   : > { %1551 = vmatmul.mubr.f32.gmra.mrb[42].mxu0 %v7047_v34  ;;  %8984 = vst [vmem:[#allocation34_spill] sm:$0xff] %v7113_v55  ;;  %8987 = vst [vmem:[#allocation37_spill] sm:$0xff] %v7127_v6  ;;  %v7141_v11 = vmax.f32 %v280_v20, 0.0  ;;  %v8901_v7 = vmax.f32 %v7146_v29, 0.0  ;;  %v283_v20 = vld [vmem:[%s6599_s8 + $0x168] sm:$0xff] }
  0xcd   : > { %1555 = vmatprep.mubr.f32.mxu0 %v7089_v0  ;;  %v7119_v0 = vmax.f32 %v278_v26, 0.0  ;;  %v281_v26 = vld [vmem:[%s6599_s8 + $0x158] sm:$0xff] }
  0xce   : > { %8989 = vst [vmem:[#allocation39_spill] sm:$0xff] %v7141_v11 }
  0xcf   : > { %8986 = vst [vmem:[#allocation36_spill] sm:$0xff] %v7119_v0 }
  0xd0   : > { %1556 = vmatmul.mubr.f32.gmra.mrb[44].mxu0 %v7069_v10 }
  0xd1   : > { %1560 = vmatprep.mubr.f32.mxu0 %v7103_v31  ;;  %v493_v31 = vrot.slane %v7119_v0, 1 }
  0xd3   : > { %v7137_v47 = vsel %vm426_vm0, %v492_v60, %v493_v31  ;;  %v7151_v9 = vsel %vm426_vm0, %v493_v31, %v495_v48  ;;  %v497_v60 = vrot.slane %v7141_v11, 1  ;;  %v7165_v31 = vmax.f32 %v283_v20, 0.0 }
  0xd4   : > { %1561 = vmatmul.mubr.f32.gmra.mrb[46].mxu0 %v7071_v32  ;;  %8988 = vst [vmem:[#allocation38_spill] sm:$0xff] %v7137_v47  ;;  %8991 = vst [vmem:[#allocation41_spill] sm:$0xff] %v7151_v9  ;;  %v7167_v48 = vmax.f32 %v284_v52, 0.0  ;;  %v505_v20 = vrot.slane %v8900_v17, 1 }
  0xd5   : > { %1565 = vmatprep.mubr.f32.mxu0 %v7113_v55  ;;  %v7143_v55 = vmax.f32 %v281_v26, 0.0 }
  0xd6   : > { %8992 = vst [vmem:[#allocation42_spill] sm:$0xff] %v7167_v48 }
  0xd7   : > { %8990 = vst [vmem:[#allocation40_spill] sm:$0xff] %v7143_v55 }
  0xd8   : > { %1566 = vmatmul.mubr.f32.gmra.mrb[48].mxu0 %v7093_v4 }
  0xd9   : > { %1570 = vmatprep.mubr.f32.mxu0 %v7127_v6  ;;  %v498_v6 = vrot.slane %v7143_v55, 1 }
  0xdb   : > { %v7161_v26 = vsel %vm426_vm0, %v497_v60, %v498_v6  ;;  %v503_v60 = vrot.slane %v7167_v48, 1 }
  0xdc   : > { %1571 = vmatmul.mubr.f32.gmra.mrb[50].mxu0 %v7095_v57 }
  0xdd   : > { %1575 = vmatprep.mubr.f32.mxu0 %v7137_v47  ;;  %v500_v47 = vrot.slane %v8901_v7, 1  ;;  %v577_v7 = vrot.slane %v6713_v63, 2 }
  0xdf   : > { %v7175_v30 = vsel %vm426_vm0, %v498_v6, %v500_v47  ;;  %v7190_v47 = vsel %vm426_vm0, %v503_v60, %v505_v20  ;;  %v1294_v6 = vld [vmem:[%s8838_s1 + $0x200] sm:$0xff]  ;;  %v1297_v20 = vld [vmem:[%s8838_s1 + $0x218] sm:$0xff] }
  0xe0   : > { %1576 = vmatmul.mubr.f32.gmra.mrb[52].mxu0 %v7117_v33  ;;  %8993 = vst [vmem:[#allocation43_spill] sm:$0xff] %v7175_v30  ;;  %8995 = vst [vmem:[#allocation45_spill] sm:$0xff] %v7190_v47 }
  0xe1   : > { %1580 = vmatprep.mubr.f32.mxu0 %v7151_v9  ;;  %v502_v9 = vrot.slane %v7165_v31, 1 }
  0xe3   : > { %v7183_v52 = vsel %vm426_vm0, %v502_v9, %v503_v60  ;;  %v1295_v9 = vld [vmem:[%s8838_s1 + $0x208] sm:$0xff]  ;;  %v1296_v60 = vld [vmem:[%s8838_s1 + $0x210] sm:$0xff] }
  0xe4   : > { %1581 = vmatmul.mubr.f32.gmra.mrb[54].mxu0 %v7119_v0  ;;  %8994 = vst [vmem:[#allocation44_spill] sm:$0xff] %v7183_v52  ;;  %v5436_v17 = vpack.c.bf16 %v1295_v9, %v1294_v6  ;;  %v1298_v6 = vld [vmem:[%s8838_s1 + $0x220] sm:$0xff]  ;;  %v1299_v9 = vld [vmem:[%s8838_s1 + $0x228] sm:$0xff] }
  0xe5   : > { %1585 = vmatprep.mubr.f32.mxu0 %v7161_v26 }
  0xe8   : > { %1586 = vmatmul.mubr.f32.gmra.mrb[56].mxu0 %v7141_v11 }
  0xe9   : > { %1590 = vmatprep.mubr.f32.mxu0 %v7175_v30  ;;  %v8996_v30 = vmov 0.0|0.0  }
  0xec   : > { %1591 = vmatmul.mubr.f32.gmra.mrb[58].mxu0 %v7143_v55 }
  0xed   : > { %1595 = vmatprep.mubr.f32.mxu0 %v7183_v52  ;;  %v5439_v52 = vpack.c.bf16 %v1297_v20, %v1296_v60  ;;  %v1300_v60 = vld [vmem:[%s8838_s1 + $0x230] sm:$0xff]  ;;  %v1303_v20 = vld [vmem:[%s8838_s1 + $0x248] sm:$0xff] }
  0xf0   : > { %1596 = vmatmul.mubr.f32.gmra.mrb[60].mxu0 %v7165_v31 }
  0xf1   : > { %1600 = vmatprep.mubr.f32.mxu0 %v7190_v47  ;;  %v578_v47 = vrot.slane %v6715_v1, 2 }
  0xf4   : > { %1601 = vmatmul.mubr.f32.gmra.mrb[62].mxu0 %v7167_v48 }
  0xf5   : > { %1670 = vmatprep.mubr.f32.mxu0 %v6713_v63  ;;  %v8997_v63 = vmax.f32 %v6718_v2, 0.0 }
  0xf8   : > { %1671 = vmatmul.mubr.f32.vlgmr.msra.gmra.mrb[0].mxu0 %v6738_v14  ;;  %v7222_v14 = vsel %vm571_vm1, %v577_v7, %v578_v47 }
  0xf9   : > { %5437 = vmatpush1.bf16.msra.mxu0 %v5436_v17  ;;  %1675 = vmatprep.mubr.f32.mxu0 %v6715_v1  ;;  %v580_v1 = vrot.slane %v8997_v63, 2  ;;  %v5442_v17 = vpack.c.bf16 %v1299_v9, %v1298_v6  ;;  %v1305_v9 = vld [vmem:[%s8838_s1 + $0x258] sm:$0xff]  ;;  %v587_v63 = vrot.slane %v6782_v37, 2 }
  0xfa   : > { %5438 = vmatprep.subr.bf16.mxu0 %v8996_v30 }
  0xfb   : > { %v7236_v7 = vsel %vm571_vm1, %v578_v47, %v580_v1  ;;  %v1304_v47 = vld [vmem:[%s8838_s1 + $0x250] sm:$0xff]  ;;  %v588_v1 = vrot.slane %v6784_v38, 2 }
  0xfc   : > { %1676 = vmatmul.mubr.f32.gmra.mrb[2].mxu0 %v6759_v25  ;;  %v1301_v25 = vld [vmem:[%s8838_s1 + $0x238] sm:$0xff] }
  0xfd   : > { %1680 = vmatprep.mubr.f32.mxu0 %v6747_v21  ;;  %5440 = vmatpush1.bf16.msra.mxu0 %v5439_v52  ;;  %v5445_v2 = vpack.c.bf16 %v1301_v25, %v1300_v60  ;;  %v1302_v52 = vld [vmem:[%s8838_s1 + $0x240] sm:$0xff]  ;;  %v1307_v25 = vld [vmem:[%s8838_s1 + $0x268] sm:$0xff] }
  0xfe   : > { %5441 = vmatprep.subr.bf16.mxu0 %v8996_v30  ;;  %v5448_v6 = vpack.c.bf16 %v1303_v20, %v1302_v52  ;;  %v1306_v60 = vld [vmem:[%s8838_s1 + $0x260] sm:$0xff]  ;;  %v8998_v52 = vmax.f32 %v6794_v41, 0.0  ;;  %v592_v41 = vrot.slane %v6826_v58, 2 }
 0x100   : > { %1681 = vmatmul.mubr.f32.gmra.mrb[4].mxu0 %v7222_v14  ;;  %v590_v20 = vrot.slane %v8998_v52, 2  ;;  %v1311_v52 = vld [vmem:[%s8838_s1 + $0x288] sm:$0xff] }
 0x101   : > { %1685 = vmatprep.mubr.f32.mxu0 %v6749_v22  ;;  %5443 = vmatpush1.bf16.msra.mxu0 %v5442_v17  ;;  %v5451_v17 = vpack.c.bf16 %v1305_v9, %v1304_v47  ;;  %v1308_v47 = vld [vmem:[%s8838_s1 + $0x270] sm:$0xff]  ;;  %v1309_v9 = vld [vmem:[%s8838_s1 + $0x278] sm:$0xff] }
 0x102   : > { %5444 = vmatprep.subr.bf16.mxu0 %v8996_v30 }
 0x104   : > { %1686 = vmatmul.mubr.f32.gmra.mrb[6].mxu0 %v7236_v7 }
 0x105   : > { %1690 = vmatprep.mubr.f32.mxu0 %v6782_v37  ;;  %5446 = vmatpush1.bf16.msra.mxu0 %v5445_v2  ;;  %v7268_v2 = vsel %vm571_vm1, %v587_v63, %v588_v1  ;;  %v7282_v63 = vsel %vm571_vm1, %v588_v1, %v590_v20  ;;  %v8999_v20 = vmax.f32 %v6838_v62, 0.0  ;;  %v597_v62 = vrot.slane %v6867_v15, 2 }
 0x106   : > { %5447 = vmatprep.subr.bf16.mxu0 %v8996_v30 }
 0x108   : > { %1691 = vmatmul.mubr.f32.gmra.mrb[8].mxu0 %v6816_v53 }
 0x109   : > { %1695 = vmatprep.mubr.f32.mxu0 %v6784_v38  ;;  %5449 = vmatpush1.bf16.msra.mxu0 %v5448_v6  ;;  %v5454_v6 = vpack.c.bf16 %v1307_v25, %v1306_v60  ;;  %v5457_v60 = vpack.c.bf16 %v1309_v9, %v1308_v47  ;;  %v1310_v25 = vld [vmem:[%s8838_s1 + $0x280] sm:$0xff]  ;;  %v1312_v9 = vld [vmem:[%s8838_s1 + $0x290] sm:$0xff] }
 0x10a   : > { %5450 = vmatprep.subr.bf16.mxu0 %v8996_v30  ;;  %v5460_v47 = vpack.c.bf16 %v1311_v52, %v1310_v25  ;;  %v1314_v52 = vld [vmem:[%s8838_s1 + $0x2a0] sm:$0xff] }
 0x10c   : > { %1696 = vmatmul.mubr.f32.gmra.mrb[10].mxu0 %v6841_v3 }
 0x10d   : > { %1700 = vmatprep.mubr.f32.mxu0 %v6826_v58  ;;  %5452 = vmatpush1.bf16.msra.mxu0 %v5451_v17  ;;  %v593_v17 = vrot.slane %v6828_v59, 2 }
 0x10e   : > { %5453 = vmatprep.subr.bf16.mxu0 %v8996_v30 }
 0x10f   : > { %v7296_v1 = vsel %vm571_vm1, %v592_v41, %v593_v17 }
 0x110   : > { %1701 = vmatmul.mubr.f32.gmra.mrb[12].mxu0 %v7268_v2 }
 0x111   : > { %1705 = vmatprep.mubr.f32.mxu0 %v6828_v59  ;;  %5455 = vmatpush1.bf16.msra.mxu0 %v5454_v6  ;;  %v595_v6 = vrot.slane %v8999_v20, 2  ;;  %v1313_v59 = vld [vmem:[%s8838_s1 + $0x298] sm:$0xff]  ;;  %v1315_v20 = vld [vmem:[%s8838_s1 + $0x2a8] sm:$0xff] }
 0x112   : > { %5456 = vmatprep.subr.bf16.mxu0 %v8996_v30  ;;  %v5463_v25 = vpack.c.bf16 %v1313_v59, %v1312_v9  ;;  %v1316_v9 = vld [vmem:[%s8838_s1 + $0x2b0] sm:$0xff] }
 0x113   : > { %v7310_v41 = vsel %vm571_vm1, %v593_v17, %v595_v6  ;;  %v9000_v6 = vmax.f32 %v6879_v28, 0.0  ;;  %v602_v28 = vrot.slane %v6905_v44, 2 }
 0x114   : > { %1706 = vmatmul.mubr.f32.gmra.mrb[14].mxu0 %v7282_v63 }
 0x115   : > { %1710 = vmatprep.mubr.f32.mxu0 %v6867_v15  ;;  %5458 = vmatpush1.bf16.msra.mxu0 %v5457_v60  ;;  %v598_v60 = vrot.slane %v6869_v23, 2  ;;  %v600_v59 = vrot.slane %v9000_v6, 2  ;;  %v1319_v6 = vld [vmem:[%s8838_s1 + $0x2c8] sm:$0xff] }
 0x116   : > { %5459 = vmatprep.subr.bf16.mxu0 %v8996_v30 }
 0x117   : > { %v7324_v17 = vsel %vm571_vm1, %v597_v62, %v598_v60  ;;  %v7338_v62 = vsel %vm571_vm1, %v598_v60, %v600_v59  ;;  %v9001_v59 = vmax.f32 %v6917_v50, 0.0  ;;  %v607_v50 = vrot.slane %v6943_v12, 2 }
 0x118   : > { %1711 = vmatmul.mubr.f32.gmra.mrb[16].mxu0 %v7296_v1 }
 0x119   : > { %1715 = vmatprep.mubr.f32.mxu0 %v6869_v23  ;;  %5461 = vmatpush1.bf16.msra.mxu0 %v5460_v47  ;;  %v5466_v47 = vpack.c.bf16 %v1315_v20, %v1314_v52  ;;  %v1317_v23 = vld [vmem:[%s8838_s1 + $0x2b8] sm:$0xff]  ;;  %v1318_v20 = vld [vmem:[%s8838_s1 + $0x2c0] sm:$0xff] }
 0x11a   : > { %5462 = vmatprep.subr.bf16.mxu0 %v8996_v30  ;;  %v5469_v52 = vpack.c.bf16 %v1317_v23, %v1316_v9  ;;  %v605_v23 = vrot.slane %v9001_v59, 2  ;;  %v1320_v9 = vld [vmem:[%s8838_s1 + $0x2d0] sm:$0xff]  ;;  %v1323_v59 = vld [vmem:[%s8838_s1 + $0x2e8] sm:$0xff] }
 0x11c   : > { %1716 = vmatmul.mubr.f32.gmra.mrb[18].mxu0 %v7310_v41 }
 0x11d   : > { %1720 = vmatprep.mubr.f32.mxu0 %v6905_v44  ;;  %5464 = vmatpush1.bf16.msra.mxu0 %v5463_v25  ;;  %v603_v25 = vrot.slane %v6907_v46, 2 }
 0x11e   : > { %5465 = vmatprep.subr.bf16.mxu0 %v8996_v30 }
 0x11f   : > { %v7352_v60 = vsel %vm571_vm1, %v602_v28, %v603_v25  ;;  %v7366_v28 = vsel %vm571_vm1, %v603_v25, %v605_v23  ;;  %v9002_v23 = vmax.f32 %v6955_v24, 0.0  ;;  %v612_v24 = vrot.slane %v6981_v51, 2 }
 0x120   : > { %1721 = vmatmul.mubr.f32.gmra.mrb[20].mxu0 %v7324_v17 }
 0x121   : > { %1725 = vmatprep.mubr.f32.mxu0 %v6907_v46  ;;  %5467 = vmatpush1.bf16.msra.mxu0 %v5466_v47  ;;  %v5472_v47 = vpack.c.bf16 %v1319_v6, %v1318_v20  ;;  %v1321_v46 = vld [vmem:[%s8838_s1 + $0x2d8] sm:$0xff]  ;;  %v1322_v6 = vld [vmem:[%s8838_s1 + $0x2e0] sm:$0xff] }
 0x122   : > { %5468 = vmatprep.subr.bf16.mxu0 %v8996_v30  ;;  %v5475_v20 = vpack.c.bf16 %v1321_v46, %v1320_v9  ;;  %v610_v46 = vrot.slane %v9002_v23, 2  ;;  %v1324_v9 = vld [vmem:[%s8838_s1 + $0x2f0] sm:$0xff]  ;;  %v9003_v23 = vmax.f32 %v6993_v61, 0.0 }
 0x124   : > { %1726 = vmatmul.mubr.f32.gmra.mrb[22].mxu0 %v7338_v62 }
 0x125   : > { %1730 = vmatprep.mubr.f32.mxu0 %v6943_v12  ;;  %5470 = vmatpush1.bf16.msra.mxu0 %v5469_v52  ;;  %v608_v52 = vrot.slane %v6945_v13, 2  ;;  %v615_v12 = vrot.slane %v9003_v23, 2 }
 0x126   : > { %5471 = vmatprep.subr.bf16.mxu0 %v8996_v30 }
 0x127   : > { %v7380_v25 = vsel %vm571_vm1, %v607_v50, %v608_v52  ;;  %v7394_v50 = vsel %vm571_vm1, %v608_v52, %v610_v46  ;;  %v617_v52 = vrot.slane %v7019_v40, 2  ;;  %v618_v46 = vrot.slane %v7021_v43, 2 }
 0x128   : > { %1731 = vmatmul.mubr.f32.gmra.mrb[24].mxu0 %v7352_v60 }
 0x129   : > { %1735 = vmatprep.mubr.f32.mxu0 %v6945_v13  ;;  %5473 = vmatpush1.bf16.msra.mxu0 %v5472_v47  ;;  %v5478_v47 = vpack.c.bf16 %v1323_v59, %v1322_v6  ;;  %v1325_v13 = vld [vmem:[%s8838_s1 + $0x2f8] sm:$0xff]  ;;  %v7417_v61 = vsel %vm571_vm1, %v617_v52, %v618_v46 }
 0x12a   : > { %5474 = vmatprep.subr.bf16.mxu0 %v8996_v30  ;;  %v5481_v6 = vpack.c.bf16 %v1325_v13, %v1324_v9 }
 0x12c   : > { %1736 = vmatmul.mubr.f32.gmra.mrb[26].mxu0 %v7366_v28 }
 0x12d   : > { %1740 = vmatprep.mubr.f32.mxu0 %v6981_v51  ;;  %5476 = vmatpush1.bf16.msra.mxu0 %v5475_v20  ;;  %v613_v20 = vrot.slane %v6983_v54, 2 }
 0x12e   : > { %5477 = vmatprep.subr.bf16.mxu0 %v8996_v30 }
 0x12f   : > { %v7402_v59 = vsel %vm571_vm1, %v612_v24, %v613_v20  ;;  %v7410_v13 = vsel %vm571_vm1, %v613_v20, %v615_v12  ;;  %v622_v24 = vrot.slane %v7045_v18, 2  ;;  %v623_v20 = vrot.slane %v7047_v34, 2 }
 0x130   : > { %1741 = vmatmul.mubr.f32.gmra.mrb[28].mxu0 %v7380_v25 }
 0x131   : > { %1745 = vmatprep.mubr.f32.mxu0 %v6983_v54  ;;  %5479 = vmatpush1.bf16.msra.mxu0 %v5478_v47  ;;  %v9004_v47 = vmax.f32 %v7025_v49, 0.0  ;;  %v9005_v49 = vmax.f32 %v7050_v39, 0.0  ;;  %v9006_v39 = vmax.f32 %v7074_v8, 0.0  ;;  %v9007_v8 = vmax.f32 %v7098_v16, 0.0 }
 0x132   : > { %5480 = vmatprep.subr.bf16.mxu0 %v8996_v30  ;;  %v637_v16 = vrot.slane %v7117_v33, 2 }
 0x133   : > { %v620_v9 = vrot.slane %v9004_v47, 2  ;;  %v625_v23 = vrot.slane %v9005_v49, 2  ;;  %v628_v47 = vrot.slane %v7071_v32, 2  ;;  %v632_v49 = vrot.slane %v7093_v4, 2 }
 0x134   : > { %1746 = vmatmul.mubr.f32.gmra.mrb[30].mxu0 %v7394_v50 }
 0x135   : > { %1750 = vmatprep.mubr.f32.mxu0 %v7019_v40  ;;  %5482 = vmatpush1.bf16.msra.mxu0 %v5481_v6  ;;  %v7424_v12 = vsel %vm571_vm1, %v618_v46, %v620_v9  ;;  %v7431_v6 = vsel %vm571_vm1, %v622_v24, %v623_v20  ;;  %v7438_v52 = vsel %vm571_vm1, %v623_v20, %v625_v23  ;;  %v627_v46 = vrot.slane %v7069_v10, 2 }
 0x136   : > { %5483 = vmatprep.subr.bf16.mxu0 %v8996_v30  ;;  %v630_v24 = vrot.slane %v9006_v39, 2  ;;  %v633_v23 = vrot.slane %v7095_v57, 2  ;;  %v635_v39 = vrot.slane %v9007_v8, 2  ;;  %v638_v8 = vrot.slane %v7119_v0, 2 }
 0x137   : > { %v7445_v9 = vsel %vm571_vm1, %v627_v46, %v628_v47 }
 0x138   : > { %1751 = vmatmul.mubr.f32.gmra.mrb[32].mxu0 %v7402_v59  ;;  %v7452_v20 = vsel %vm571_vm1, %v628_v47, %v630_v24  ;;  %v7459_v46 = vsel %vm571_vm1, %v632_v49, %v633_v23  ;;  %v1359_v47 = vld [vmem:[%s8838_s1 + $0x408] sm:$0xff]  ;;  %v7472_v49 = vsel %vm571_vm1, %v633_v23, %v635_v39  ;;  %v7485_v23 = vsel %vm571_vm1, %v637_v16, %v638_v8 }
 0x139   : > { %1755 = vmatprep.mubr.f32.mxu0 %v7021_v43  ;;  %v9008_v39 = vmax.f32 %v7122_v36, 0.0  ;;  %v642_v36 = vrot.slane %v7141_v11, 2 }
 0x13c   : > { %1756 = vmatmul.mubr.f32.gmra.mrb[34].mxu0 %v7410_v13 }
 0x13d   : > { %1760 = vmatprep.mubr.f32.mxu0 %v7045_v18 }
 0x140   : > { %1761 = vmatmul.mubr.f32.gmra.mrb[36].mxu0 %v7417_v61 }
 0x141   : > { %1765 = vmatprep.mubr.f32.mxu0 %v7047_v34 }
 0x144   : > { %1766 = vmatmul.mubr.f32.gmra.mrb[38].mxu0 %v7424_v12 }
 0x145   : > { %1770 = vmatprep.mubr.f32.mxu0 %v7069_v10 }
 0x148   : > { %1771 = vmatmul.mubr.f32.gmra.mrb[40].mxu0 %v7431_v6 }
 0x149   : > { %1775 = vmatprep.mubr.f32.mxu0 %v7071_v32  ;;  %v1358_v32 = vld [vmem:[%s8838_s1 + $0x400] sm:$0xff] }
 0x14a   : > { %v5531_v24 = vpack.c.bf16 %v1359_v47, %v1358_v32  ;;  %v1361_v32 = vld [vmem:[%s8838_s1 + $0x418] sm:$0xff] }
 0x14c   : > { %1776 = vmatmul.mubr.f32.gmra.mrb[42].mxu0 %v7438_v52  ;;  %5532 = vmatprep.subr.bf16.mxu1 %v5531_v24 }
 0x14d   : > { %1780 = vmatprep.mubr.f32.mxu0 %v7093_v4  ;;  %5534 = vmatpush3.bf16.msra.mxu1 %v5531_v24  ;;  %v640_v24 = vrot.slane %v9008_v39, 2  ;;  %v1364_v39 = vld [vmem:[%s8838_s1 + $0x430] sm:$0xff] }
 0x14f   : > { %v7498_v16 = vsel %vm571_vm1, %v638_v8, %v640_v24  ;;  %v9009_v24 = vmax.f32 %v7146_v29, 0.0 }
 0x150   : > { %1781 = vmatmul.mubr.f32.gmra.mrb[44].mxu0 %v7445_v9 }
 0x151   : > { %1785 = vmatprep.mubr.f32.mxu0 %v7095_v57  ;;  %v1360_v57 = vld [vmem:[%s8838_s1 + $0x410] sm:$0xff] }
 0x152   : > { %v5535_v47 = vpack.c.bf16 %v1361_v32, %v1360_v57  ;;  %v1363_v57 = vld [vmem:[%s8838_s1 + $0x428] sm:$0xff] }
 0x154   : > { %1786 = vmatmul.mubr.f32.gmra.mrb[46].mxu0 %v7452_v20  ;;  %5536 = vmatprep.subr.bf16.mxu1 %v5535_v47 }
 0x155   : > { %1790 = vmatprep.mubr.f32.mxu0 %v7117_v33  ;;  %5538 = vmatpush3.bf16.msra.mxu1 %v5535_v47  ;;  %v643_v47 = vrot.slane %v7143_v55, 2  ;;  %v1368_v33 = vld [vmem:[%s8838_s1 + $0x450] sm:$0xff] }
 0x157   : > { %v7511_v8 = vsel %vm571_vm1, %v642_v36, %v643_v47 }
 0x158   : > { %1791 = vmatmul.mubr.f32.gmra.mrb[48].mxu0 %v7459_v46 }
 0x159   : > { %1795 = vmatprep.mubr.f32.mxu0 %v7119_v0  ;;  %v1362_v0 = vld [vmem:[%s8838_s1 + $0x420] sm:$0xff] }
 0x15a   : > { %v5539_v32 = vpack.c.bf16 %v1363_v57, %v1362_v0  ;;  %v1365_v0 = vld [vmem:[%s8838_s1 + $0x438] sm:$0xff] }
 0x15b   : > { %v5543_v57 = vpack.c.bf16 %v1365_v0, %v1364_v39  ;;  %v1367_v39 = vld [vmem:[%s8838_s1 + $0x448] sm:$0xff]  ;;  %v286_v0 = vld [vmem:[%s6599_s8 + $0x180] sm:$0xff] }
 0x15c   : > { %1796 = vmatmul.mubr.f32.gmra.mrb[50].mxu0 %v7472_v49  ;;  %5540 = vmatprep.subr.bf16.mxu1 %v5539_v32  ;;  %v7527_v36 = vmax.f32 %v286_v0, 0.0 }
 0x15d   : > { %1800 = vmatprep.mubr.f32.mxu0 %v7141_v11  ;;  %5542 = vmatpush3.bf16.msra.mxu1 %v5539_v32  ;;  %v645_v32 = vrot.slane %v9009_v24, 2  ;;  %v648_v24 = vrot.slane %v7167_v48, 2 }
 0x15e   : > { %5544 = vmatprep.subr.bf16.mxu1 %v5543_v57 }
 0x15f   : > { %v7525_v29 = vsel %vm571_vm1, %v643_v47, %v645_v32 }
 0x160   : > { %1801 = vmatmul.mubr.f32.gmra.mrb[52].mxu0 %v7485_v23 }
 0x161   : > { %1805 = vmatprep.mubr.f32.mxu0 %v7143_v55  ;;  %5546 = vmatpush3.bf16.msra.mxu1 %v5543_v57  ;;  %v1366_v55 = vld [vmem:[%s8838_s1 + $0x440] sm:$0xff]  ;;  %v647_v57 = vrot.slane %v7165_v31, 2 }
 0x162   : > { %v5547_v11 = vpack.c.bf16 %v1367_v39, %v1366_v55  ;;  %v1369_v55 = vld [vmem:[%s8838_s1 + $0x458] sm:$0xff]  ;;  %v287_v39 = vld [vmem:[%s6599_s8 + $0x188] sm:$0xff] }
 0x163   : > { %v5551_v4 = vpack.c.bf16 %v1369_v55, %v1368_v33  ;;  %v7541_v47 = vsel %vm571_vm1, %v647_v57, %v648_v24  ;;  %v7543_v32 = vmax.f32 %v287_v39, 0.0  ;;  %v1371_v33 = vld [vmem:[%s8838_s1 + $0x468] sm:$0xff] }
 0x164   : > { %1806 = vmatmul.mubr.f32.gmra.mrb[54].mxu0 %v7498_v16  ;;  %5548 = vmatprep.subr.bf16.mxu1 %v5547_v11  ;;  %v1327_v39 = vld [vmem:[%s8838_s1 + $0x308] sm:$0xff] }
 0x165   : > { %1810 = vmatprep.mubr.f32.mxu0 %v7165_v31  ;;  %5550 = vmatpush3.bf16.msra.mxu1 %v5547_v11  ;;  %v9010_v11 = vmax.f32 %v7170_v42, 0.0  ;;  %v1372_v42 = vld [vmem:[%s8838_s1 + $0x470] sm:$0xff] }
 0x166   : > { %5552 = vmatprep.subr.bf16.mxu1 %v5551_v4 }
 0x167   : > { %v650_v0 = vrot.slane %v9010_v11, 2 }
 0x168   : > { %1811 = vmatmul.mubr.f32.gmra.mrb[56].mxu0 %v7511_v8 }
 0x169   : > { %1815 = vmatprep.mubr.f32.mxu0 %v7167_v48  ;;  %5554 = vmatpush3.bf16.msra.mxu1 %v5551_v4  ;;  %v1370_v48 = vld [vmem:[%s8838_s1 + $0x460] sm:$0xff]  ;;  %v7556_v57 = vsel %vm571_vm1, %v648_v24, %v650_v0  ;;  %v1373_v4 = vld [vmem:[%s8838_s1 + $0x478] sm:$0xff]  ;;  %v1328_v0 = vld [vmem:[%s8838_s1 + $0x310] sm:$0xff] }
 0x16a   : > { %v5555_v55 = vpack.c.bf16 %v1371_v33, %v1370_v48  ;;  %v1326_v48 = vld [vmem:[%s8838_s1 + $0x300] sm:$0xff]  ;;  %v5559_v11 = vpack.c.bf16 %v1373_v4, %v1372_v42  ;;  %v1329_v33 = vld [vmem:[%s8838_s1 + $0x318] sm:$0xff]  ;;  %v1331_v42 = vld [vmem:[%s8838_s1 + $0x328] sm:$0xff] }
 0x16b   : > { %v5484_v24 = vpack.c.bf16 %v1327_v39, %v1326_v48  ;;  %v1333_v4 = vld [vmem:[%s8838_s1 + $0x338] sm:$0xff]  ;;  %v1335_v48 = vld [vmem:[%s8838_s1 + $0x348] sm:$0xff]  ;;  %v1336_v39 = vld [vmem:[%s8838_s1 + $0x350] sm:$0xff] }
 0x16c   : > { %1816 = vmatmul.mubr.f32.gmra.mrb[58].mxu0 %v7525_v29  ;;  %5556 = vmatprep.subr.bf16.mxu1 %v5555_v55 }
 0x16d   : > { %1820 = vmatprep.mubr.f32.mxu0 %v7527_v36  ;;  %5558 = vmatpush3.bf16.msra.mxu1 %v5555_v55  ;;  %v1330_v55 = vld [vmem:[%s8838_s1 + $0x320] sm:$0xff] }
 0x16e   : > { %5560 = vmatprep.subr.bf16.mxu1 %v5559_v11 }
 0x170   : > { %1821 = vmatmul.mubr.f32.gmra.mrb[60].mxu0 %v7541_v47 }
 0x171   : > { %1825 = vmatprep.mubr.f32.mxu0 %v7543_v32  ;;  %5562 = vmatpush3.bf16.msra.mxu1 %v5559_v11  ;;  %v1337_v11 = vld [vmem:[%s8838_s1 + $0x358] sm:$0xff] }
 0x172   : > { %5563 = vmatprep.subr.bf16.mxu1 %v8996_v30 }
 0x174   : > { %1826 = vmatmul.mubr.f32.gmra.mrb[62].mxu0 %v7556_v57  ;;  %5212 = vmatmul.mubr.f32.vlgmr.msra.gmra.mrb[0].mxu1 %v6841_v3 }
 0x175   : > { %1895 = vmatprep.mubr.f32.mxu0 %v7222_v14  ;;  %v5487_v14 = vpack.c.bf16 %v1329_v33, %v1328_v0  ;;  %5214 = vmatprep.mubr.f32.mxu1 %v7268_v2  ;;  %v1339_v0 = vld [vmem:[%s8838_s1 + $0x368] sm:$0xff]  ;;  %v1340_v33 = vld [vmem:[%s8838_s1 + $0x370] sm:$0xff] }
 0x178   : > { %1896 = vmatmul.mubr.f32.vlgmr.msra.gmra.mrb[0].mxu0 %v6742_v19  ;;  %5215 = vmatmul.mubr.f32.gmra.mrb[2].mxu1 %v7282_v63  ;;  %v5490_v19 = vpack.c.bf16 %v1331_v42, %v1330_v55  ;;  %v9011_v55 = vld [vmem:[#allocation11_spill] sm:$0xff]  ;;  %v1342_v42 = vld [vmem:[%s8838_s1 + $0x380] sm:$0xff] }
 0x179   : > { %5485 = vmatpush1.bf16.msra.mxu0 %v5484_v24  ;;  %1900 = vmatprep.mubr.f32.mxu0 %v7236_v7  ;;  %v1332_v7 = vld [vmem:[%s8838_s1 + $0x330] sm:$0xff]  ;;  %v1338_v24 = vld [vmem:[%s8838_s1 + $0x360] sm:$0xff] }
 0x17a   : > { %5486 = vmatprep.subr.bf16.mxu0 %v8996_v30  ;;  %5217 = vmatprep.mubr.f32.mxu1 %v7296_v1 }
 0x17c   : > { %1901 = vmatmul.mubr.f32.gmra.mrb[2].mxu0 %v6764_v27  ;;  %5218 = vmatmul.mubr.f32.gmra.mrb[4].mxu1 %v7310_v41  ;;  %v5493_v27 = vpack.c.bf16 %v1333_v4, %v1332_v7  ;;  %v9012_v7 = vld [vmem:[#allocation13_spill] sm:$0xff]  ;;  %v1344_v4 = vld [vmem:[%s8838_s1 + $0x390] sm:$0xff] }
 0x17d   : > { %1905 = vmatprep.mubr.f32.mxu0 %v6816_v53  ;;  %5488 = vmatpush1.bf16.msra.mxu0 %v5487_v14  ;;  %v1334_v53 = vld [vmem:[%s8838_s1 + $0x340] sm:$0xff]  ;;  %v1341_v14 = vld [vmem:[%s8838_s1 + $0x378] sm:$0xff] }
 0x17e   : > { %5489 = vmatprep.subr.bf16.mxu0 %v8996_v30  ;;  %5220 = vmatprep.mubr.f32.mxu1 %v7324_v17 }
 0x180   : > { %1906 = vmatmul.mubr.f32.gmra.mrb[4].mxu0 %v6780_v35  ;;  %5221 = vmatmul.mubr.f32.gmra.mrb[6].mxu1 %v7338_v62 }
 0x181   : > { %1910 = vmatprep.mubr.f32.mxu0 %v6841_v3  ;;  %5491 = vmatpush1.bf16.msra.mxu0 %v5490_v19  ;;  %v5496_v3 = vpack.c.bf16 %v1335_v48, %v1334_v53  ;;  %v1343_v19 = vld [vmem:[%s8838_s1 + $0x388] sm:$0xff]  ;;  %v9013_v53 = vld [vmem:[#allocation14_spill] sm:$0xff]  ;;  %v1346_v48 = vld [vmem:[%s8838_s1 + $0x3a0] sm:$0xff] }
 0x182   : > { %5492 = vmatprep.subr.bf16.mxu0 %v8996_v30  ;;  %5223 = vmatprep.mubr.f32.mxu1 %v7352_v60 }
 0x184   : > { %1911 = vmatmul.mubr.f32.gmra.mrb[6].mxu0 %v6801_v45  ;;  %5224 = vmatmul.mubr.f32.gmra.mrb[8].mxu1 %v7366_v28 }
 0x185   : > { %1915 = vmatprep.mubr.f32.mxu0 %v7268_v2  ;;  %5494 = vmatpush1.bf16.msra.mxu0 %v5493_v27  ;;  %v5499_v2 = vpack.c.bf16 %v1337_v11, %v1336_v39  ;;  %v1345_v27 = vld [vmem:[%s8838_s1 + $0x398] sm:$0xff]  ;;  %v9014_v39 = vld [vmem:[#allocation16_spill] sm:$0xff]  ;;  %v1348_v11 = vld [vmem:[%s8838_s1 + $0x3b0] sm:$0xff] }
 0x186   : > { %5495 = vmatprep.subr.bf16.mxu0 %v8996_v30  ;;  %5226 = vmatprep.mubr.f32.mxu1 %v7380_v25 }
 0x188   : > { %1916 = vmatmul.mubr.f32.gmra.mrb[8].mxu0 %v6822_v56  ;;  %5227 = vmatmul.mubr.f32.gmra.mrb[10].mxu1 %v7394_v50 }
 0x189   : > { %1920 = vmatprep.mubr.f32.mxu0 %v7282_v63  ;;  %5497 = vmatpush1.bf16.msra.mxu0 %v5496_v3  ;;  %v5502_v63 = vpack.c.bf16 %v1339_v0, %v1338_v24  ;;  %v1347_v3 = vld [vmem:[%s8838_s1 + $0x3a8] sm:$0xff]  ;;  %v1350_v0 = vld [vmem:[%s8838_s1 + $0x3c0] sm:$0xff] }
 0x18a   : > { %5498 = vmatprep.subr.bf16.mxu0 %v8996_v30  ;;  %5229 = vmatprep.mubr.f32.mxu1 %v7402_v59  ;;  %v9015_v24 = vld [vmem:[#allocation17_spill] sm:$0xff] }
 0x18c   : > { %1921 = vmatmul.mubr.f32.gmra.mrb[10].mxu0 %v6846_v5  ;;  %5230 = vmatmul.mubr.f32.gmra.mrb[12].mxu1 %v7410_v13 }
 0x18d   : > { %1925 = vmatprep.mubr.f32.mxu0 %v7296_v1  ;;  %5500 = vmatpush1.bf16.msra.mxu0 %v5499_v2  ;;  %v5505_v1 = vpack.c.bf16 %v1341_v14, %v1340_v33  ;;  %v1349_v2 = vld [vmem:[%s8838_s1 + $0x3b8] sm:$0xff]  ;;  %v9016_v33 = vld [vmem:[#allocation20_spill] sm:$0xff]  ;;  %v7702_v14 = vld [vmem:[%s6599_s8 + $0x190] sm:$0x3] }
 0x18e   : > { %5501 = vmatprep.subr.bf16.mxu0 %v8996_v30  ;;  %5232 = vmatprep.mubr.f32.mxu1 %v7417_v61 }
 0x190   : > { %1926 = vmatmul.mubr.f32.gmra.mrb[12].mxu0 %v9011_v55  ;;  %5233 = vmatmul.mubr.f32.gmra.mrb[14].mxu1 %v7424_v12 }
 0x191   : > { %1930 = vmatprep.mubr.f32.mxu0 %v7310_v41  ;;  %5503 = vmatpush1.bf16.msra.mxu0 %v5502_v63  ;;  %v5508_v41 = vpack.c.bf16 %v1343_v19, %v1342_v42  ;;  %v1351_v63 = vld [vmem:[%s8838_s1 + $0x3c8] sm:$0xff]  ;;  %v1353_v42 = vld [vmem:[%s8838_s1 + $0x3d8] sm:$0xff]  ;;  %v342_v19 = vmax.f32 %v7702_v14, 0.0  ;;  %v3479_v14 = vld [vmem:[#allocation4] sm:$0xff] }
 0x192   : > { %5504 = vmatprep.subr.bf16.mxu0 %v8996_v30  ;;  %5235 = vmatprep.mubr.f32.mxu1 %v7431_v6 }
 0x194   : > { %1931 = vmatmul.mubr.f32.gmra.mrb[14].mxu0 %v9012_v7  ;;  %5236 = vmatmul.mubr.f32.gmra.mrb[16].mxu1 %v7438_v52 }
 0x195   : > { %1935 = vmatprep.mubr.f32.mxu0 %v7324_v17  ;;  %5506 = vmatpush1.bf16.msra.mxu0 %v5505_v1  ;;  %v5511_v17 = vpack.c.bf16 %v1345_v27, %v1344_v4  ;;  %v1352_v1 = vld [vmem:[%s8838_s1 + $0x3d0] sm:$0xff]  ;;  %v790_v4 = vrot.slane %v7527_v36, 2  ;;  %v791_v27 = vrot.slane %v7543_v32, 2 }
 0x196   : > { %5507 = vmatprep.subr.bf16.mxu0 %v8996_v30  ;;  %5238 = vmatprep.mubr.f32.mxu1 %v7445_v9 }
 0x198   : > { %1936 = vmatmul.mubr.f32.gmra.mrb[16].mxu0 %v9013_v53  ;;  %5239 = vmatmul.mubr.f32.gmra.mrb[18].mxu1 %v7452_v20 }
 0x199   : > { %1940 = vmatprep.mubr.f32.mxu0 %v7338_v62  ;;  %5509 = vmatpush1.bf16.msra.mxu0 %v5508_v41  ;;  %v5514_v62 = vpack.c.bf16 %v1347_v3, %v1346_v48  ;;  %v9017_v41 = vld [vmem:[#allocation21_spill] sm:$0xff]  ;;  %v9018_v3 = vld [vmem:[#allocation22_spill] sm:$0xff] }
 0x19a   : > { %5510 = vmatprep.subr.bf16.mxu0 %v8996_v30  ;;  %5241 = vmatprep.mubr.f32.mxu1 %v7459_v46  ;;  %v1355_v48 = vld [vmem:[%s8838_s1 + $0x3e8] sm:$0xff] }
 0x19c   : > { %1941 = vmatmul.mubr.f32.gmra.mrb[18].mxu0 %v9014_v39  ;;  %5242 = vmatmul.mubr.f32.gmra.mrb[20].mxu1 %v7472_v49 }
 0x19d   : > { %1945 = vmatprep.mubr.f32.mxu0 %v7352_v60  ;;  %5512 = vmatpush1.bf16.msra.mxu0 %v5511_v17  ;;  %v5517_v60 = vpack.c.bf16 %v1349_v2, %v1348_v11  ;;  %v1354_v17 = vld [vmem:[%s8838_s1 + $0x3e0] sm:$0xff]  ;;  %v792_v11 = vsel %vm571_vm1, %v790_v4, %v791_v27  ;;  %v1356_v2 = vld [vmem:[%s8838_s1 + $0x3f0] sm:$0xff] }
 0x19e   : > { %5513 = vmatprep.subr.bf16.mxu0 %v8996_v30  ;;  %5244 = vmatprep.mubr.f32.mxu1 %v7485_v23  ;;  %v9025_v4 = vld [vmem:[#allocation30_spill] sm:$0xff] }
 0x1a0   : > { %1946 = vmatmul.mubr.f32.gmra.mrb[20].mxu0 %v9015_v24  ;;  %5245 = vmatmul.mubr.f32.gmra.mrb[22].mxu1 %v7498_v16 }
 0x1a1   : > { %1950 = vmatprep.mubr.f32.mxu0 %v7366_v28  ;;  %5515 = vmatpush1.bf16.msra.mxu0 %v5514_v62  ;;  %v5520_v28 = vpack.c.bf16 %v1351_v63, %v1350_v0  ;;  %v5526_v62 = vpack.c.bf16 %v1355_v48, %v1354_v17  ;;  %v9019_v63 = vld [vmem:[#allocation23_spill] sm:$0xff]  ;;  %v7782_v48 = vld [vmem:[%s6599_s8 + $0x1a8] sm:$0x3] }
 0x1a2   : > { %5516 = vmatprep.subr.bf16.mxu0 %v8996_v30  ;;  %5247 = vmatprep.mubr.f32.mxu1 %v7511_v8 }
 0x1a4   : > { %1951 = vmatmul.mubr.f32.gmra.mrb[22].mxu0 %v9016_v33  ;;  %5248 = vmatmul.mubr.f32.gmra.mrb[24].mxu1 %v7525_v29 }
 0x1a5   : > { %1955 = vmatprep.mubr.f32.mxu0 %v7380_v25  ;;  %5518 = vmatpush1.bf16.msra.mxu0 %v5517_v60  ;;  %v5523_v25 = vpack.c.bf16 %v1353_v42, %v1352_v1  ;;  %v1357_v60 = vld [vmem:[%s8838_s1 + $0x3f8] sm:$0xff]  ;;  %v9021_v1 = vld [vmem:[#allocation25_spill] sm:$0xff]  ;;  %v9022_v42 = vld [vmem:[#allocation26_spill] sm:$0xff] }
 0x1a6   : > { %5519 = vmatprep.subr.bf16.mxu0 %v8996_v30  ;;  %5250 = vmatprep.mubr.f32.mxu1 %v7541_v47 }
 0x1a8   : > { %1956 = vmatmul.mubr.f32.gmra.mrb[24].mxu0 %v9017_v41  ;;  %5251 = vmatmul.mubr.f32.gmra.mrb[26].mxu1 %v7556_v57 }
 0x1a9   : > { %1960 = vmatprep.mubr.f32.mxu0 %v7394_v50  ;;  %5521 = vmatpush1.bf16.msra.mxu0 %v5520_v28  ;;  %v793_v50 = vrot.slane %v342_v19, 2  ;;  %v9020_v28 = vld [vmem:[#allocation24_spill] sm:$0xff] }
 0x1aa   : > { %5522 = vmatprep.subr.bf16.mxu0 %v8996_v30  ;;  %5253 = vmatprep.mubr.f32.mxu1 %v792_v11 }
 0x1ab   : > { %v794_v0 = vsel %vm571_vm1, %v791_v27, %v793_v50  ;;  %v290_v27 = vld [vmem:[%s6599_s8 + $0x1a0] sm:$0xff] }
 0x1ac   : > { %1961 = vmatmul.mubr.f32.gmra.mrb[26].mxu0 %v9018_v3  ;;  %5254 = vmatmul.mubr.f32.gmra.mrb[28].mxu1 %v794_v0 }
 0x1ad   : > { %1965 = vmatprep.mubr.f32.mxu0 %v7402_v59  ;;  %5524 = vmatpush1.bf16.msra.mxu0 %v5523_v25  ;;  %v5529_v59 = vpack.c.bf16 %v1357_v60, %v1356_v2  ;;  %v9023_v25 = vld [vmem:[#allocation27_spill] sm:$0xff] }
 0x1ae   : > { %5525 = vmatprep.subr.bf16.mxu0 %v8996_v30 }
 0x1b0   : > { %1966 = vmatmul.mubr.f32.gmra.mrb[28].mxu0 %v9019_v63 }
 0x1b1   : > { %1970 = vmatprep.mubr.f32.mxu0 %v7410_v13  ;;  %5527 = vmatpush1.bf16.msra.mxu0 %v5526_v62  ;;  %v9024_v13 = vld [vmem:[#allocation29_spill] sm:$0xff] }
 0x1b2   : > { %5528 = vmatprep.subr.bf16.mxu0 %v8996_v30 }
 0x1b4   : > { %1971 = vmatmul.mubr.f32.gmra.mrb[30].mxu0 %v9020_v28 }
 0x1b5   : > { %1975 = vmatprep.mubr.f32.mxu0 %v7417_v61  ;;  %5530 = vmatpush1.bf16.msra.mxu0 %v5529_v59  ;;  %v9026_v61 = vld [vmem:[#allocation33_spill] sm:$0xff] }
 0x1b8   : > { %1976 = vmatmul.mubr.f32.gmra.mrb[32].mxu0 %v9021_v1 }
 0x1b9   : > { %1980 = vmatprep.mubr.f32.mxu0 %v7424_v12  ;;  %v9027_v12 = vld [vmem:[#allocation34_spill] sm:$0xff] }
 0x1bc   : > { %1981 = vmatmul.mubr.f32.gmra.mrb[34].mxu0 %v9022_v42 }
 0x1bd   : > { %1985 = vmatprep.mubr.f32.mxu0 %v7431_v6  ;;  %v9028_v6 = vld [vmem:[#allocation37_spill] sm:$0xff] }
 0x1c0   : > { %1986 = vmatmul.mubr.f32.gmra.mrb[36].mxu0 %v9023_v25 }
 0x1c1   : > { %1990 = vmatprep.mubr.f32.mxu0 %v7438_v52  ;;  %v9029_v52 = vld [vmem:[#allocation38_spill] sm:$0xff] }
 0x1c4   : > { %1991 = vmatmul.mubr.f32.gmra.mrb[38].mxu0 %v9024_v13 }
 0x1c5   : > { %1995 = vmatprep.mubr.f32.mxu0 %v7445_v9  ;;  %v9030_v9 = vld [vmem:[#allocation41_spill] sm:$0xff] }
 0x1c8   : > { %1996 = vmatmul.mubr.f32.gmra.mrb[40].mxu0 %v9025_v4 }
 0x1c9   : > { %2000 = vmatprep.mubr.f32.mxu0 %v7452_v20  ;;  %v9031_v20 = vld [vmem:[#allocation43_spill] sm:$0xff] }
 0x1cc   : > { %2001 = vmatmul.mubr.f32.gmra.mrb[42].mxu0 %v9026_v61 }
 0x1cd   : > { %2005 = vmatprep.mubr.f32.mxu0 %v7459_v46  ;;  %v9032_v46 = vld [vmem:[#allocation44_spill] sm:$0xff] }
 0x1d0   : > { %2006 = vmatmul.mubr.f32.gmra.mrb[44].mxu0 %v9027_v12 }
 0x1d1   : > { %2010 = vmatprep.mubr.f32.mxu0 %v7472_v49  ;;  %v751_v49 = vrot.slane %v7527_v36, 1 }
 0x1d4   : > { %2011 = vmatmul.mubr.f32.gmra.mrb[46].mxu0 %v9028_v6 }
 0x1d5   : > { %2015 = vmatprep.mubr.f32.mxu0 %v7485_v23  ;;  %v752_v23 = vrot.slane %v7543_v32, 1 }
 0x1d7   : > { %v7787_v50 = vsel %vm426_vm0, %v751_v49, %v752_v23 }
 0x1d8   : > { %2016 = vmatmul.mubr.f32.gmra.mrb[48].mxu0 %v9029_v52 }
 0x1d9   : > { %2020 = vmatprep.mubr.f32.mxu0 %v7498_v16  ;;  %v289_v16 = vld [vmem:[%s6599_s8 + $0x198] sm:$0xff] }
 0x1da   : > { %v7777_v17 = vmax.f32 %v289_v16, 0.0  ;;  %v3481_v16 = vld [vmem:[#allocation4 + $0x10] sm:$0xff] }
 0x1dc   : > { %2021 = vmatmul.mubr.f32.gmra.mrb[50].mxu0 %v9030_v9  ;;  %v903_v62 = vrot.slane %v7777_v17, 2 }
 0x1dd   : > { %2025 = vmatprep.mubr.f32.mxu0 %v7511_v8  ;;  %v7779_v8 = vmax.f32 %v290_v27, 0.0 }
 0x1df   : > { %v904_v2 = vrot.slane %v7779_v8, 2 }
 0x1e0   : > { %2026 = vmatmul.mubr.f32.gmra.mrb[52].mxu0 %v7161_v26 }
 0x1e1   : > { %2030 = vmatprep.mubr.f32.mxu0 %v7525_v29  ;;  %v9033_v29 = vld [vmem:[#allocation45_spill] sm:$0xff]  ;;  %v905_v59 = vsel %vm571_vm1, %v903_v62, %v904_v2 }
 0x1e2   : > { %5256 = vmatprep.mubr.f32.mxu1 %v905_v59 }
 0x1e4   : > { %2031 = vmatmul.mubr.f32.gmra.mrb[54].mxu0 %v9031_v20 }
 0x1e5   : > { %2035 = vmatprep.mubr.f32.mxu0 %v7541_v47  ;;  %v8921_v47 = vmax.f32 %v7782_v48, 0.0 }
 0x1e7   : > { %v906_v60 = vrot.slane %v8921_v47, 2  ;;  %v3482_v47 = vld [vmem:[#allocation4 + $0x18] sm:$0xff] }
 0x1e8   : > { %2036 = vmatmul.mubr.f32.gmra.mrb[56].mxu0 %v9032_v46  ;;  %v5567_v62 = vpack.c.bf16 %v3482_v47, %v3481_v16  ;;  %v3608_v47 = vld [vmem:[#allocation4 + $0x408] sm:$0xff] }
 0x1e9   : > { %2040 = vmatprep.mubr.f32.mxu0 %v7556_v57  ;;  %v754_v57 = vrot.slane %v342_v19, 1  ;;  %v3480_v19 = vld [vmem:[#allocation4 + $0x8] sm:$0xff] }
 0x1ea   : > { %v5564_v27 = vpack.c.bf16 %v3480_v19, %v3479_v14  ;;  %v3490_v14 = vld [vmem:[#allocation4 + $0x58] sm:$0xff]  ;;  %v3492_v19 = vld [vmem:[#allocation4 + $0x68] sm:$0xff] }
 0x1eb   : > { %v7799_v49 = vsel %vm426_vm0, %v752_v23, %v754_v57  ;;  %v3485_v57 = vld [vmem:[#allocation4 + $0x30] sm:$0xff] }
 0x1ec   : > { %2041 = vmatmul.mubr.f32.gmra.mrb[58].mxu0 %v9033_v29  ;;  %5565 = vmatpush1.bf16.msra.mxu1 %v5564_v27  ;;  %v9035_v27 = vld [vmem:[#allocation10_spill] sm:$0xff] }
 0x1ed   : > { %2045 = vmatprep.mubr.f32.mxu0 %v792_v11  ;;  %v907_v11 = vsel %vm571_vm1, %v904_v2, %v906_v60  ;;  %5566 = vmatprep.subr.bf16.mxu1 %v8996_v30  ;;  %v3484_v2 = vld [vmem:[#allocation4 + $0x28] sm:$0xff]  ;;  %v3607_v60 = vld [vmem:[#allocation4 + $0x400] sm:$0xff] }
 0x1ee   : > { %5257 = vmatmul.mubr.f32.gmra.mrb[30].mxu1 %v907_v11  ;;  %v7809_v59 = vpack.c.bf16 %v3608_v47, %v3607_v60  ;;  %v3488_v11 = vld [vmem:[#allocation4 + $0x48] sm:$0xff]  ;;  %v3501_v47 = vld [vmem:[#allocation4 + $0xb0] sm:$0xff] }
 0x1ef   : > { %v9037_v60 = vld [vmem:[#allocation15_spill] sm:$0xff] }
 0x1f0   : > { %2046 = vmatmul.mubr.f32.gmra.mrb[60].mxu0 %v7787_v50  ;;  %5568 = vmatpush1.bf16.msra.mxu1 %v5567_v62  ;;  %9034 = vst [vmem:[#allocation11_spill] sm:$0xff] %v7809_v59  ;;  %v3494_v62 = vld [vmem:[#allocation4 + $0x78] sm:$0xff] }
 0x1f1   : > { %2050 = vmatprep.mubr.f32.mxu0 %v794_v0  ;;  %v3483_v0 = vld [vmem:[#allocation4 + $0x20] sm:$0xff]  ;;  %5569 = vmatprep.subr.bf16.mxu1 %v8996_v30 }
 0x1f2   : > { %v5570_v23 = vpack.c.bf16 %v3484_v2, %v3483_v0  ;;  %5756 = vmatprep.subr.bf16.mxu0 %v7809_v59  ;;  %v3496_v0 = vld [vmem:[#allocation4 + $0x88] sm:$0xff]  ;;  %v9036_v2 = vld [vmem:[#allocation12_spill] sm:$0xff] }
 0x1f4   : > { %2051 = vmatmul.mubr.f32.gmra.mrb[62].mxu0 %v7799_v49  ;;  %5571 = vmatpush1.bf16.msra.mxu1 %v5570_v23  ;;  %v3497_v23 = vld [vmem:[#allocation4 + $0x90] sm:$0xff] }
 0x1f5   : > { %2120 = vmatprep.mubr.f32.mxu0 %v6780_v35  ;;  %v3486_v35 = vld [vmem:[#allocation4 + $0x38] sm:$0xff]  ;;  %5572 = vmatprep.subr.bf16.mxu1 %v8996_v30 }
 0x1f8   : > { %2121 = vmatmul.mubr.f32.vlgmr.msra.gmra.mrb[0].mxu0 %v6747_v21  ;;  %v5573_v21 = vpack.c.bf16 %v3486_v35, %v3485_v57  ;;  %v3498_v57 = vld [vmem:[#allocation4 + $0x98] sm:$0xff]  ;;  %v3500_v35 = vld [vmem:[#allocation4 + $0xa8] sm:$0xff] }
 0x1f9   : > { %2125 = vmatprep.mubr.f32.mxu0 %v6801_v45  ;;  %v3487_v45 = vld [vmem:[#allocation4 + $0x40] sm:$0xff]  ;;  %5758 = vmatpush3.bf16.msra.mxu0 %v7809_v59 }
 0x1fa   : > { %5574 = vmatpush1.bf16.msra.mxu1 %v5573_v21  ;;  %v3502_v21 = vld [vmem:[#allocation4 + $0xb8] sm:$0xff] }
 0x1fb   : > { %5575 = vmatprep.subr.bf16.mxu1 %v8996_v30 }
 0x1fc   : > { %2126 = vmatmul.mubr.f32.gmra.mrb[2].mxu0 %v6749_v22  ;;  %v5576_v22 = vpack.c.bf16 %v3488_v11, %v3487_v45  ;;  %v9038_v45 = vld [vmem:[#allocation18_spill] sm:$0xff]  ;;  %v3504_v11 = vld [vmem:[#allocation4 + $0xc8] sm:$0xff] }
 0x1fd   : > { %2130 = vmatprep.mubr.f32.mxu0 %v6822_v56  ;;  %v3489_v56 = vld [vmem:[#allocation4 + $0x50] sm:$0xff] }
 0x1fe   : > { %5577 = vmatpush1.bf16.msra.mxu1 %v5576_v22  ;;  %v9039_v22 = vld [vmem:[#allocation19_spill] sm:$0xff] }
 0x1ff   : > { %5578 = vmatprep.subr.bf16.mxu1 %v8996_v30 }
 0x200   : > { %2131 = vmatmul.mubr.f32.gmra.mrb[4].mxu0 %v6782_v37  ;;  %v5579_v37 = vpack.c.bf16 %v3490_v14, %v3489_v56  ;;  %v3505_v56 = vld [vmem:[#allocation4 + $0xd0] sm:$0xff]  ;;  %v3506_v14 = vld [vmem:[#allocation4 + $0xd8] sm:$0xff] }
 0x201   : > { %2135 = vmatprep.mubr.f32.mxu0 %v6846_v5  ;;  %v3491_v5 = vld [vmem:[#allocation4 + $0x60] sm:$0xff] }
 0x202   : > { %5580 = vmatpush1.bf16.msra.mxu1 %v5579_v37  ;;  %v5582_v16 = vpack.c.bf16 %v3492_v19, %v3491_v5  ;;  %v3612_v37 = vld [vmem:[#allocation4 + $0x428] sm:$0xff] }
 0x203   : > { %5581 = vmatprep.subr.bf16.mxu1 %v8996_v30 }
 0x204   : > { %2136 = vmatmul.mubr.f32.gmra.mrb[6].mxu0 %v6784_v38  ;;  %v3493_v38 = vld [vmem:[#allocation4 + $0x70] sm:$0xff] }
 0x205   : > { %2140 = vmatprep.mubr.f32.mxu0 %v9011_v55  ;;  %v5585_v55 = vpack.c.bf16 %v3494_v62, %v3493_v38  ;;  %v3614_v38 = vld [vmem:[#allocation4 + $0x438] sm:$0xff] }
 0x206   : > { %5583 = vmatpush1.bf16.msra.mxu1 %v5582_v16  ;;  %v9045_v16 = vld [vmem:[#allocation35_spill] sm:$0xff] }
 0x207   : > { %5584 = vmatprep.subr.bf16.mxu1 %v8996_v30 }
 0x208   : > { %2141 = vmatmul.mubr.f32.gmra.mrb[8].mxu0 %v6826_v58  ;;  %v3495_v58 = vld [vmem:[#allocation4 + $0x80] sm:$0xff] }
 0x209   : > { %2145 = vmatprep.mubr.f32.mxu0 %v9012_v7  ;;  %v5588_v7 = vpack.c.bf16 %v3496_v0, %v3495_v58  ;;  %v3615_v0 = vld [vmem:[#allocation4 + $0x440] sm:$0xff] }
 0x20a   : > { %5586 = vmatpush1.bf16.msra.mxu1 %v5585_v55  ;;  %v9047_v55 = vld [vmem:[#allocation36_spill] sm:$0xff] }
 0x20b   : > { %5587 = vmatprep.subr.bf16.mxu1 %v8996_v30 }
 0x20c   : > { %2146 = vmatmul.mubr.f32.gmra.mrb[10].mxu0 %v9035_v27  ;;  %v3613_v27 = vld [vmem:[#allocation4 + $0x430] sm:$0xff] }
 0x20d   : > { %2150 = vmatprep.mubr.f32.mxu0 %v9013_v53  ;;  %v5591_v53 = vpack.c.bf16 %v3498_v57, %v3497_v23  ;;  %v7923_v62 = vpack.c.bf16 %v3614_v38, %v3613_v27  ;;  %v3512_v23 = vld [vmem:[#allocation4 + $0x108] sm:$0xff] }
 0x20e   : > { %5589 = vmatpush1.bf16.msra.mxu1 %v5588_v7  ;;  %v3616_v7 = vld [vmem:[#allocation4 + $0x448] sm:$0xff] }
 0x20f   : > { %5590 = vmatprep.subr.bf16.mxu1 %v8996_v30  ;;  %9046 = vst [vmem:[#allocation16_spill] sm:$0xff] %v7923_v62  ;;  %v3524_v27 = vld [vmem:[#allocation4 + $0x168] sm:$0xff] }
 0x210   : > { %2151 = vmatmul.mubr.f32.gmra.mrb[12].mxu0 %v6867_v15  ;;  %v3499_v15 = vld [vmem:[#allocation4 + $0xa0] sm:$0xff] }
 0x211   : > { %2155 = vmatprep.mubr.f32.mxu0 %v9014_v39  ;;  %v5594_v39 = vpack.c.bf16 %v3500_v35, %v3499_v15  ;;  %v3617_v15 = vld [vmem:[#allocation4 + $0x450] sm:$0xff]  ;;  %v3618_v35 = vld [vmem:[#allocation4 + $0x458] sm:$0xff] }
 0x212   : > { %5592 = vmatpush1.bf16.msra.mxu1 %v5591_v53  ;;  %v9049_v53 = vld [vmem:[#allocation39_spill] sm:$0xff] }
 0x213   : > { %5593 = vmatprep.subr.bf16.mxu1 %v8996_v30 }
 0x214   : > { %2156 = vmatmul.mubr.f32.gmra.mrb[14].mxu0 %v9036_v2  ;;  %v3511_v2 = vld [vmem:[#allocation4 + $0x100] sm:$0xff] }
 0x215   : > { %2160 = vmatprep.mubr.f32.mxu0 %v9015_v24  ;;  %v5597_v24 = vpack.c.bf16 %v3502_v21, %v3501_v47  ;;  %v5612_v57 = vpack.c.bf16 %v3512_v23, %v3511_v2  ;;  %v3619_v21 = vld [vmem:[#allocation4 + $0x460] sm:$0xff]  ;;  %v3526_v2 = vld [vmem:[#allocation4 + $0x178] sm:$0xff] }
 0x216   : > { %5595 = vmatpush1.bf16.msra.mxu1 %v5594_v39  ;;  %v7939_v39 = vpack.c.bf16 %v3618_v35, %v3617_v15  ;;  %v3527_v15 = vld [vmem:[#allocation4 + $0x180] sm:$0xff]  ;;  %v3528_v35 = vld [vmem:[#allocation4 + $0x188] sm:$0xff] }
 0x217   : > { %5596 = vmatprep.subr.bf16.mxu1 %v8996_v30 }
 0x218   : > { %2161 = vmatmul.mubr.f32.gmra.mrb[16].mxu0 %v6905_v44  ;;  %v3503_v44 = vld [vmem:[#allocation4 + $0xc0] sm:$0xff]  ;;  %9050 = vst [vmem:[#allocation20_spill] sm:$0xff] %v7939_v39 }
 0x219   : > { %2165 = vmatprep.mubr.f32.mxu0 %v9016_v33  ;;  %v5600_v33 = vpack.c.bf16 %v3504_v11, %v3503_v44  ;;  %v3514_v44 = vld [vmem:[#allocation4 + $0x118] sm:$0xff] }
 0x21a   : > { %5598 = vmatpush1.bf16.msra.mxu1 %v5597_v24  ;;  %v3620_v24 = vld [vmem:[#allocation4 + $0x468] sm:$0xff] }
 0x21b   : > { %5599 = vmatprep.subr.bf16.mxu1 %v8996_v30 }
 0x21c   : > { %2166 = vmatmul.mubr.f32.gmra.mrb[18].mxu0 %v9037_v60  ;;  %v9051_v60 = vld [vmem:[#allocation40_spill] sm:$0xff] }
 0x21d   : > { %2170 = vmatprep.mubr.f32.mxu0 %v9017_v41  ;;  %v5603_v41 = vpack.c.bf16 %v3506_v14, %v3505_v56  ;;  %v9054_v14 = vld [vmem:[#allocation42_spill] sm:$0xff] }
 0x21e   : > { %5601 = vmatpush1.bf16.msra.mxu1 %v5600_v33  ;;  %v3621_v33 = vld [vmem:[#allocation4 + $0x470] sm:$0xff] }
 0x21f   : > { %5602 = vmatprep.subr.bf16.mxu1 %v8996_v30 }
 0x220   : > { %2171 = vmatmul.mubr.f32.gmra.mrb[20].mxu0 %v9038_v45  ;;  %v3513_v45 = vld [vmem:[#allocation4 + $0x110] sm:$0xff] }
 0x221   : > { %2175 = vmatprep.mubr.f32.mxu0 %v9018_v3  ;;  %v5615_v11 = vpack.c.bf16 %v3514_v44, %v3513_v45  ;;  %v3529_v45 = vld [vmem:[#allocation4 + $0x190] sm:$0xff]  ;;  %v3530_v44 = vld [vmem:[#allocation4 + $0x198] sm:$0xff] }
 0x222   : > { %5604 = vmatpush1.bf16.msra.mxu1 %v5603_v41 }
 0x223   : > { %5605 = vmatprep.subr.bf16.mxu1 %v8996_v30 }
 0x224   : > { %2176 = vmatmul.mubr.f32.gmra.mrb[22].mxu0 %v9039_v22  ;;  %v3622_v22 = vld [vmem:[#allocation4 + $0x478] sm:$0xff] }
 0x225   : > { %2180 = vmatprep.mubr.f32.mxu0 %v9019_v63  ;;  %v3609_v63 = vld [vmem:[#allocation4 + $0x410] sm:$0xff]  ;;  %v7956_v56 = vpack.c.bf16 %v3622_v22, %v3621_v33 }
 0x227   : > { %9053 = vst [vmem:[#allocation22_spill] sm:$0xff] %v7956_v56 }
 0x228   : > { %2181 = vmatmul.mubr.f32.gmra.mrb[24].mxu0 %v6981_v51  ;;  %v3507_v51 = vld [vmem:[#allocation4 + $0xe0] sm:$0xff] }
 0x229   : > { %2185 = vmatprep.mubr.f32.mxu0 %v9020_v28  ;;  %v3610_v28 = vld [vmem:[#allocation4 + $0x418] sm:$0xff] }
 0x22c   : > { %2186 = vmatmul.mubr.f32.gmra.mrb[26].mxu0 %v6983_v54  ;;  %v3508_v54 = vld [vmem:[#allocation4 + $0xe8] sm:$0xff] }
 0x22d   : > { %2190 = vmatprep.mubr.f32.mxu0 %v9021_v1  ;;  %v5606_v3 = vpack.c.bf16 %v3508_v54, %v3507_v51  ;;  %v3515_v51 = vld [vmem:[#allocation4 + $0x120] sm:$0xff]  ;;  %v3516_v54 = vld [vmem:[#allocation4 + $0x128] sm:$0xff] }
 0x22f   : > { %5607 = vmatpush1.bf16.msra.mxu1 %v5606_v3 }
 0x230   : > { %2191 = vmatmul.mubr.f32.gmra.mrb[28].mxu0 %v7019_v40  ;;  %v9040_v40 = vld [vmem:[#allocation28_spill] sm:$0xff]  ;;  %5608 = vmatprep.subr.bf16.mxu1 %v8996_v30 }
 0x231   : > { %2195 = vmatprep.mubr.f32.mxu0 %v9022_v42  ;;  %v7906_v42 = vpack.c.bf16 %v3610_v28, %v3609_v63  ;;  %v3518_v63 = vld [vmem:[#allocation4 + $0x138] sm:$0xff] }
 0x233   : > { %9042 = vst [vmem:[#allocation13_spill] sm:$0xff] %v7906_v42  ;;  %5760 = vmatprep.subr.bf16.mxu0 %v7906_v42 }
 0x234   : > { %2196 = vmatmul.mubr.f32.gmra.mrb[30].mxu0 %v7021_v43  ;;  %v6457_v43 = vmov 0.0  }
 0x235   : > { %2200 = vmatprep.mubr.f32.mxu0 %v9023_v25  ;;  %2506 = vst [vmem:[#allocation3] sm:$0xff] %v6457_v43  ;;  %2507 = vst [vmem:[#allocation3 + $0x8] sm:$0xff] %v6457_v43  ;;  %5762 = vmatpush3.bf16.msra.mxu0 %v7906_v42 }
 0x236   : > { %2508 = vst [vmem:[#allocation3 + $0x10] sm:$0x3] %v6457_v43  ;;  %2510 = vst [vmem:[#allocation3 + $0x198] sm:$0xff] %v6457_v43 }
 0x237   : > { %2511 = vst [vmem:[#allocation3 + $0x1a0] sm:$0xff] %v6457_v43  ;;  %2512 = vst [vmem:[#allocation3 + $0x1a8] sm:$0x3] %v6457_v43 }
 0x238   : > { %2201 = vmatmul.mubr.f32.gmra.mrb[32].mxu0 %v7045_v18  ;;  %2514 = vst [vmem:[#allocation3 + $0x18] sm:$0x1] %v6457_v43  ;;  %2515 = vst [vmem:[#allocation3 + $0x30] sm:$0x1] %v6457_v43  ;;  %v3509_v18 = vld [vmem:[#allocation4 + $0xf0] sm:$0xff] }
 0x239   : > { %2205 = vmatprep.mubr.f32.mxu0 %v9024_v13  ;;  %2516 = vst [vmem:[#allocation3 + $0x48] sm:$0x1] %v6457_v43  ;;  %2517 = vst [vmem:[#allocation3 + $0x60] sm:$0x1] %v6457_v43 }
 0x23a   : > { %2518 = vst [vmem:[#allocation3 + $0x78] sm:$0x1] %v6457_v43  ;;  %2519 = vst [vmem:[#allocation3 + $0x90] sm:$0x1] %v6457_v43 }
 0x23b   : > { %2520 = vst [vmem:[#allocation3 + $0xa8] sm:$0x1] %v6457_v43  ;;  %2521 = vst [vmem:[#allocation3 + $0xc0] sm:$0x1] %v6457_v43 }
 0x23c   : > { %2206 = vmatmul.mubr.f32.gmra.mrb[34].mxu0 %v7047_v34  ;;  %2522 = vst [vmem:[#allocation3 + $0xd8] sm:$0x1] %v6457_v43  ;;  %2523 = vst [vmem:[#allocation3 + $0xf0] sm:$0x1] %v6457_v43  ;;  %v3510_v34 = vld [vmem:[#allocation4 + $0xf8] sm:$0xff] }
 0x23d   : > { %2210 = vmatprep.mubr.f32.mxu0 %v9025_v4  ;;  %2524 = vst [vmem:[#allocation3 + $0x108] sm:$0x1] %v6457_v43  ;;  %2525 = vst [vmem:[#allocation3 + $0x120] sm:$0x1] %v6457_v43  ;;  %v5609_v1 = vpack.c.bf16 %v3510_v34, %v3509_v18  ;;  %v2678_v13 = vld [vmem:[#allocation3 + $0x1] sm:$0xff]  ;;  %v2679_v19 = vld [vmem:[#allocation3 + $0x9] sm:$0xff] }
 0x23e   : > { %2526 = vst [vmem:[#allocation3 + $0x138] sm:$0x1] %v6457_v43  ;;  %2527 = vst [vmem:[#allocation3 + $0x150] sm:$0x1] %v6457_v43  ;;  %v9043_v4 = vld [vmem:[#allocation32_spill] sm:$0xff]  ;;  %3694 = vmatprep.mubr.f32.mxu1 %v2678_v13 }
 0x23f   : > { %2528 = vst [vmem:[#allocation3 + $0x168] sm:$0x1] %v6457_v43  ;;  %2529 = vst [vmem:[#allocation3 + $0x180] sm:$0x1] %v6457_v43  ;;  %5610 = vmatpush1.bf16.msra.mxu1 %v5609_v1  ;;  %v3520_v1 = vld [vmem:[#allocation4 + $0x148] sm:$0xff] }
 0x240   : > { %2211 = vmatmul.mubr.f32.gmra.mrb[36].mxu0 %v7069_v10  ;;  %2532 = vst [vmem:[#allocation3 + $0x29] sm:$0x1] %v6457_v43  ;;  %2533 = vst [vmem:[#allocation3 + $0x41] sm:$0x1] %v6457_v43  ;;  %v9041_v10 = vld [vmem:[#allocation31_spill] sm:$0xff]  ;;  %5611 = vmatprep.subr.bf16.mxu1 %v8996_v30 }
 0x241   : > { %2215 = vmatprep.mubr.f32.mxu0 %v9026_v61  ;;  %2534 = vst [vmem:[#allocation3 + $0x59] sm:$0x1] %v6457_v43  ;;  %2535 = vst [vmem:[#allocation3 + $0x71] sm:$0x1] %v6457_v43 }
 0x242   : > { %2536 = vst [vmem:[#allocation3 + $0x89] sm:$0x1] %v6457_v43  ;;  %2537 = vst [vmem:[#allocation3 + $0xa1] sm:$0x1] %v6457_v43 }
 0x243   : > { %2538 = vst [vmem:[#allocation3 + $0xb9] sm:$0x1] %v6457_v43  ;;  %2539 = vst [vmem:[#allocation3 + $0xd1] sm:$0x1] %v6457_v43 }
 0x244   : > { %2216 = vmatmul.mubr.f32.gmra.mrb[38].mxu0 %v9040_v40  ;;  %2540 = vst [vmem:[#allocation3 + $0xe9] sm:$0x1] %v6457_v43  ;;  %2541 = vst [vmem:[#allocation3 + $0x101] sm:$0x1] %v6457_v43  ;;  %v5618_v40 = vpack.c.bf16 %v3516_v54, %v3515_v51 }
 0x245   : > { %2542 = vst [vmem:[#allocation3 + $0x119] sm:$0x1] %v6457_v43  ;;  %2543 = vst [vmem:[#allocation3 + $0x131] sm:$0x1] %v6457_v43  ;;  %2220 = vmatprep.mubr.f32.mxu0 %v9027_v12  ;;  %v3611_v12 = vld [vmem:[#allocation4 + $0x420] sm:$0xff] }
 0x246   : > { %2544 = vst [vmem:[#allocation3 + $0x149] sm:$0x1] %v6457_v43  ;;  %2545 = vst [vmem:[#allocation3 + $0x161] sm:$0x1] %v6457_v43 }
 0x247   : > { %2546 = vst [vmem:[#allocation3 + $0x179] sm:$0x1] %v6457_v43  ;;  %2547 = vst [vmem:[#allocation3 + $0x191] sm:$0x1] %v6457_v43  ;;  %v7909_v25 = vpop.f32.mrb[0].mxu1 }
 0x248   : > { %2513 = vst [vmem:[#allocation3] sm:$0x1] %v6457_v43  ;;  %2530 = vst [vmem:[#allocation3 + $0x198] sm:$0x1] %v6457_v43  ;;  %2221 = vmatmul.mubr.f32.gmra.mrb[40].mxu0 %v9041_v10  ;;  %v7913_v61 = vpop.f32.mrb[1].mxu1 }
 0x249   : > { %2531 = vst [vmem:[#allocation3 + $0x11] sm:$0x1] %v6457_v43  ;;  %2548 = vst [vmem:[#allocation3 + $0x1a9] sm:$0x1] %v6457_v43  ;;  %2225 = vmatprep.mubr.f32.mxu0 %v9028_v6  ;;  %v7917_v6 = vpack.c.bf16 %v3612_v37, %v3611_v12  ;;  %v3522_v37 = vld [vmem:[#allocation4 + $0x158] sm:$0xff] }
 0x24b   : > { %9044 = vst [vmem:[#allocation14_spill] sm:$0xff] %v7917_v6  ;;  %5764 = vmatprep.subr.bf16.mxu0 %v7917_v6 }
 0x24c   : > { %2226 = vmatmul.mubr.f32.gmra.mrb[42].mxu0 %v9043_v4 }
 0x24d   : > { %2230 = vmatprep.mubr.f32.mxu0 %v9029_v52  ;;  %5766 = vmatpush3.bf16.msra.mxu0 %v7917_v6  ;;  %v7927_v52 = vpop.f32.mrb[2].mxu1 }
 0x24e   : > { %5768 = vmatprep.subr.bf16.mxu0 %v7923_v62  ;;  %v7930_v58 = vpop.f32.mrb[3].mxu1 }
 0x24f   : > { %v2614_v5 = vld [vmem:[#allocation3] sm:$0xff] }
 0x250   : > { %3695 = vmatmul.mubr.f32.vlgmr.msra.gmra.mrb[32].mxu1 %v2614_v5  ;;  %2231 = vmatmul.mubr.f32.gmra.mrb[44].mxu0 %v9045_v16  ;;  %v3523_v16 = vld [vmem:[#allocation4 + $0x160] sm:$0xff] }
 0x251   : > { %3699 = vmatprep.mubr.f32.mxu1 %v2679_v19  ;;  %2235 = vmatprep.mubr.f32.mxu0 %v9030_v9  ;;  %v7934_v9 = vpack.c.bf16 %v3616_v7, %v3615_v0  ;;  %v5630_v38 = vpack.c.bf16 %v3524_v27, %v3523_v16  ;;  %v3525_v7 = vld [vmem:[#allocation4 + $0x170] sm:$0xff]  ;;  %v3539_v27 = vld [vmem:[#allocation4 + $0x1e0] sm:$0xff] }
 0x252   : > { %5770 = vmatpush3.bf16.msra.mxu0 %v7923_v62  ;;  %5613 = vmatpush1.bf16.msra.mxu1 %v5612_v57  ;;  %v5633_v23 = vpack.c.bf16 %v3526_v2, %v3525_v7  ;;  %v8042_v2 = vld [vmem:[%s8839_s2] ss:$0 sm:$0xff] }
 0x253   : > { %9048 = vst [vmem:[#allocation17_spill] sm:$0xff] %v7934_v9  ;;  %5772 = vmatprep.subr.bf16.mxu0 %v7934_v9  ;;  %5614 = vmatprep.subr.bf16.mxu1 %v8996_v30 }
 0x254   : > { %3700 = vmatmul.mubr.f32.gmra.mrb[34].mxu1 %v6457_v43  ;;  %2236 = vmatmul.mubr.f32.gmra.mrb[46].mxu0 %v9047_v55  ;;  %v9055_v43 = vmax.f32 %v7782_v48, 0.0 }
 0x255   : > { %2240 = vmatprep.mubr.f32.mxu0 %v7161_v26  ;;  %v7944_v26 = vpop.f32.mrb[4].mxu1 }
 0x256   : > { %5774 = vmatpush3.bf16.msra.mxu0 %v7934_v9  ;;  %v7947_v47 = vpop.f32.mrb[5].mxu1  ;;  %5616 = vmatpush1.bf16.msra.mxu1 %v5615_v11  ;;  %v867_v18 = vrot.slane %v9055_v43, 1  ;;  %v5639_v11 = vpack.c.bf16 %v3530_v44, %v3529_v45  ;;  %v3542_v45 = vld [vmem:[#allocation4 + $0x1f8] sm:$0xff] }
 0x257   : > { %5776 = vmatprep.subr.bf16.mxu0 %v7939_v39  ;;  %5617 = vmatprep.subr.bf16.mxu1 %v8996_v30 }
 0x258   : > { %2241 = vmatmul.mubr.f32.gmra.mrb[48].mxu0 %v9049_v53 }
 0x259   : > { %2245 = vmatprep.mubr.f32.mxu0 %v9031_v20  ;;  %v7950_v20 = vpack.c.bf16 %v3620_v24, %v3619_v21 }
 0x25a   : > { %5778 = vmatpush3.bf16.msra.mxu0 %v7939_v39  ;;  %5619 = vmatpush1.bf16.msra.mxu1 %v5618_v40  ;;  %v3533_v40 = vld [vmem:[#allocation4 + $0x1b0] sm:$0xff] }
 0x25b   : > { %9052 = vst [vmem:[#allocation21_spill] sm:$0xff] %v7950_v20  ;;  %5780 = vmatprep.subr.bf16.mxu0 %v7950_v20  ;;  %5620 = vmatprep.subr.bf16.mxu1 %v8996_v30 }
 0x25c   : > { %2246 = vmatmul.mubr.f32.gmra.mrb[50].mxu0 %v9051_v60  ;;  %v5636_v60 = vpack.c.bf16 %v3528_v35, %v3527_v15 }
 0x25d   : > { %2250 = vmatprep.mubr.f32.mxu0 %v9032_v46  ;;  %v7961_v46 = vpop.f32.mrb[6].mxu1 }
 0x25e   : > { %5782 = vmatpush3.bf16.msra.mxu0 %v7950_v20  ;;  %v7964_v41 = vpop.f32.mrb[7].mxu1 }
 0x25f   : > { %5784 = vmatprep.subr.bf16.mxu0 %v7956_v56 }
 0x260   : > { %2251 = vmatmul.mubr.f32.gmra.mrb[52].mxu0 %v7165_v31  ;;  %v864_v31 = vrot.slane %v7777_v17, 1 }
 0x261   : > { %2255 = vmatprep.mubr.f32.mxu0 %v9033_v29  ;;  %v865_v29 = vrot.slane %v7779_v8, 1 }
 0x262   : > { %5786 = vmatpush3.bf16.msra.mxu0 %v7956_v56 }
 0x263   : > { %v866_v3 = vsel %vm426_vm0, %v864_v31, %v865_v29  ;;  %v868_v10 = vsel %vm426_vm0, %v865_v29, %v867_v18  ;;  %v3532_v31 = vld [vmem:[#allocation4 + $0x1a8] sm:$0xff] }
 0x264   : > { %2256 = vmatmul.mubr.f32.gmra.mrb[54].mxu0 %v9054_v14  ;;  %v3531_v14 = vld [vmem:[#allocation4 + $0x1a0] sm:$0xff] }
 0x265   : > { %2260 = vmatprep.mubr.f32.mxu0 %v7787_v50  ;;  %v7976_v50 = vpop.f32.mrb[8].mxu1  ;;  %v5642_v29 = vpack.c.bf16 %v3532_v31, %v3531_v14 }
 0x266   : > { %v7979_v34 = vpop.f32.mrb[9].mxu1 }
 0x267   : > { %v7984_v48 = vpop.f32.mrb[10].mxu1 }
 0x268   : > { %2261 = vmatmul.mubr.f32.gmra.mrb[56].mxu0 %v7527_v36  ;;  %v3517_v36 = vld [vmem:[#allocation4 + $0x130] sm:$0xff]  ;;  %v7987_v28 = vpop.f32.mrb[11].mxu1 }
 0x269   : > { %2265 = vmatprep.mubr.f32.mxu0 %v7799_v49  ;;  %v5621_v49 = vpack.c.bf16 %v3518_v63, %v3517_v36  ;;  %v7990_v4 = vpop.f32.mrb[12].mxu1  ;;  %v3535_v36 = vld [vmem:[#allocation4 + $0x1c0] sm:$0xff]  ;;  %v3536_v63 = vld [vmem:[#allocation4 + $0x1c8] sm:$0xff] }
 0x26a   : > { %v7992_v12 = vpop.f32.mrb[13].mxu1 }
 0x26b   : > { %5622 = vmatpush1.bf16.msra.mxu1 %v5621_v49  ;;  %v7995_v19 = vpop.f32.mrb[14].mxu1  ;;  %v5648_v49 = vpack.c.bf16 %v3536_v63, %v3535_v36 }
 0x26c   : > { %2266 = vmatmul.mubr.f32.gmra.mrb[58].mxu0 %v7543_v32  ;;  %5623 = vmatprep.subr.bf16.mxu1 %v8996_v30  ;;  %v3519_v32 = vld [vmem:[#allocation4 + $0x140] sm:$0xff] }
 0x26d   : > { %2270 = vmatprep.mubr.f32.mxu0 %v866_v3  ;;  %v5624_v13 = vpack.c.bf16 %v3520_v1, %v3519_v32  ;;  %v3534_v3 = vld [vmem:[#allocation4 + $0x1b8] sm:$0xff] }
 0x26e   : > { %v5645_v43 = vpack.c.bf16 %v3534_v3, %v3533_v40 }
 0x26f   : > { %5625 = vmatpush1.bf16.msra.mxu1 %v5624_v13  ;;  %v3537_v13 = vld [vmem:[#allocation4 + $0x1d0] sm:$0xff] }
 0x270   : > { %2271 = vmatmul.mubr.f32.gmra.mrb[60].mxu0 %v7777_v17  ;;  %5626 = vmatprep.subr.bf16.mxu1 %v8996_v30  ;;  %v3521_v17 = vld [vmem:[#allocation4 + $0x150] sm:$0xff] }
 0x271   : > { %2275 = vmatprep.mubr.f32.mxu0 %v868_v10  ;;  %v5627_v5 = vpack.c.bf16 %v3522_v37, %v3521_v17  ;;  %v3538_v17 = vld [vmem:[#allocation4 + $0x1d8] sm:$0xff] }
 0x272   : > { %v5651_v37 = vpack.c.bf16 %v3538_v17, %v3537_v13 }
 0x273   : > { %5628 = vmatpush1.bf16.msra.mxu1 %v5627_v5 }
 0x274   : > { %2276 = vmatmul.mubr.f32.gmra.mrb[62].mxu0 %v7779_v8  ;;  %5629 = vmatprep.subr.bf16.mxu1 %v8996_v30  ;;  %v7997_v8 = vpop.f32.mrb[15].mxu1 }
 0x275   : > { %v8000_v55 = vpop.f32.mrb[16].mxu1 }
 0x276   : > { %v8002_v0 = vpop.f32.mrb[17].mxu1 }
 0x277   : > { %5631 = vmatpush1.bf16.msra.mxu1 %v5630_v38  ;;  %v8005_v57 = vpop.f32.mrb[18].mxu1  ;;  %v3540_v38 = vld [vmem:[#allocation4 + $0x1e8] sm:$0xff] }
 0x278   : > { %5632 = vmatprep.subr.bf16.mxu1 %v8996_v30  ;;  %v8007_v53 = vpop.f32.mrb[19].mxu1  ;;  %v5654_v7 = vpack.c.bf16 %v3540_v38, %v3539_v27 }
 0x279   : > { %v8010_v21 = vpop.f32.mrb[20].mxu1 }
 0x27a   : > { %v8012_v24 = vpop.f32.mrb[21].mxu1 }
 0x27b   : > { %5634 = vmatpush1.bf16.msra.mxu1 %v5633_v23  ;;  %v8015_v33 = vpop.f32.mrb[22].mxu1 }
 0x27c   : > { %5635 = vmatprep.subr.bf16.mxu1 %v8996_v30  ;;  %v8017_v22 = vpop.f32.mrb[23].mxu1 }
 0x27d   : > { %v8020_v51 = vpop.f32.mrb[24].mxu1 }
 0x27e   : > { %v8022_v54 = vpop.f32.mrb[25].mxu1 }
 0x27f   : > { %5637 = vmatpush1.bf16.msra.mxu1 %v5636_v60  ;;  %v8025_v18 = vpop.f32.mrb[26].mxu1  ;;  %v3541_v60 = vld [vmem:[#allocation4 + $0x1f0] sm:$0xff] }
 0x280   : > { %5638 = vmatprep.subr.bf16.mxu1 %v8996_v30  ;;  %v8027_v10 = vpop.f32.mrb[27].mxu1  ;;  %v5657_v44 = vpack.c.bf16 %v3542_v45, %v3541_v60 }
 0x281   : > { %v8030_v32 = vpop.f32.mrb[28].mxu1 }
 0x282   : > { %v8032_v1 = vpop.f32.mrb[29].mxu1 }
 0x283   : > { %5640 = vmatpush1.bf16.msra.mxu1 %v5639_v11 }
 0x284   : > { %5641 = vmatprep.subr.bf16.mxu1 %v8996_v30 }
 0x287   : > { %5643 = vmatpush1.bf16.msra.mxu1 %v5642_v29 }
 0x288   : > { %5644 = vmatprep.subr.bf16.mxu1 %v8996_v30 }
 0x28b   : > { %5646 = vmatpush1.bf16.msra.mxu1 %v5645_v43 }
 0x28c   : > { %5647 = vmatprep.subr.bf16.mxu1 %v8996_v30 }
 0x28f   : > { %5649 = vmatpush1.bf16.msra.mxu1 %v5648_v49 }
 0x290   : > { %5650 = vmatprep.subr.bf16.mxu1 %v8996_v30 }
 0x293   : > { %5652 = vmatpush1.bf16.msra.mxu1 %v5651_v37 }
 0x294   : > { %5653 = vmatprep.subr.bf16.mxu1 %v8996_v30 }
 0x297   : > { %5655 = vmatpush1.bf16.msra.mxu1 %v5654_v7 }
 0x298   : > { %5656 = vmatprep.subr.bf16.mxu1 %v8996_v30 }
 0x29b   : > { %5658 = vmatpush1.bf16.msra.mxu1 %v5657_v44 }
 0x29c   : > { %5659 = vmatprep.subr.bf16.mxu1 %v8996_v30 }
 0x2c1   : > { %v8035_v5 = vpop.f32.mrb[30].mxu1 }
 0x2c2   : > { %v8037_v16 = vpop.f32.mrb[31].mxu1 }
 0x2cb   : > { %v2122_v23 = vpop.f32.mrb[0].mxu0 }
 0x2cc   : > { %v5803_v15 = vadd.f32 %v8042_v2, %v2122_v23  ;;  %v2124_v35 = vpop.f32.mrb[1].mxu0 }
 0x2ce   : > { %v2348_v11 = vadd.f32 %v5803_v15, %v7913_v61 }
 0x2cf   : > { %v2127_v14 = vpop.f32.mrb[2].mxu0 }
 0x2d0   : > { %v2549_v31 = vmax.f32 %v2348_v11, 0.0  ;;  %v5804_v29 = vadd.f32 %v8042_v2, %v2127_v14  ;;  %v2129_v40 = vpop.f32.mrb[3].mxu0 }
 0x2d2   : > { %2582 = vst [vmem:[#allocation3 + $0x19] sm:$0xff] %v2549_v31  ;;  %v2353_v3 = vadd.f32 %v5804_v29, %v7909_v25  ;;  %3704 = vmatprep.mubr.f32.mxu1 %v2549_v31 }
 0x2d3   : > { %v2132_v43 = vpop.f32.mrb[4].mxu0 }
 0x2d4   : > { %v2550_v36 = vmax.f32 %v2353_v3, 0.0  ;;  %v5805_v63 = vadd.f32 %v8042_v2, %v2132_v43  ;;  %v2134_v49 = vpop.f32.mrb[5].mxu0 }
 0x2d6   : > { %2583 = vst [vmem:[#allocation3 + $0x21] sm:$0xff] %v2550_v36  ;;  %v2358_v61 = vadd.f32 %v5805_v63, %v7930_v58 }
 0x2d7   : > { %v2137_v13 = vpop.f32.mrb[6].mxu0 }
 0x2d8   : > { %v2551_v17 = vmax.f32 %v2358_v61, 0.0  ;;  %v5806_v37 = vadd.f32 %v8042_v2, %v2137_v13  ;;  %v2139_v27 = vpop.f32.mrb[7].mxu0 }
 0x2d9   : > { %v8053_v38 = vld [vmem:[#allocation3 + $0x18] sm:$0xff] }
 0x2da   : > { %2584 = vst [vmem:[#allocation3 + $0x31] sm:$0xff] %v2551_v17  ;;  %v2363_v7 = vadd.f32 %v5806_v37, %v7927_v52  ;;  %3705 = vmatmul.mubr.f32.gmra.mrb[36].mxu1 %v8053_v38 }
 0x2db   : > { %v2142_v25 = vpop.f32.mrb[8].mxu0  ;;  %3709 = vmatprep.mubr.f32.mxu1 %v2550_v36 }
 0x2dc   : > { %v2552_v23 = vmax.f32 %v2363_v7, 0.0  ;;  %v5807_v15 = vadd.f32 %v8042_v2, %v2142_v25  ;;  %v2144_v35 = vpop.f32.mrb[9].mxu0 }
 0x2dd   : > { %v8058_v60 = vld [vmem:[#allocation3 + $0x20] sm:$0xff] }
 0x2de   : > { %2585 = vst [vmem:[#allocation3 + $0x39] sm:$0xff] %v2552_v23  ;;  %v2368_v58 = vadd.f32 %v5807_v15, %v7947_v47  ;;  %3710 = vmatmul.mubr.f32.gmra.mrb[38].mxu1 %v8058_v60 }
 0x2df   : > { %v2147_v45 = vpop.f32.mrb[10].mxu0  ;;  %3714 = vmatprep.mubr.f32.mxu1 %v2551_v17 }
 0x2e0   : > { %v2553_v44 = vmax.f32 %v2368_v58, 0.0  ;;  %v5808_v52 = vadd.f32 %v8042_v2, %v2147_v45  ;;  %v2149_v11 = vpop.f32.mrb[11].mxu0 }
 0x2e1   : > { %v8063_v14 = vld [vmem:[#allocation3 + $0x30] sm:$0xff] }
 0x2e2   : > { %2586 = vst [vmem:[#allocation3 + $0x49] sm:$0xff] %v2553_v44  ;;  %v2373_v31 = vadd.f32 %v5808_v52, %v7944_v26  ;;  %3715 = vmatmul.mubr.f32.gmra.mrb[40].mxu1 %v8063_v14 }
 0x2e3   : > { %v2152_v29 = vpop.f32.mrb[12].mxu0  ;;  %3719 = vmatprep.mubr.f32.mxu1 %v2552_v23 }
 0x2e4   : > { %v2554_v40 = vmax.f32 %v2373_v31, 0.0  ;;  %v5809_v47 = vadd.f32 %v8042_v2, %v2152_v29  ;;  %v2154_v3 = vpop.f32.mrb[13].mxu0 }
 0x2e5   : > { %v8068_v43 = vld [vmem:[#allocation3 + $0x32] sm:$0xff]  ;;  %v8072_v63 = vld [vmem:[#allocation3 + $0x3a] sm:$0xff] }
 0x2e6   : > { %v8070_v36 = vld [vmem:[#allocation3 + $0x38] sm:$0xff]  ;;  %2587 = vst [vmem:[#allocation3 + $0x51] sm:$0xff] %v2554_v40  ;;  %v2378_v49 = vadd.f32 %v5809_v47, %v7964_v41  ;;  %5291 = vmatprep.mubr.f32.mxu0 %v8068_v43 }
 0x2e7   : > { %3720 = vmatmul.mubr.f32.gmra.mrb[42].mxu1 %v8070_v36  ;;  %v2157_v26 = vpop.f32.mrb[14].mxu0  ;;  %5292 = vmatmul.mubr.f32.vlgmr.msra.gmra.mrb[64].mxu0 %v8072_v63 }
 0x2e8   : > { %3724 = vmatprep.mubr.f32.mxu1 %v2553_v44  ;;  %v2555_v61 = vmax.f32 %v2378_v49, 0.0  ;;  %v5810_v13 = vadd.f32 %v8042_v2, %v2157_v26  ;;  %v2159_v17 = vpop.f32.mrb[15].mxu0 }
 0x2e9   : > { %v8079_v37 = vld [vmem:[#allocation3 + $0x48] sm:$0xff] }
 0x2ea   : > { %2588 = vst [vmem:[#allocation3 + $0x61] sm:$0xff] %v2555_v61  ;;  %v2383_v27 = vadd.f32 %v5810_v13, %v7961_v46 }
 0x2eb   : > { %3725 = vmatmul.mubr.f32.gmra.mrb[44].mxu1 %v8079_v37  ;;  %v2162_v41 = vpop.f32.mrb[16].mxu0 }
 0x2ec   : > { %3729 = vmatprep.mubr.f32.mxu1 %v2554_v40  ;;  %v2556_v7 = vmax.f32 %v2383_v27, 0.0  ;;  %v5811_v25 = vadd.f32 %v8042_v2, %v2162_v41  ;;  %v2164_v23 = vpop.f32.mrb[17].mxu0 }
 0x2ed   : > { %v8084_v15 = vld [vmem:[#allocation3 + $0x4a] sm:$0xff]  ;;  %v8088_v58 = vld [vmem:[#allocation3 + $0x52] sm:$0xff] }
 0x2ee   : > { %v8086_v35 = vld [vmem:[#allocation3 + $0x50] sm:$0xff]  ;;  %2589 = vst [vmem:[#allocation3 + $0x69] sm:$0xff] %v2556_v7  ;;  %v2388_v45 = vadd.f32 %v5811_v25, %v7979_v34  ;;  %5294 = vmatprep.mubr.f32.mxu0 %v8084_v15 }
 0x2ef   : > { %3730 = vmatmul.mubr.f32.gmra.mrb[46].mxu1 %v8086_v35  ;;  %v2167_v46 = vpop.f32.mrb[18].mxu0  ;;  %5295 = vmatmul.mubr.f32.gmra.mrb[66].mxu0 %v8088_v58 }
 0x2f0   : > { %3734 = vmatprep.mubr.f32.mxu1 %v2555_v61  ;;  %v2557_v44 = vmax.f32 %v2388_v45, 0.0  ;;  %v5812_v52 = vadd.f32 %v8042_v2, %v2167_v46  ;;  %v2169_v11 = vpop.f32.mrb[19].mxu0 }
 0x2f1   : > { %v8095_v31 = vld [vmem:[#allocation3 + $0x60] sm:$0xff] }
 0x2f2   : > { %2590 = vst [vmem:[#allocation3 + $0x79] sm:$0xff] %v2557_v44  ;;  %v2393_v29 = vadd.f32 %v5812_v52, %v7976_v50 }
 0x2f3   : > { %3735 = vmatmul.mubr.f32.gmra.mrb[48].mxu1 %v8095_v31  ;;  %v2172_v34 = vpop.f32.mrb[20].mxu0 }
 0x2f4   : > { %3739 = vmatprep.mubr.f32.mxu1 %v2556_v7  ;;  %v2558_v40 = vmax.f32 %v2393_v29, 0.0  ;;  %v5813_v47 = vadd.f32 %v8042_v2, %v2172_v34  ;;  %v2174_v3 = vpop.f32.mrb[21].mxu0 }
 0x2f5   : > { %v8100_v49 = vld [vmem:[#allocation3 + $0x62] sm:$0xff]  ;;  %v8104_v61 = vld [vmem:[#allocation3 + $0x6a] sm:$0xff] }
 0x2f6   : > { %v8102_v26 = vld [vmem:[#allocation3 + $0x68] sm:$0xff]  ;;  %2591 = vst [vmem:[#allocation3 + $0x81] sm:$0xff] %v2558_v40  ;;  %v2398_v13 = vadd.f32 %v5813_v47, %v7987_v28  ;;  %5297 = vmatprep.mubr.f32.mxu0 %v8100_v49 }
 0x2f7   : > { %3740 = vmatmul.mubr.f32.gmra.mrb[50].mxu1 %v8102_v26  ;;  %v2177_v50 = vpop.f32.mrb[22].mxu0  ;;  %5298 = vmatmul.mubr.f32.gmra.mrb[68].mxu0 %v8104_v61 }
 0x2f8   : > { %3744 = vmatprep.mubr.f32.mxu1 %v2557_v44  ;;  %v2559_v17 = vmax.f32 %v2398_v13, 0.0  ;;  %v5814_v27 = vadd.f32 %v8042_v2, %v2177_v50  ;;  %v2179_v41 = vpop.f32.mrb[23].mxu0 }
 0x2f9   : > { %v8111_v7 = vld [vmem:[#allocation3 + $0x78] sm:$0xff] }
 0x2fa   : > { %2592 = vst [vmem:[#allocation3 + $0x91] sm:$0xff] %v2559_v17  ;;  %v2403_v25 = vadd.f32 %v5814_v27, %v7984_v48 }
 0x2fb   : > { %3745 = vmatmul.mubr.f32.gmra.mrb[52].mxu1 %v8111_v7  ;;  %v2182_v28 = vpop.f32.mrb[24].mxu0 }
 0x2fc   : > { %3749 = vmatprep.mubr.f32.mxu1 %v2558_v40  ;;  %v2560_v23 = vmax.f32 %v2403_v25, 0.0  ;;  %v5815_v45 = vadd.f32 %v8042_v2, %v2182_v28  ;;  %v2184_v46 = vpop.f32.mrb[25].mxu0 }
 0x2fd   : > { %v8116_v52 = vld [vmem:[#allocation3 + $0x7a] sm:$0xff]  ;;  %v8120_v11 = vld [vmem:[#allocation3 + $0x82] sm:$0xff] }
 0x2fe   : > { %v8118_v44 = vld [vmem:[#allocation3 + $0x80] sm:$0xff]  ;;  %2593 = vst [vmem:[#allocation3 + $0x99] sm:$0xff] %v2560_v23  ;;  %v2408_v29 = vadd.f32 %v5815_v45, %v7992_v12  ;;  %5300 = vmatprep.mubr.f32.mxu0 %v8116_v52 }
 0x2ff   : > { %3750 = vmatmul.mubr.f32.gmra.mrb[54].mxu1 %v8118_v44  ;;  %v2187_v48 = vpop.f32.mrb[26].mxu0  ;;  %5301 = vmatmul.mubr.f32.gmra.mrb[70].mxu0 %v8120_v11 }
 0x300   : > { %3754 = vmatprep.mubr.f32.mxu1 %v2559_v17  ;;  %v2561_v34 = vmax.f32 %v2408_v29, 0.0  ;;  %v5816_v40 = vadd.f32 %v8042_v2, %v2187_v48  ;;  %v2189_v47 = vpop.f32.mrb[27].mxu0 }
 0x301   : > { %v8127_v3 = vld [vmem:[#allocation3 + $0x90] sm:$0xff] }
 0x302   : > { %2594 = vst [vmem:[#allocation3 + $0xa9] sm:$0xff] %v2561_v34  ;;  %v2413_v13 = vadd.f32 %v5816_v40, %v7990_v4 }
 0x303   : > { %3755 = vmatmul.mubr.f32.gmra.mrb[56].mxu1 %v8127_v3  ;;  %v2192_v12 = vpop.f32.mrb[28].mxu0 }
 0x304   : > { %3759 = vmatprep.mubr.f32.mxu1 %v2560_v23  ;;  %v2562_v50 = vmax.f32 %v2413_v13, 0.0  ;;  %v5817_v27 = vadd.f32 %v8042_v2, %v2192_v12  ;;  %v2194_v41 = vpop.f32.mrb[29].mxu0 }
 0x305   : > { %v8132_v25 = vld [vmem:[#allocation3 + $0x92] sm:$0xff]  ;;  %v8136_v28 = vld [vmem:[#allocation3 + $0x9a] sm:$0xff] }
 0x306   : > { %v8134_v17 = vld [vmem:[#allocation3 + $0x98] sm:$0xff]  ;;  %2595 = vst [vmem:[#allocation3 + $0xb1] sm:$0xff] %v2562_v50  ;;  %v2418_v45 = vadd.f32 %v5817_v27, %v7997_v8  ;;  %5303 = vmatprep.mubr.f32.mxu0 %v8132_v25 }
 0x307   : > { %3760 = vmatmul.mubr.f32.gmra.mrb[58].mxu1 %v8134_v17  ;;  %v2197_v4 = vpop.f32.mrb[30].mxu0  ;;  %5304 = vmatmul.mubr.f32.gmra.mrb[72].mxu0 %v8136_v28 }
 0x308   : > { %3764 = vmatprep.mubr.f32.mxu1 %v2561_v34  ;;  %v2563_v23 = vmax.f32 %v2418_v45, 0.0  ;;  %v5818_v46 = vadd.f32 %v8042_v2, %v2197_v4  ;;  %v2199_v29 = vpop.f32.mrb[31].mxu0 }
 0x309   : > { %v8143_v48 = vld [vmem:[#allocation3 + $0xa8] sm:$0xff] }
 0x30a   : > { %2596 = vst [vmem:[#allocation3 + $0xc1] sm:$0xff] %v2563_v23  ;;  %v2423_v40 = vadd.f32 %v5818_v46, %v7995_v19 }
 0x30b   : > { %3765 = vmatmul.mubr.f32.gmra.mrb[60].mxu1 %v8143_v48  ;;  %v2202_v8 = vpop.f32.mrb[32].mxu0 }
 0x30c   : > { %3769 = vmatprep.mubr.f32.mxu1 %v2562_v50  ;;  %v2564_v47 = vmax.f32 %v2423_v40, 0.0  ;;  %v5819_v13 = vadd.f32 %v8042_v2, %v2202_v8  ;;  %v2204_v12 = vpop.f32.mrb[33].mxu0 }
 0x30d   : > { %v8148_v27 = vld [vmem:[#allocation3 + $0xaa] sm:$0xff]  ;;  %v8152_v41 = vld [vmem:[#allocation3 + $0xb2] sm:$0xff] }
 0x30e   : > { %v8150_v34 = vld [vmem:[#allocation3 + $0xb0] sm:$0xff]  ;;  %2597 = vst [vmem:[#allocation3 + $0xc9] sm:$0xff] %v2564_v47  ;;  %v2428_v45 = vadd.f32 %v5819_v13, %v8002_v0  ;;  %5306 = vmatprep.mubr.f32.mxu0 %v8148_v27 }
 0x30f   : > { %3770 = vmatmul.mubr.f32.gmra.mrb[62].mxu1 %v8150_v34  ;;  %v2207_v19 = vpop.f32.mrb[34].mxu0  ;;  %5307 = vmatmul.mubr.f32.gmra.mrb[74].mxu0 %v8152_v41 }
 0x310   : > { %3774 = vmatprep.mubr.f32.mxu1 %v2563_v23  ;;  %v2565_v50 = vmax.f32 %v2428_v45, 0.0  ;;  %v5820_v4 = vadd.f32 %v8042_v2, %v2207_v19  ;;  %v2209_v46 = vpop.f32.mrb[35].mxu0 }
 0x311   : > { %v8159_v29 = vld [vmem:[#allocation3 + $0xc0] sm:$0xff] }
 0x312   : > { %2598 = vst [vmem:[#allocation3 + $0xd9] sm:$0xff] %v2565_v50  ;;  %v2433_v40 = vadd.f32 %v5820_v4, %v8000_v55 }
 0x313   : > { %3775 = vmatmul.mubr.f32.gmra.mrb[64].mxu1 %v8159_v29  ;;  %v2212_v0 = vpop.f32.mrb[36].mxu0 }
 0x314   : > { %3779 = vmatprep.mubr.f32.mxu1 %v2564_v47  ;;  %v2566_v8 = vmax.f32 %v2433_v40, 0.0  ;;  %v5821_v13 = vadd.f32 %v8042_v2, %v2212_v0  ;;  %v2214_v12 = vpop.f32.mrb[37].mxu0 }
 0x315   : > { %v8164_v56 = vld [vmem:[#allocation3 + $0xc2] sm:$0xff]  ;;  %v8168_v45 = vld [vmem:[#allocation3 + $0xca] sm:$0xff] }
 0x316   : > { %v8166_v23 = vld [vmem:[#allocation3 + $0xc8] sm:$0xff]  ;;  %2599 = vst [vmem:[#allocation3 + $0xe1] sm:$0xff] %v2566_v8  ;;  %v2438_v19 = vadd.f32 %v5821_v13, %v8007_v53  ;;  %5309 = vmatprep.mubr.f32.mxu0 %v8164_v56 }
 0x317   : > { %3780 = vmatmul.mubr.f32.gmra.mrb[66].mxu1 %v8166_v23  ;;  %v2217_v55 = vpop.f32.mrb[38].mxu0  ;;  %5310 = vmatmul.mubr.f32.gmra.mrb[76].mxu0 %v8168_v45 }
 0x318   : > { %3784 = vmatprep.mubr.f32.mxu1 %v2565_v50  ;;  %v2567_v47 = vmax.f32 %v2438_v19, 0.0  ;;  %v5822_v4 = vadd.f32 %v8042_v2, %v2217_v55  ;;  %v2219_v46 = vpop.f32.mrb[39].mxu0 }
 0x319   : > { %v8175_v40 = vld [vmem:[#allocation3 + $0xd8] sm:$0xff] }
 0x31a   : > { %2600 = vst [vmem:[#allocation3 + $0xf1] sm:$0xff] %v2567_v47  ;;  %v2443_v0 = vadd.f32 %v5822_v4, %v8005_v57 }
 0x31b   : > { %3785 = vmatmul.mubr.f32.gmra.mrb[68].mxu1 %v8175_v40  ;;  %v2222_v53 = vpop.f32.mrb[40].mxu0 }
 0x31c   : > { %3789 = vmatprep.mubr.f32.mxu1 %v2566_v8  ;;  %v2568_v13 = vmax.f32 %v2443_v0, 0.0  ;;  %v5823_v12 = vadd.f32 %v8042_v2, %v2222_v53  ;;  %v2224_v20 = vpop.f32.mrb[41].mxu0 }
 0x31d   : > { %v8180_v39 = vld [vmem:[#allocation3 + $0xda] sm:$0xff]  ;;  %v8184_v19 = vld [vmem:[#allocation3 + $0xe2] sm:$0xff] }
 0x31e   : > { %v8182_v50 = vld [vmem:[#allocation3 + $0xe0] sm:$0xff]  ;;  %2601 = vst [vmem:[#allocation3 + $0xf9] sm:$0xff] %v2568_v13  ;;  %v2448_v55 = vadd.f32 %v5823_v12, %v8012_v24  ;;  %5312 = vmatprep.mubr.f32.mxu0 %v8180_v39 }
 0x31f   : > { %3790 = vmatmul.mubr.f32.gmra.mrb[70].mxu1 %v8182_v50  ;;  %v2227_v57 = vpop.f32.mrb[42].mxu0  ;;  %5313 = vmatmul.mubr.f32.gmra.mrb[78].mxu0 %v8184_v19 }
 0x320   : > { %3794 = vmatprep.mubr.f32.mxu1 %v2567_v47  ;;  %v2569_v8 = vmax.f32 %v2448_v55, 0.0  ;;  %v5824_v20 = vadd.f32 %v8042_v2, %v2227_v57  ;;  %v2229_v4 = vpop.f32.mrb[43].mxu0 }
 0x321   : > { %v8191_v46 = vld [vmem:[#allocation3 + $0xf0] sm:$0xff] }
 0x322   : > { %2602 = vst [vmem:[#allocation3 + $0x109] sm:$0xff] %v2569_v8  ;;  %v2453_v0 = vadd.f32 %v5824_v20, %v8010_v21 }
 0x323   : > { %3795 = vmatmul.mubr.f32.gmra.mrb[72].mxu1 %v8191_v46  ;;  %v2232_v24 = vpop.f32.mrb[44].mxu0 }
 0x324   : > { %3799 = vmatprep.mubr.f32.mxu1 %v2568_v13  ;;  %v2570_v53 = vmax.f32 %v2453_v0, 0.0  ;;  %v5825_v12 = vadd.f32 %v8042_v2, %v2232_v24  ;;  %v2234_v9 = vpop.f32.mrb[45].mxu0 }
 0x325   : > { %v8196_v62 = vld [vmem:[#allocation3 + $0xf2] sm:$0xff]  ;;  %v8200_v55 = vld [vmem:[#allocation3 + $0xfa] sm:$0xff] }
 0x326   : > { %v8198_v47 = vld [vmem:[#allocation3 + $0xf8] sm:$0xff]  ;;  %2603 = vst [vmem:[#allocation3 + $0x111] sm:$0xff] %v2570_v53  ;;  %v2458_v57 = vadd.f32 %v5825_v12, %v8017_v22  ;;  %5315 = vmatprep.mubr.f32.mxu0 %v8196_v62 }
 0x327   : > { %3800 = vmatmul.mubr.f32.gmra.mrb[74].mxu1 %v8198_v47  ;;  %v2237_v21 = vpop.f32.mrb[46].mxu0  ;;  %5316 = vmatmul.mubr.f32.gmra.mrb[80].mxu0 %v8200_v55 }
 0x328   : > { %3804 = vmatprep.mubr.f32.mxu1 %v2569_v8  ;;  %v2571_v13 = vmax.f32 %v2458_v57, 0.0  ;;  %v5826_v9 = vadd.f32 %v8042_v2, %v2237_v21  ;;  %v2239_v20 = vpop.f32.mrb[47].mxu0 }
 0x329   : > { %v8207_v4 = vld [vmem:[#allocation3 + $0x108] sm:$0xff] }
 0x32a   : > { %2604 = vst [vmem:[#allocation3 + $0x121] sm:$0xff] %v2571_v13  ;;  %v2463_v0 = vadd.f32 %v5826_v9, %v8015_v33 }
 0x32b   : > { %3805 = vmatmul.mubr.f32.gmra.mrb[76].mxu1 %v8207_v4  ;;  %v2242_v22 = vpop.f32.mrb[48].mxu0 }
 0x32c   : > { %3809 = vmatprep.mubr.f32.mxu1 %v2570_v53  ;;  %v2572_v24 = vmax.f32 %v2463_v0, 0.0  ;;  %v5827_v12 = vadd.f32 %v8042_v2, %v2242_v22  ;;  %v2244_v6 = vpop.f32.mrb[49].mxu0 }
 0x32d   : > { %v8212_v42 = vld [vmem:[#allocation3 + $0x10a] sm:$0xff]  ;;  %v8216_v57 = vld [vmem:[#allocation3 + $0x112] sm:$0xff] }
 0x32e   : > { %v8214_v8 = vld [vmem:[#allocation3 + $0x110] sm:$0xff]  ;;  %2605 = vst [vmem:[#allocation3 + $0x129] sm:$0xff] %v2572_v24  ;;  %v2468_v21 = vadd.f32 %v5827_v12, %v8022_v54  ;;  %5318 = vmatprep.mubr.f32.mxu0 %v8212_v42 }
 0x32f   : > { %3810 = vmatmul.mubr.f32.gmra.mrb[78].mxu1 %v8214_v8  ;;  %v2247_v33 = vpop.f32.mrb[50].mxu0  ;;  %5319 = vmatmul.mubr.f32.gmra.mrb[82].mxu0 %v8216_v57 }
 0x330   : > { %3814 = vmatprep.mubr.f32.mxu1 %v2571_v13  ;;  %v8222_v53 = vmax.f32 %v2468_v21, 0.0  ;;  %v5828_v6 = vadd.f32 %v8042_v2, %v2247_v33  ;;  %v2249_v9 = vpop.f32.mrb[51].mxu0 }
 0x331   : > { %v8225_v20 = vld [vmem:[#allocation3 + $0x120] sm:$0xff] }
 0x332   : > { %9056 = vst [vmem:[#allocation23_spill] sm:$0xff] %v8222_v53  ;;  %2606 = vst [vmem:[#allocation3 + $0x139] sm:$0xff] %v8222_v53  ;;  %v2473_v0 = vadd.f32 %v5828_v6, %v8020_v51 }
 0x333   : > { %3815 = vmatmul.mubr.f32.gmra.mrb[80].mxu1 %v8225_v20  ;;  %v2252_v54 = vpop.f32.mrb[52].mxu0 }
 0x334   : > { %3819 = vmatprep.mubr.f32.mxu1 %v2572_v24  ;;  %v8230_v22 = vmax.f32 %v2473_v0, 0.0  ;;  %v5829_v12 = vadd.f32 %v8042_v2, %v2252_v54  ;;  %v2254_v13 = vpop.f32.mrb[53].mxu0 }
 0x335   : > { %v8233_v21 = vld [vmem:[#allocation3 + $0x122] sm:$0xff]  ;;  %v8237_v33 = vld [vmem:[#allocation3 + $0x12a] sm:$0xff] }
 0x336   : > { %9057 = vst [vmem:[#allocation24_spill] sm:$0xff] %v8230_v22  ;;  %v8235_v59 = vld [vmem:[#allocation3 + $0x128] sm:$0xff]  ;;  %9058 = vst [vmem:[#allocation25_spill] sm:$0xff] %v8237_v33  ;;  %v2478_v9 = vadd.f32 %v5829_v12, %v8027_v10  ;;  %5321 = vmatprep.mubr.f32.mxu0 %v8233_v21 }
 0x337   : > { %2607 = vst [vmem:[#allocation3 + $0x141] sm:$0xff] %v8230_v22  ;;  %3820 = vmatmul.mubr.f32.gmra.mrb[82].mxu1 %v8235_v59  ;;  %v2257_v51 = vpop.f32.mrb[54].mxu0  ;;  %5322 = vmatmul.mubr.f32.gmra.mrb[84].mxu0 %v8237_v33 }
 0x338   : > { %3824 = vmatprep.mubr.f32.mxu1 %v8222_v53  ;;  %v8245_v24 = vmax.f32 %v2478_v9, 0.0  ;;  %v5830_v6 = vadd.f32 %v8042_v2, %v2257_v51  ;;  %v2259_v0 = vpop.f32.mrb[55].mxu0 }
 0x339   : > { %v8248_v54 = vld [vmem:[#allocation3 + $0x138] sm:$0xff] }
 0x33a   : > { %9059 = vst [vmem:[#allocation26_spill] sm:$0xff] %v8245_v24  ;;  %2608 = vst [vmem:[#allocation3 + $0x151] sm:$0xff] %v8245_v24  ;;  %v2483_v10 = vadd.f32 %v5830_v6, %v8025_v18 }
 0x33b   : > { %3825 = vmatmul.mubr.f32.gmra.mrb[84].mxu1 %v8248_v54  ;;  %v2262_v12 = vpop.f32.mrb[56].mxu0 }
 0x33c   : > { %3829 = vmatprep.mubr.f32.mxu1 %v8230_v22  ;;  %v8254_v13 = vmax.f32 %v2483_v10, 0.0  ;;  %v5831_v53 = vadd.f32 %v8042_v2, %v2262_v12  ;;  %v2264_v9 = vpop.f32.mrb[57].mxu0 }
 0x33e   : > { %9060 = vst [vmem:[#allocation27_spill] sm:$0xff] %v8254_v13  ;;  %v8257_v33 = vld [vmem:[#allocation3 + $0x13a] sm:$0xff]  ;;  %v8261_v0 = vld [vmem:[#allocation3 + $0x142] sm:$0xff]  ;;  %2609 = vst [vmem:[#allocation3 + $0x159] sm:$0xff] %v8254_v13  ;;  %v2488_v18 = vadd.f32 %v5831_v53, %v8032_v1 }
 0x33f   : > { %9061 = vst [vmem:[#allocation29_spill] sm:$0xff] %v8257_v33  ;;  %v8259_v51 = vld [vmem:[#allocation3 + $0x140] sm:$0xff]  ;;  %9062 = vst [vmem:[#allocation30_spill] sm:$0xff] %v8261_v0  ;;  %5324 = vmatprep.mubr.f32.mxu0 %v8257_v33  ;;  %v2267_v6 = vpop.f32.mrb[58].mxu0 }
 0x340   : > { %3830 = vmatmul.mubr.f32.gmra.mrb[86].mxu1 %v8259_v51  ;;  %5325 = vmatmul.mubr.f32.gmra.mrb[86].mxu0 %v8261_v0  ;;  %v8269_v10 = vmax.f32 %v2488_v18, 0.0  ;;  %v5832_v12 = vadd.f32 %v8042_v2, %v2267_v6  ;;  %v2269_v9 = vpop.f32.mrb[59].mxu0 }
 0x341   : > { %3834 = vmatprep.mubr.f32.mxu1 %v8245_v24  ;;  %v8272_v22 = vld [vmem:[#allocation3 + $0x150] sm:$0xff] }
 0x342   : > { %9063 = vst [vmem:[#allocation33_spill] sm:$0xff] %v8269_v10  ;;  %2610 = vst [vmem:[#allocation3 + $0x169] sm:$0xff] %v8269_v10  ;;  %v2493_v1 = vadd.f32 %v5832_v12, %v8030_v32 }
 0x343   : > { %v2272_v53 = vpop.f32.mrb[60].mxu0 }
 0x344   : > { %3835 = vmatmul.mubr.f32.gmra.mrb[88].mxu1 %v8272_v22  ;;  %v8278_v33 = vmax.f32 %v2493_v1, 0.0  ;;  %v5833_v24 = vadd.f32 %v8042_v2, %v2272_v53  ;;  %v2274_v18 = vpop.f32.mrb[61].mxu0 }
 0x345   : > { %3839 = vmatprep.mubr.f32.mxu1 %v8254_v13  ;;  %v8281_v0 = vld [vmem:[#allocation3 + $0x158] sm:$0xff] }
 0x346   : > { %9064 = vst [vmem:[#allocation34_spill] sm:$0xff] %v8278_v33  ;;  %2611 = vst [vmem:[#allocation3 + $0x171] sm:$0xff] %v8278_v33  ;;  %v8285_v6 = vadd.f32 %v5833_v24, %v8037_v16  ;;  %v3543_v24 = vld [vmem:[#allocation4 + $0x200] sm:$0xff]  ;;  %v3544_v18 = vld [vmem:[#allocation4 + $0x208] sm:$0xff] }
 0x347   : > { %v2277_v32 = vpop.f32.mrb[62].mxu0 }
 0x348   : > { %9065 = vst [vmem:[#allocation37_spill] sm:$0xff] %v8285_v6  ;;  %3840 = vmatmul.mubr.f32.gmra.mrb[90].mxu1 %v8281_v0  ;;  %v8949_v12 = vmax.f32 %v8285_v6, 0.0  ;;  %v5834_v9 = vadd.f32 %v8042_v2, %v2277_v32  ;;  %v2279_v1 = vpop.f32.mrb[63].mxu0  ;;  %v2742_v2 = vld [vmem:[#allocation3 + $0x2] sm:$0xff]  ;;  %v3547_v6 = vld [vmem:[#allocation4 + $0x220] sm:$0xff] }
 0x349   : > { %3844 = vmatprep.mubr.f32.mxu1 %v8269_v10  ;;  %v8291_v13 = vld [vmem:[#allocation3 + $0x168] sm:$0xff]  ;;  %v3545_v32 = vld [vmem:[#allocation4 + $0x210] sm:$0xff] }
 0x34a   : > { %2612 = vst [vmem:[#allocation3 + $0x181] sm:$0xff] %v8949_v12  ;;  %v8296_v53 = vadd.f32 %v5834_v9, %v8035_v5  ;;  %v5660_v5 = vpack.c.bf16 %v3544_v18, %v3543_v24  ;;  %v3546_v9 = vld [vmem:[#allocation4 + $0x218] sm:$0xff]  ;;  %v8311_v18 = vld [vmem:[#allocation3 + $0x1a] sm:$0xff] }
 0x34b   : > { %v2743_v1 = vld [vmem:[#allocation3 + $0xa] sm:$0xff]  ;;  %v5663_v12 = vpack.c.bf16 %v3546_v9, %v3545_v32  ;;  %v8316_v32 = vld [vmem:[#allocation3 + $0x22] sm:$0xff] }
 0x34c   : > { %3845 = vmatmul.mubr.f32.gmra.mrb[92].mxu1 %v8291_v13  ;;  %v8952_v16 = vmax.f32 %v8296_v53, 0.0  ;;  %v3550_v24 = vld [vmem:[#allocation4 + $0x238] sm:$0xff]  ;;  %v3557_v9 = vld [vmem:[#allocation4 + $0x270] sm:$0xff] }
 0x34d   : > { %3849 = vmatprep.mubr.f32.mxu1 %v8278_v33  ;;  %v8301_v10 = vld [vmem:[#allocation3 + $0x170] sm:$0xff]  ;;  %v3548_v33 = vld [vmem:[#allocation4 + $0x228] sm:$0xff] }
 0x34e   : > { %2613 = vst [vmem:[#allocation3 + $0x189] sm:$0xff] %v8952_v16  ;;  %v5666_v16 = vpack.c.bf16 %v3548_v33, %v3547_v6  ;;  %v3553_v33 = vld [vmem:[#allocation4 + $0x250] sm:$0xff]  ;;  %v3554_v6 = vld [vmem:[#allocation4 + $0x258] sm:$0xff] }
 0x350   : > { %3850 = vmatmul.mubr.f32.gmra.mrb[94].mxu1 %v8301_v10 }
 0x351   : > { %3919 = vmatprep.mubr.f32.mxu1 %v8053_v38  ;;  %v3549_v38 = vld [vmem:[#allocation4 + $0x230] sm:$0xff] }
 0x354   : > { %3920 = vmatmul.mubr.f32.vlgmr.msra.gmra.mrb[32].mxu1 %v2742_v2  ;;  %v3551_v2 = vld [vmem:[#allocation4 + $0x240] sm:$0xff] }
 0x355   : > { %3924 = vmatprep.mubr.f32.mxu1 %v8058_v60  ;;  %5661 = vmatpush1.bf16.msra.mxu1 %v5660_v5  ;;  %v5669_v60 = vpack.c.bf16 %v3550_v24, %v3549_v38  ;;  %v3552_v5 = vld [vmem:[#allocation4 + $0x248] sm:$0xff]  ;;  %v3562_v24 = vld [vmem:[#allocation4 + $0x298] sm:$0xff] }
 0x356   : > { %5662 = vmatprep.subr.bf16.mxu1 %v8996_v30  ;;  %v3560_v38 = vld [vmem:[#allocation4 + $0x288] sm:$0xff] }
 0x358   : > { %3925 = vmatmul.mubr.f32.gmra.mrb[34].mxu1 %v2743_v1  ;;  %v3558_v1 = vld [vmem:[#allocation4 + $0x278] sm:$0xff] }
 0x359   : > { %3929 = vmatprep.mubr.f32.mxu1 %v8063_v14  ;;  %5664 = vmatpush1.bf16.msra.mxu1 %v5663_v12  ;;  %v5672_v14 = vpack.c.bf16 %v3552_v5, %v3551_v2  ;;  %v3555_v12 = vld [vmem:[#allocation4 + $0x260] sm:$0xff]  ;;  %v3566_v2 = vld [vmem:[#allocation4 + $0x2b8] sm:$0xff]  ;;  %v3568_v5 = vld [vmem:[#allocation4 + $0x2c8] sm:$0xff] }
 0x35a   : > { %5665 = vmatprep.subr.bf16.mxu1 %v8996_v30 }
 0x35c   : > { %3930 = vmatmul.mubr.f32.gmra.mrb[36].mxu1 %v8311_v18 }
 0x35d   : > { %3934 = vmatprep.mubr.f32.mxu1 %v8070_v36  ;;  %5667 = vmatpush1.bf16.msra.mxu1 %v5666_v16  ;;  %v5675_v36 = vpack.c.bf16 %v3554_v6, %v3553_v33  ;;  %v3556_v16 = vld [vmem:[#allocation4 + $0x268] sm:$0xff]  ;;  %v3574_v6 = vld [vmem:[#allocation4 + $0x2f8] sm:$0xff] }
 0x35e   : > { %5668 = vmatprep.subr.bf16.mxu1 %v8996_v30  ;;  %v3572_v33 = vld [vmem:[#allocation4 + $0x2e8] sm:$0xff] }
 0x360   : > { %3935 = vmatmul.mubr.f32.gmra.mrb[38].mxu1 %v8316_v32 }
 0x361   : > { %3939 = vmatprep.mubr.f32.mxu1 %v8079_v37  ;;  %5670 = vmatpush1.bf16.msra.mxu1 %v5669_v60  ;;  %v5678_v37 = vpack.c.bf16 %v3556_v16, %v3555_v12  ;;  %v3564_v60 = vld [vmem:[#allocation4 + $0x2a8] sm:$0xff]  ;;  %v3579_v16 = vld [vmem:[#allocation4 + $0x320] sm:$0xff] }
 0x362   : > { %5671 = vmatprep.subr.bf16.mxu1 %v8996_v30 }
 0x364   : > { %3940 = vmatmul.mubr.f32.gmra.mrb[40].mxu1 %v8068_v43  ;;  %v5681_v43 = vpack.c.bf16 %v3558_v1, %v3557_v9  ;;  %v2871_v9 = vld [vmem:[#allocation3 + $0x21] sm:$0xff] }
 0x365   : > { %3944 = vmatprep.mubr.f32.mxu1 %v8086_v35  ;;  %5673 = vmatpush1.bf16.msra.mxu1 %v5672_v14  ;;  %v3559_v35 = vld [vmem:[#allocation4 + $0x280] sm:$0xff]  ;;  %v3570_v14 = vld [vmem:[#allocation4 + $0x2d8] sm:$0xff] }
 0x366   : > { %5674 = vmatprep.subr.bf16.mxu1 %v8996_v30 }
 0x368   : > { %3945 = vmatmul.mubr.f32.gmra.mrb[42].mxu1 %v8072_v63  ;;  %v5684_v63 = vpack.c.bf16 %v3560_v38, %v3559_v35  ;;  %v3582_v35 = vld [vmem:[#allocation4 + $0x338] sm:$0xff]  ;;  %v8420_v38 = vld [vmem:[#allocation3 + $0x31] sm:$0xff] }
 0x369   : > { %3949 = vmatprep.mubr.f32.mxu1 %v8095_v31  ;;  %5676 = vmatpush1.bf16.msra.mxu1 %v5675_v36  ;;  %v3561_v31 = vld [vmem:[#allocation4 + $0x290] sm:$0xff] }
 0x36a   : > { %5677 = vmatprep.subr.bf16.mxu1 %v8996_v30 }
 0x36c   : > { %3950 = vmatmul.mubr.f32.gmra.mrb[44].mxu1 %v8084_v15  ;;  %v5687_v15 = vpack.c.bf16 %v3562_v24, %v3561_v31 }
 0x36d   : > { %3954 = vmatprep.mubr.f32.mxu1 %v8102_v26  ;;  %5679 = vmatpush1.bf16.msra.mxu1 %v5678_v37  ;;  %v3563_v26 = vld [vmem:[#allocation4 + $0x2a0] sm:$0xff]  ;;  %v3580_v37 = vld [vmem:[#allocation4 + $0x328] sm:$0xff] }
 0x36e   : > { %5680 = vmatprep.subr.bf16.mxu1 %v8996_v30  ;;  %v5714_v1 = vpack.c.bf16 %v3580_v37, %v3579_v16  ;;  %v8452_v16 = vld [vmem:[#allocation3 + $0x69] sm:$0xff]  ;;  %v2942_v37 = vld [vmem:[#allocation3 + $0x7a] sm:$0xff] }
 0x370   : > { %3955 = vmatmul.mubr.f32.gmra.mrb[46].mxu1 %v8088_v58  ;;  %v5690_v58 = vpack.c.bf16 %v3564_v60, %v3563_v26  ;;  %v3584_v26 = vld [vmem:[#allocation4 + $0x348] sm:$0xff] }
 0x371   : > { %3959 = vmatprep.mubr.f32.mxu1 %v8111_v7  ;;  %5682 = vmatpush1.bf16.msra.mxu1 %v5681_v43  ;;  %v3565_v7 = vld [vmem:[#allocation4 + $0x2b0] sm:$0xff] }
 0x372   : > { %5683 = vmatprep.subr.bf16.mxu1 %v8996_v30  ;;  %v3581_v43 = vld [vmem:[#allocation4 + $0x330] sm:$0xff] }
 0x373   : > { %v5717_v24 = vpack.c.bf16 %v3582_v35, %v3581_v43  ;;  %v8428_v60 = vld [vmem:[#allocation3 + $0x39] sm:$0xff] }
 0x374   : > { %3960 = vmatmul.mubr.f32.gmra.mrb[48].mxu1 %v8100_v49  ;;  %v5693_v49 = vpack.c.bf16 %v3566_v2, %v3565_v7  ;;  %v3585_v2 = vld [vmem:[#allocation4 + $0x350] sm:$0xff] }
 0x375   : > { %3964 = vmatprep.mubr.f32.mxu1 %v8118_v44  ;;  %5685 = vmatpush1.bf16.msra.mxu1 %v5684_v63  ;;  %v3567_v44 = vld [vmem:[#allocation4 + $0x2c0] sm:$0xff]  ;;  %v8456_v43 = vld [vmem:[#allocation3 + $0x79] sm:$0xff] }
 0x376   : > { %5686 = vmatprep.subr.bf16.mxu1 %v8996_v30 }
 0x378   : > { %3965 = vmatmul.mubr.f32.gmra.mrb[50].mxu1 %v8104_v61  ;;  %v5696_v61 = vpack.c.bf16 %v3568_v5, %v3567_v44  ;;  %v8432_v44 = vld [vmem:[#allocation3 + $0x49] sm:$0xff] }
 0x379   : > { %3969 = vmatprep.mubr.f32.mxu1 %v8127_v3  ;;  %5688 = vmatpush1.bf16.msra.mxu1 %v5687_v15  ;;  %v3569_v3 = vld [vmem:[#allocation4 + $0x2d0] sm:$0xff]  ;;  %v3583_v15 = vld [vmem:[#allocation4 + $0x340] sm:$0xff] }
 0x37a   : > { %5689 = vmatprep.subr.bf16.mxu1 %v8996_v30  ;;  %v5720_v7 = vpack.c.bf16 %v3584_v26, %v3583_v15  ;;  %v3595_v26 = vld [vmem:[#allocation4 + $0x3a0] sm:$0xff] }
 0x37c   : > { %3970 = vmatmul.mubr.f32.gmra.mrb[52].mxu1 %v8116_v52  ;;  %v5699_v52 = vpack.c.bf16 %v3570_v14, %v3569_v3 }
 0x37d   : > { %3974 = vmatprep.mubr.f32.mxu1 %v8134_v17  ;;  %5691 = vmatpush1.bf16.msra.mxu1 %v5690_v58  ;;  %v3571_v17 = vld [vmem:[#allocation4 + $0x2e0] sm:$0xff] }
 0x37e   : > { %5692 = vmatprep.subr.bf16.mxu1 %v8996_v30  ;;  %v2938_v58 = vld [vmem:[#allocation3 + $0x4a] sm:$0xff] }
 0x380   : > { %3975 = vmatmul.mubr.f32.gmra.mrb[54].mxu1 %v8120_v11  ;;  %v5702_v11 = vpack.c.bf16 %v3572_v33, %v3571_v17  ;;  %v3588_v17 = vld [vmem:[#allocation4 + $0x368] sm:$0xff] }
 0x381   : > { %3979 = vmatprep.mubr.f32.mxu1 %v8143_v48  ;;  %5694 = vmatpush1.bf16.msra.mxu1 %v5693_v49  ;;  %v3573_v48 = vld [vmem:[#allocation4 + $0x2f0] sm:$0xff]  ;;  %v3586_v49 = vld [vmem:[#allocation4 + $0x358] sm:$0xff]  ;;  %v8440_v33 = vld [vmem:[#allocation3 + $0x51] sm:$0xff] }
 0x382   : > { %5695 = vmatprep.subr.bf16.mxu1 %v8996_v30  ;;  %v5723_v14 = vpack.c.bf16 %v3586_v49, %v3585_v2  ;;  %v2944_v2 = vld [vmem:[#allocation3 + $0x92] sm:$0xff] }
 0x384   : > { %3980 = vmatmul.mubr.f32.gmra.mrb[56].mxu1 %v8132_v25  ;;  %v5705_v25 = vpack.c.bf16 %v3574_v6, %v3573_v48  ;;  %v3589_v6 = vld [vmem:[#allocation4 + $0x370] sm:$0xff] }
 0x385   : > { %3984 = vmatprep.mubr.f32.mxu1 %v8150_v34  ;;  %5697 = vmatpush1.bf16.msra.mxu1 %v5696_v61  ;;  %v2939_v61 = vld [vmem:[#allocation3 + $0x52] sm:$0xff] }
 0x386   : > { %5698 = vmatprep.subr.bf16.mxu1 %v8996_v30 }
 0x388   : > { %3985 = vmatmul.mubr.f32.gmra.mrb[58].mxu1 %v8136_v28 }
 0x389   : > { %3989 = vmatprep.mubr.f32.mxu1 %v8159_v29  ;;  %5700 = vmatpush1.bf16.msra.mxu1 %v5699_v52  ;;  %v3587_v52 = vld [vmem:[#allocation4 + $0x360] sm:$0xff] }
 0x38a   : > { %5701 = vmatprep.subr.bf16.mxu1 %v8996_v30  ;;  %v5726_v48 = vpack.c.bf16 %v3588_v17, %v3587_v52  ;;  %v8468_v52 = vld [vmem:[#allocation3 + $0x91] sm:$0xff] }
 0x38c   : > { %3990 = vmatmul.mubr.f32.gmra.mrb[60].mxu1 %v8148_v27  ;;  %v9067_v27 = vld [vmem:[#allocation29_spill] sm:$0xff] }
 0x38d   : > { %3994 = vmatprep.mubr.f32.mxu1 %v8166_v23  ;;  %5703 = vmatpush1.bf16.msra.mxu1 %v5702_v11  ;;  %v2940_v11 = vld [vmem:[#allocation3 + $0x62] sm:$0xff] }
 0x38e   : > { %5704 = vmatprep.subr.bf16.mxu1 %v8996_v30 }
 0x390   : > { %3995 = vmatmul.mubr.f32.gmra.mrb[62].mxu1 %v8152_v41  ;;  %v8385_v41 = vld [vmem:[#allocation3 + $0x152] sm:$0xff] }
 0x391   : > { %3999 = vmatprep.mubr.f32.mxu1 %v8175_v40  ;;  %5706 = vmatpush1.bf16.msra.mxu1 %v5705_v25  ;;  %v8396_v40 = vld [vmem:[#allocation3 + $0x180] sm:$0xff]  ;;  %v3590_v25 = vld [vmem:[#allocation4 + $0x378] sm:$0xff] }
 0x392   : > { %5707 = vmatprep.subr.bf16.mxu1 %v8996_v30 }
 0x394   : > { %4000 = vmatmul.mubr.f32.gmra.mrb[64].mxu1 %v8164_v56  ;;  %v9066_v56 = vld [vmem:[#allocation25_spill] sm:$0xff] }
 0x395   : > { %4004 = vmatprep.mubr.f32.mxu1 %v8182_v50  ;;  %v8399_v50 = vld [vmem:[#allocation3 + $0x16a] sm:$0xff] }
 0x398   : > { %4005 = vmatmul.mubr.f32.gmra.mrb[66].mxu1 %v8168_v45  ;;  %v8393_v45 = vld [vmem:[#allocation3 + $0x15a] sm:$0xff] }
 0x399   : > { %4009 = vmatprep.mubr.f32.mxu1 %v8191_v46 }
 0x39c   : > { %4010 = vmatmul.mubr.f32.gmra.mrb[68].mxu1 %v8180_v39 }
 0x39d   : > { %4014 = vmatprep.mubr.f32.mxu1 %v8198_v47  ;;  %v8404_v47 = vld [vmem:[#allocation3 + $0x188] sm:$0xff] }
 0x3a0   : > { %4015 = vmatmul.mubr.f32.gmra.mrb[70].mxu1 %v8184_v19 }
 0x3a1   : > { %4019 = vmatprep.mubr.f32.mxu1 %v8207_v4 }
 0x3a4   : > { %4020 = vmatmul.mubr.f32.gmra.mrb[72].mxu1 %v8196_v62 }
 0x3a5   : > { %4024 = vmatprep.mubr.f32.mxu1 %v8214_v8  ;;  %v3575_v8 = vld [vmem:[#allocation4 + $0x300] sm:$0xff] }
 0x3a8   : > { %4025 = vmatmul.mubr.f32.gmra.mrb[74].mxu1 %v8200_v55 }
 0x3a9   : > { %4029 = vmatprep.mubr.f32.mxu1 %v8225_v20  ;;  %v3576_v20 = vld [vmem:[#allocation4 + $0x308] sm:$0xff] }
 0x3ac   : > { %4030 = vmatmul.mubr.f32.gmra.mrb[76].mxu1 %v8212_v42 }
 0x3ad   : > { %4034 = vmatprep.mubr.f32.mxu1 %v8235_v59  ;;  %v9068_v59 = vld [vmem:[#allocation30_spill] sm:$0xff] }
 0x3b0   : > { %4035 = vmatmul.mubr.f32.gmra.mrb[78].mxu1 %v8216_v57 }
 0x3b1   : > { %4039 = vmatprep.mubr.f32.mxu1 %v8248_v54  ;;  %v5708_v54 = vpack.c.bf16 %v3576_v20, %v3575_v8  ;;  %v8444_v8 = vld [vmem:[#allocation3 + $0x61] sm:$0xff] }
 0x3b4   : > { %4040 = vmatmul.mubr.f32.gmra.mrb[80].mxu1 %v8233_v21 }
 0x3b5   : > { %4044 = vmatprep.mubr.f32.mxu1 %v8259_v51  ;;  %v3578_v51 = vld [vmem:[#allocation4 + $0x318] sm:$0xff] }
 0x3b8   : > { %4045 = vmatmul.mubr.f32.gmra.mrb[82].mxu1 %v9066_v56 }
 0x3b9   : > { %4049 = vmatprep.mubr.f32.mxu1 %v8272_v22  ;;  %v8409_v22 = vld [vmem:[#allocation3 + $0x172] sm:$0xff] }
 0x3ba   : > { %v8377_v28 = vpop.f32.mrb[64].mxu0 }
 0x3bb   : > { %v8380_v34 = vpop.f32.mrb[65].mxu0 }
 0x3bc   : > { %4050 = vmatmul.mubr.f32.gmra.mrb[84].mxu1 %v9067_v27 }
 0x3bd   : > { %4054 = vmatprep.mubr.f32.mxu1 %v8281_v0  ;;  %v2870_v0 = vld [vmem:[#allocation3 + $0x19] sm:$0xff] }
 0x3c0   : > { %4055 = vmatmul.mubr.f32.gmra.mrb[86].mxu1 %v9068_v59 }
 0x3c1   : > { %4059 = vmatprep.mubr.f32.mxu1 %v8291_v13  ;;  %v3577_v13 = vld [vmem:[#allocation4 + $0x310] sm:$0xff] }
 0x3c2   : > { %v8387_v29 = vpop.f32.mrb[66].mxu0  ;;  %v5711_v12 = vpack.c.bf16 %v3578_v51, %v3577_v13  ;;  %v5729_v51 = vpack.c.bf16 %v3590_v25, %v3589_v6  ;;  %v3599_v25 = vld [vmem:[#allocation4 + $0x3c0] sm:$0xff] }
 0x3c3   : > { %v8390_v23 = vpop.f32.mrb[67].mxu0 }
 0x3c4   : > { %4060 = vmatmul.mubr.f32.gmra.mrb[88].mxu1 %v8385_v41 }
 0x3c5   : > { %4064 = vmatprep.mubr.f32.mxu1 %v8301_v10 }
 0x3c8   : > { %4065 = vmatmul.mubr.f32.gmra.mrb[90].mxu1 %v8393_v45 }
 0x3c9   : > { %4069 = vmatprep.mubr.f32.mxu1 %v8396_v40 }
 0x3ca   : > { %v8401_v46 = vpop.f32.mrb[68].mxu0 }
 0x3cb   : > { %v8406_v4 = vpop.f32.mrb[69].mxu0 }
 0x3cc   : > { %4070 = vmatmul.mubr.f32.gmra.mrb[92].mxu1 %v8399_v50 }
 0x3cd   : > { %4074 = vmatprep.mubr.f32.mxu1 %v8404_v47 }
 0x3d0   : > { %4075 = vmatmul.mubr.f32.gmra.mrb[94].mxu1 %v8409_v22 }
 0x3d1   : > { %4144 = vmatprep.mubr.f32.mxu1 %v8311_v18  ;;  %v2936_v18 = vld [vmem:[#allocation3 + $0x32] sm:$0xff] }
 0x3d2   : > { %v8413_v10 = vpop.f32.mrb[70].mxu0 }
 0x3d3   : > { %v8415_v36 = vpop.f32.mrb[71].mxu0 }
 0x3d4   : > { %4145 = vmatmul.mubr.f32.vlgmr.msra.gmra.mrb[32].mxu1 %v2870_v0  ;;  %v3591_v0 = vld [vmem:[#allocation4 + $0x380] sm:$0xff] }
 0x3d5   : > { %4149 = vmatprep.mubr.f32.mxu1 %v8316_v32  ;;  %5709 = vmatpush1.bf16.msra.mxu1 %v5708_v54  ;;  %v2937_v32 = vld [vmem:[#allocation3 + $0x3a] sm:$0xff]  ;;  %v2941_v54 = vld [vmem:[#allocation3 + $0x6a] sm:$0xff] }
 0x3d6   : > { %5710 = vmatprep.subr.bf16.mxu1 %v8996_v30 }
 0x3d8   : > { %4150 = vmatmul.mubr.f32.gmra.mrb[34].mxu1 %v2871_v9 }
 0x3d9   : > { %4154 = vmatprep.mubr.f32.mxu1 %v2936_v18  ;;  %5712 = vmatpush1.bf16.msra.mxu1 %v5711_v12  ;;  %v3592_v12 = vld [vmem:[#allocation4 + $0x388] sm:$0xff]  ;;  %v3593_v18 = vld [vmem:[#allocation4 + $0x390] sm:$0xff] }
 0x3da   : > { %5713 = vmatprep.subr.bf16.mxu1 %v8996_v30  ;;  %v8422_v63 = vpop.f32.mrb[72].mxu0  ;;  %v5732_v9 = vpack.c.bf16 %v3592_v12, %v3591_v0  ;;  %v2946_v0 = vld [vmem:[#allocation3 + $0xaa] sm:$0xff] }
 0x3db   : > { %v8425_v31 = vpop.f32.mrb[73].mxu0 }
 0x3dc   : > { %4155 = vmatmul.mubr.f32.gmra.mrb[36].mxu1 %v8420_v38 }
 0x3dd   : > { %4159 = vmatprep.mubr.f32.mxu1 %v2937_v32  ;;  %5715 = vmatpush1.bf16.msra.mxu1 %v5714_v1  ;;  %v3594_v1 = vld [vmem:[#allocation4 + $0x398] sm:$0xff] }
 0x3de   : > { %5716 = vmatprep.subr.bf16.mxu1 %v8996_v30  ;;  %v2943_v32 = vld [vmem:[#allocation3 + $0x82] sm:$0xff]  ;;  %v5735_v15 = vpack.c.bf16 %v3594_v1, %v3593_v18 }
 0x3df   : > { %v8480_v18 = vld [vmem:[#allocation3 + $0xa9] sm:$0xff] }
 0x3e0   : > { %4160 = vmatmul.mubr.f32.gmra.mrb[38].mxu1 %v8428_v60 }
 0x3e1   : > { %4164 = vmatprep.mubr.f32.mxu1 %v2938_v58  ;;  %5718 = vmatpush1.bf16.msra.mxu1 %v5717_v24  ;;  %v3596_v58 = vld [vmem:[#allocation4 + $0x3a8] sm:$0xff] }
 0x3e2   : > { %5719 = vmatprep.subr.bf16.mxu1 %v8996_v30  ;;  %v8434_v5 = vpop.f32.mrb[74].mxu0  ;;  %v5738_v49 = vpack.c.bf16 %v3596_v58, %v3595_v26  ;;  %v3603_v58 = vld [vmem:[#allocation4 + $0x3e0] sm:$0xff] }
 0x3e3   : > { %v8437_v3 = vpop.f32.mrb[75].mxu0 }
 0x3e4   : > { %4165 = vmatmul.mubr.f32.gmra.mrb[40].mxu1 %v8432_v44 }
 0x3e5   : > { %4169 = vmatprep.mubr.f32.mxu1 %v2939_v61  ;;  %5721 = vmatpush1.bf16.msra.mxu1 %v5720_v7  ;;  %v8464_v7 = vld [vmem:[#allocation3 + $0x81] sm:$0xff] }
 0x3e6   : > { %5722 = vmatprep.subr.bf16.mxu1 %v8996_v30  ;;  %v3597_v61 = vld [vmem:[#allocation4 + $0x3b0] sm:$0xff] }
 0x3e8   : > { %4170 = vmatmul.mubr.f32.gmra.mrb[42].mxu1 %v8440_v33 }
 0x3e9   : > { %4174 = vmatprep.mubr.f32.mxu1 %v2940_v11  ;;  %5724 = vmatpush1.bf16.msra.mxu1 %v5723_v14  ;;  %v3598_v14 = vld [vmem:[#allocation4 + $0x3b8] sm:$0xff]  ;;  %v2945_v11 = vld [vmem:[#allocation3 + $0x9a] sm:$0xff] }
 0x3ea   : > { %5725 = vmatprep.subr.bf16.mxu1 %v8996_v30  ;;  %v8446_v20 = vpop.f32.mrb[76].mxu0  ;;  %v5741_v6 = vpack.c.bf16 %v3598_v14, %v3597_v61  ;;  %v2948_v61 = vld [vmem:[#allocation3 + $0xc2] sm:$0xff] }
 0x3eb   : > { %v8449_v13 = vpop.f32.mrb[77].mxu0 }
 0x3ec   : > { %4175 = vmatmul.mubr.f32.gmra.mrb[44].mxu1 %v8444_v8 }
 0x3ed   : > { %4179 = vmatprep.mubr.f32.mxu1 %v2941_v54  ;;  %5727 = vmatpush1.bf16.msra.mxu1 %v5726_v48  ;;  %v3600_v54 = vld [vmem:[#allocation4 + $0x3c8] sm:$0xff] }
 0x3ee   : > { %5728 = vmatprep.subr.bf16.mxu1 %v8996_v30  ;;  %v5744_v12 = vpack.c.bf16 %v3600_v54, %v3599_v25  ;;  %v8492_v25 = vld [vmem:[#allocation3 + $0xc1] sm:$0xff] }
 0x3f0   : > { %4180 = vmatmul.mubr.f32.gmra.mrb[46].mxu1 %v8452_v16 }
 0x3f1   : > { %4184 = vmatprep.mubr.f32.mxu1 %v2942_v37  ;;  %5730 = vmatpush1.bf16.msra.mxu1 %v5729_v51  ;;  %v8476_v51 = vld [vmem:[#allocation3 + $0x99] sm:$0xff] }
 0x3f2   : > { %5731 = vmatprep.subr.bf16.mxu1 %v8996_v30  ;;  %v8458_v35 = vpop.f32.mrb[78].mxu0  ;;  %v3601_v37 = vld [vmem:[#allocation4 + $0x3d0] sm:$0xff] }
 0x3f3   : > { %v8461_v24 = vpop.f32.mrb[79].mxu0 }
 0x3f4   : > { %4185 = vmatmul.mubr.f32.gmra.mrb[48].mxu1 %v8456_v43 }
 0x3f5   : > { %4189 = vmatprep.mubr.f32.mxu1 %v2943_v32  ;;  %5733 = vmatpush1.bf16.msra.mxu1 %v5732_v9  ;;  %v3602_v9 = vld [vmem:[#allocation4 + $0x3d8] sm:$0xff]  ;;  %v2947_v32 = vld [vmem:[#allocation3 + $0xb2] sm:$0xff] }
 0x3f6   : > { %5734 = vmatprep.subr.bf16.mxu1 %v8996_v30  ;;  %v5747_v26 = vpack.c.bf16 %v3602_v9, %v3601_v37  ;;  %v8500_v9 = vld [vmem:[#allocation3 + $0xc9] sm:$0xff] }
 0x3f8   : > { %4190 = vmatmul.mubr.f32.gmra.mrb[50].mxu1 %v8464_v7 }
 0x3f9   : > { %4194 = vmatprep.mubr.f32.mxu1 %v2944_v2  ;;  %5736 = vmatpush1.bf16.msra.mxu1 %v5735_v15  ;;  %v3604_v2 = vld [vmem:[#allocation4 + $0x3e8] sm:$0xff] }
 0x3fa   : > { %5737 = vmatprep.subr.bf16.mxu1 %v8996_v30  ;;  %v8470_v17 = vpop.f32.mrb[80].mxu0  ;;  %v5750_v14 = vpack.c.bf16 %v3604_v2, %v3603_v58 }
 0x3fb   : > { %v8473_v48 = vpop.f32.mrb[81].mxu0 }
 0x3fc   : > { %4195 = vmatmul.mubr.f32.gmra.mrb[52].mxu1 %v8468_v52 }
 0x3fd   : > { %4199 = vmatprep.mubr.f32.mxu1 %v2945_v11  ;;  %5739 = vmatpush1.bf16.msra.mxu1 %v5738_v49  ;;  %v8488_v49 = vld [vmem:[#allocation3 + $0xb1] sm:$0xff]  ;;  %v3605_v11 = vld [vmem:[#allocation4 + $0x3f0] sm:$0xff] }
 0x3fe   : > { %5740 = vmatprep.subr.bf16.mxu1 %v8996_v30 }
 0x400   : > { %4200 = vmatmul.mubr.f32.gmra.mrb[54].mxu1 %v8476_v51 }
 0x401   : > { %4204 = vmatprep.mubr.f32.mxu1 %v2946_v0  ;;  %5742 = vmatpush1.bf16.msra.mxu1 %v5741_v6  ;;  %v3606_v6 = vld [vmem:[#allocation4 + $0x3f8] sm:$0xff] }
 0x402   : > { %5743 = vmatprep.subr.bf16.mxu1 %v8996_v30  ;;  %v8482_v1 = vpop.f32.mrb[82].mxu0  ;;  %v2949_v0 = vld [vmem:[#allocation3 + $0xca] sm:$0xff]  ;;  %v5753_v37 = vpack.c.bf16 %v3606_v6, %v3605_v11  ;;  %v9073_v11 = vld [vmem:[#allocation27_spill] sm:$0xff]  ;;  %v8552_v6 = vld [vmem:[#allocation3 + $0x182] sm:$0xff] }
 0x403   : > { %v8485_v15 = vpop.f32.mrb[83].mxu0 }
 0x404   : > { %4205 = vmatmul.mubr.f32.gmra.mrb[56].mxu1 %v8480_v18 }
 0x405   : > { %4209 = vmatprep.mubr.f32.mxu1 %v2947_v32  ;;  %5745 = vmatpush1.bf16.msra.mxu1 %v5744_v12  ;;  %v9069_v32 = vld [vmem:[#allocation11_spill] sm:$0xff] }
 0x406   : > { %5746 = vmatprep.subr.bf16.mxu1 %v8996_v30 }
 0x408   : > { %4210 = vmatmul.mubr.f32.gmra.mrb[58].mxu1 %v8488_v49 }
 0x409   : > { %4214 = vmatprep.mubr.f32.mxu1 %v2948_v61  ;;  %5748 = vmatpush1.bf16.msra.mxu1 %v5747_v26  ;;  %v8505_v26 = vld [vmem:[#allocation3 + $0xd9] sm:$0xff] }
 0x40a   : > { %5749 = vmatprep.subr.bf16.mxu1 %v8996_v30  ;;  %v8494_v54 = vpop.f32.mrb[84].mxu0  ;;  %v8521_v61 = vld [vmem:[#allocation3 + $0xf9] sm:$0xff] }
 0x40b   : > { %v8497_v12 = vpop.f32.mrb[85].mxu0 }
 0x40c   : > { %4215 = vmatmul.mubr.f32.gmra.mrb[60].mxu1 %v8492_v25 }
 0x40d   : > { %4219 = vmatprep.mubr.f32.mxu1 %v2949_v0  ;;  %5751 = vmatpush1.bf16.msra.mxu1 %v5750_v14  ;;  %v8525_v14 = vld [vmem:[#allocation3 + $0x109] sm:$0xff] }
 0x40e   : > { %5752 = vmatprep.subr.bf16.mxu1 %v8996_v30  ;;  %v8513_v30 = vld [vmem:[#allocation3 + $0xe1] sm:$0xff] }
 0x410   : > { %4220 = vmatmul.mubr.f32.gmra.mrb[62].mxu1 %v8500_v9 }
 0x411   : > { %4224 = vmatprep.mubr.f32.mxu1 %v8180_v39  ;;  %5754 = vmatpush1.bf16.msra.mxu1 %v5753_v37  ;;  %v8517_v39 = vld [vmem:[#allocation3 + $0xf1] sm:$0xff] }
 0x412   : > { %5787 = vmatprep.subr.bf16.mxu1 %v9069_v32  ;;  %v8557_v37 = vld [vmem:[#allocation3 + $0x18a] sm:$0xff] }
 0x413   : > { %v8507_v58 = vpop.f32.mrb[86].mxu0 }
 0x414   : > { %4225 = vmatmul.mubr.f32.gmra.mrb[64].mxu1 %v8505_v26  ;;  %v8510_v2 = vpop.f32.mrb[87].mxu0 }
 0x415   : > { %4229 = vmatprep.mubr.f32.mxu1 %v8184_v19  ;;  %v8529_v19 = vld [vmem:[#allocation3 + $0x111] sm:$0xff] }
 0x418   : > { %4230 = vmatmul.mubr.f32.gmra.mrb[66].mxu1 %v8513_v30 }
 0x419   : > { %4234 = vmatprep.mubr.f32.mxu1 %v8196_v62  ;;  %v8533_v62 = vld [vmem:[#allocation3 + $0x121] sm:$0xff] }
 0x41c   : > { %4235 = vmatmul.mubr.f32.gmra.mrb[68].mxu1 %v8517_v39 }
 0x41d   : > { %4239 = vmatprep.mubr.f32.mxu1 %v8200_v55  ;;  %v8537_v55 = vld [vmem:[#allocation3 + $0x129] sm:$0xff] }
 0x420   : > { %4240 = vmatmul.mubr.f32.gmra.mrb[70].mxu1 %v8521_v61 }
 0x421   : > { %4244 = vmatprep.mubr.f32.mxu1 %v8212_v42  ;;  %v9070_v42 = vld [vmem:[#allocation23_spill] sm:$0xff] }
 0x424   : > { %4245 = vmatmul.mubr.f32.gmra.mrb[72].mxu1 %v8525_v14 }
 0x425   : > { %4249 = vmatprep.mubr.f32.mxu1 %v8216_v57  ;;  %v9071_v57 = vld [vmem:[#allocation24_spill] sm:$0xff] }
 0x428   : > { %4250 = vmatmul.mubr.f32.gmra.mrb[74].mxu1 %v8529_v19 }
 0x429   : > { %4254 = vmatprep.mubr.f32.mxu1 %v8233_v21  ;;  %v9072_v21 = vld [vmem:[#allocation26_spill] sm:$0xff] }
 0x42c   : > { %4255 = vmatmul.mubr.f32.gmra.mrb[76].mxu1 %v8533_v62 }
 0x42d   : > { %4259 = vmatprep.mubr.f32.mxu1 %v9066_v56  ;;  %v9074_v56 = vld [vmem:[#allocation33_spill] sm:$0xff] }
 0x430   : > { %4260 = vmatmul.mubr.f32.gmra.mrb[78].mxu1 %v8537_v55 }
 0x431   : > { %4264 = vmatprep.mubr.f32.mxu1 %v9067_v27  ;;  %v9075_v27 = vld [vmem:[#allocation34_spill] sm:$0xff] }
 0x434   : > { %4265 = vmatmul.mubr.f32.gmra.mrb[80].mxu1 %v9070_v42  ;;  %v9078_v42 = vmax.f32 %v8296_v53, 0.0  ;;  %v3001_v53 = vld [vmem:[#allocation3 + $0x48] sm:$0xff] }
 0x435   : > { %4269 = vmatprep.mubr.f32.mxu1 %v9068_v59  ;;  %v9076_v59 = vld [vmem:[#allocation37_spill] sm:$0xff] }
 0x436   : > { %v9077_v0 = vmax.f32 %v9076_v59, 0.0  ;;  %v9084_v59 = vld [vmem:[#allocation21_spill] sm:$0xff] }
 0x438   : > { %4270 = vmatmul.mubr.f32.gmra.mrb[82].mxu1 %v9071_v57  ;;  %v2999_v57 = vld [vmem:[#allocation3 + $0x30] sm:$0xff] }
 0x439   : > { %4274 = vmatprep.mubr.f32.mxu1 %v8385_v41 }
 0x43c   : > { %4275 = vmatmul.mubr.f32.gmra.mrb[84].mxu1 %v9072_v21  ;;  %v9079_v21 = vld [vmem:[#allocation13_spill] sm:$0xff] }
 0x43d   : > { %4279 = vmatprep.mubr.f32.mxu1 %v8393_v45 }
 0x440   : > { %4280 = vmatmul.mubr.f32.gmra.mrb[86].mxu1 %v9073_v11  ;;  %v3000_v11 = vld [vmem:[#allocation3 + $0x38] sm:$0xff] }
 0x441   : > { %4284 = vmatprep.mubr.f32.mxu1 %v8399_v50 }
 0x444   : > { %4285 = vmatmul.mubr.f32.gmra.mrb[88].mxu1 %v9074_v56  ;;  %v9080_v56 = vld [vmem:[#allocation14_spill] sm:$0xff] }
 0x445   : > { %4289 = vmatprep.mubr.f32.mxu1 %v8409_v22 }
 0x448   : > { %4290 = vmatmul.mubr.f32.gmra.mrb[90].mxu1 %v9075_v27  ;;  %v9083_v27 = vld [vmem:[#allocation20_spill] sm:$0xff] }
 0x449   : > { %4294 = vmatprep.mubr.f32.mxu1 %v8552_v6 }
 0x44c   : > { %4295 = vmatmul.mubr.f32.gmra.mrb[92].mxu1 %v9077_v0  ;;  %v9085_v0 = vld [vmem:[#allocation22_spill] sm:$0xff] }
 0x44d   : > { %4299 = vmatprep.mubr.f32.mxu1 %v8557_v37 }
 0x450   : > { %4300 = vmatmul.mubr.f32.gmra.mrb[94].mxu1 %v9078_v42  ;;  %v3007_v42 = vld [vmem:[#allocation3 + $0x90] sm:$0xff] }
 0x451   : > { %4369 = vmatprep.mubr.f32.mxu1 %v8420_v38  ;;  %v9081_v38 = vld [vmem:[#allocation16_spill] sm:$0xff] }
 0x454   : > { %4370 = vmatmul.mubr.f32.vlgmr.msra.gmra.mrb[32].mxu1 %v2999_v57  ;;  %v3009_v57 = vld [vmem:[#allocation3 + $0xa8] sm:$0xff] }
 0x455   : > { %4374 = vmatprep.mubr.f32.mxu1 %v8428_v60  ;;  %5795 = vmatpush3.bf16.msra.mxu1 %v9069_v32  ;;  %v3002_v60 = vld [vmem:[#allocation3 + $0x50] sm:$0xff]  ;;  %v9082_v32 = vld [vmem:[#allocation17_spill] sm:$0xff] }
 0x456   : > { %5788 = vmatprep.subr.bf16.mxu1 %v9079_v21 }
 0x458   : > { %4375 = vmatmul.mubr.f32.gmra.mrb[34].mxu1 %v3000_v11  ;;  %v3085_v11 = vld [vmem:[#allocation3 + $0x139] sm:$0xff] }
 0x459   : > { %4379 = vmatprep.mubr.f32.mxu1 %v8432_v44  ;;  %5796 = vmatpush3.bf16.msra.mxu1 %v9079_v21  ;;  %v3003_v44 = vld [vmem:[#allocation3 + $0x60] sm:$0xff] }
 0x45a   : > { %5789 = vmatprep.subr.bf16.mxu1 %v9080_v56  ;;  %v3011_v21 = vld [vmem:[#allocation3 + $0xc0] sm:$0xff] }
 0x45c   : > { %4380 = vmatmul.mubr.f32.gmra.mrb[36].mxu1 %v3001_v53  ;;  %v3087_v53 = vld [vmem:[#allocation3 + $0x151] sm:$0xff] }
 0x45d   : > { %4384 = vmatprep.mubr.f32.mxu1 %v8440_v33  ;;  %5797 = vmatpush3.bf16.msra.mxu1 %v9080_v56  ;;  %v3004_v33 = vld [vmem:[#allocation3 + $0x68] sm:$0xff] }
 0x45e   : > { %5790 = vmatprep.subr.bf16.mxu1 %v9081_v38  ;;  %v3086_v56 = vld [vmem:[#allocation3 + $0x141] sm:$0xff] }
 0x460   : > { %4385 = vmatmul.mubr.f32.gmra.mrb[38].mxu1 %v3002_v60  ;;  %v3089_v60 = vld [vmem:[#allocation3 + $0x169] sm:$0xff] }
 0x461   : > { %4389 = vmatprep.mubr.f32.mxu1 %v8444_v8  ;;  %5798 = vmatpush3.bf16.msra.mxu1 %v9081_v38  ;;  %v3005_v8 = vld [vmem:[#allocation3 + $0x78] sm:$0xff] }
 0x462   : > { %5791 = vmatprep.subr.bf16.mxu1 %v9082_v32  ;;  %v3088_v38 = vld [vmem:[#allocation3 + $0x159] sm:$0xff] }
 0x464   : > { %4390 = vmatmul.mubr.f32.gmra.mrb[40].mxu1 %v3003_v44  ;;  %v3026_v44 = vld [vmem:[#allocation3 + $0x170] sm:$0xff] }
 0x465   : > { %4394 = vmatprep.mubr.f32.mxu1 %v8452_v16  ;;  %5799 = vmatpush3.bf16.msra.mxu1 %v9082_v32  ;;  %v3006_v16 = vld [vmem:[#allocation3 + $0x80] sm:$0xff]  ;;  %v3090_v32 = vld [vmem:[#allocation3 + $0x171] sm:$0xff] }
 0x466   : > { %5792 = vmatprep.subr.bf16.mxu1 %v9083_v27 }
 0x468   : > { %4395 = vmatmul.mubr.f32.gmra.mrb[42].mxu1 %v3004_v33  ;;  %v3092_v33 = vld [vmem:[#allocation3 + $0x189] sm:$0xff] }
 0x469   : > { %4399 = vmatprep.mubr.f32.mxu1 %v8456_v43  ;;  %5800 = vmatpush3.bf16.msra.mxu1 %v9083_v27  ;;  %v3008_v43 = vld [vmem:[#allocation3 + $0x98] sm:$0xff]  ;;  %v3091_v27 = vld [vmem:[#allocation3 + $0x181] sm:$0xff] }
 0x46a   : > { %5793 = vmatprep.subr.bf16.mxu1 %v9084_v59 }
 0x46c   : > { %4400 = vmatmul.mubr.f32.gmra.mrb[44].mxu1 %v3005_v8  ;;  %v3029_v8 = vld [vmem:[#allocation3 + $0x198] sm:$0xff] }
 0x46d   : > { %4404 = vmatprep.mubr.f32.mxu1 %v8464_v7  ;;  %5801 = vmatpush3.bf16.msra.mxu1 %v9084_v59  ;;  %v3010_v7 = vld [vmem:[#allocation3 + $0xb0] sm:$0xff]  ;;  %v3093_v59 = vld [vmem:[#allocation3 + $0x199] sm:$0xff] }
 0x46e   : > { %5794 = vmatprep.subr.bf16.mxu1 %v9085_v0 }
 0x470   : > { %4405 = vmatmul.mubr.f32.gmra.mrb[46].mxu1 %v3006_v16  ;;  %v6308_v16 = vld [vmem:[#allocation3 + $0x8] sm:$0xff] }
 0x471   : > { %4409 = vmatprep.mubr.f32.mxu1 %v8468_v52  ;;  %5802 = vmatpush3.bf16.msra.mxu1 %v9085_v0  ;;  %v3012_v52 = vld [vmem:[#allocation3 + $0xc8] sm:$0xff] }
 0x472   : > { %v3094_v0 = vld [vmem:[#allocation3 + $0x1a1] sm:$0xff] }
 0x474   : > { %4410 = vmatmul.mubr.f32.gmra.mrb[48].mxu1 %v3007_v42 }
 0x475   : > { %4414 = vmatprep.mubr.f32.mxu1 %v8476_v51  ;;  %v3013_v51 = vld [vmem:[#allocation3 + $0xd8] sm:$0xff] }
 0x478   : > { %4415 = vmatmul.mubr.f32.gmra.mrb[50].mxu1 %v3008_v43 }
 0x479   : > { %4419 = vmatprep.mubr.f32.mxu1 %v8480_v18  ;;  %v3014_v18 = vld [vmem:[#allocation3 + $0xe0] sm:$0xff] }
 0x47c   : > { %4420 = vmatmul.mubr.f32.gmra.mrb[52].mxu1 %v3009_v57 }
 0x47d   : > { %4424 = vmatprep.mubr.f32.mxu1 %v8488_v49  ;;  %v3015_v49 = vld [vmem:[#allocation3 + $0xf0] sm:$0xff] }
 0x480   : > { %4425 = vmatmul.mubr.f32.gmra.mrb[54].mxu1 %v3010_v7  ;;  %v6311_v7 = vld [vmem:[%s6599_s8 + $0x28] sm:$0x3] }
 0x481   : > { %4429 = vmatprep.mubr.f32.mxu1 %v8492_v25  ;;  %v3016_v25 = vld [vmem:[#allocation3 + $0xf8] sm:$0xff] }
 0x484   : > { %4430 = vmatmul.mubr.f32.gmra.mrb[56].mxu1 %v3011_v21  ;;  %v4806_v21 = vrot.slane %v6311_v7, 1 }
 0x485   : > { %4434 = vmatprep.mubr.f32.mxu1 %v8500_v9  ;;  %v3017_v9 = vld [vmem:[#allocation3 + $0x108] sm:$0xff] }
 0x488   : > { %4435 = vmatmul.mubr.f32.gmra.mrb[58].mxu1 %v3012_v52 }
 0x489   : > { %4439 = vmatprep.mubr.f32.mxu1 %v8505_v26  ;;  %v3018_v26 = vld [vmem:[#allocation3 + $0x110] sm:$0xff] }
 0x48c   : > { %4440 = vmatmul.mubr.f32.gmra.mrb[60].mxu1 %v3013_v51 }
 0x48d   : > { %4444 = vmatprep.mubr.f32.mxu1 %v8513_v30  ;;  %v3019_v30 = vld [vmem:[#allocation3 + $0x120] sm:$0xff] }
 0x490   : > { %4445 = vmatmul.mubr.f32.gmra.mrb[62].mxu1 %v3014_v18 }
 0x491   : > { %4449 = vmatprep.mubr.f32.mxu1 %v8517_v39  ;;  %v3020_v39 = vld [vmem:[#allocation3 + $0x128] sm:$0xff] }
 0x494   : > { %4450 = vmatmul.mubr.f32.gmra.mrb[64].mxu1 %v3015_v49 }
 0x495   : > { %4454 = vmatprep.mubr.f32.mxu1 %v8521_v61  ;;  %v3021_v61 = vld [vmem:[#allocation3 + $0x138] sm:$0xff] }
 0x498   : > { %4455 = vmatmul.mubr.f32.gmra.mrb[66].mxu1 %v3016_v25 }
 0x499   : > { %4459 = vmatprep.mubr.f32.mxu1 %v8525_v14  ;;  %v3022_v14 = vld [vmem:[#allocation3 + $0x140] sm:$0xff] }
 0x49c   : > { %4460 = vmatmul.mubr.f32.gmra.mrb[68].mxu1 %v3017_v9 }
 0x49d   : > { %4464 = vmatprep.mubr.f32.mxu1 %v8529_v19  ;;  %v3023_v19 = vld [vmem:[#allocation3 + $0x150] sm:$0xff] }
 0x4a0   : > { %4465 = vmatmul.mubr.f32.gmra.mrb[70].mxu1 %v3018_v26  ;;  %v6312_v26 = vld [vmem:[%s6599_s8 + $0x30] sm:$0xff] }
 0x4a1   : > { %4469 = vmatprep.mubr.f32.mxu1 %v8533_v62  ;;  %v3024_v62 = vld [vmem:[#allocation3 + $0x158] sm:$0xff] }
 0x4a4   : > { %4470 = vmatmul.mubr.f32.gmra.mrb[72].mxu1 %v3019_v30  ;;  %v4808_v30 = vrot.slane %v6312_v26, 1 }
 0x4a5   : > { %4474 = vmatprep.mubr.f32.mxu1 %v8537_v55  ;;  %v3025_v55 = vld [vmem:[#allocation3 + $0x168] sm:$0xff] }
 0x4a8   : > { %4475 = vmatmul.mubr.f32.gmra.mrb[74].mxu1 %v3020_v39  ;;  %v6313_v39 = vld [vmem:[%s6599_s8 + $0x38] sm:$0xff] }
 0x4a9   : > { %4479 = vmatprep.mubr.f32.mxu1 %v3085_v11  ;;  %v4809_v11 = vrot.slane %v6313_v39, 1  ;;  %v6320_v39 = vld [vmem:[%s6599_s8 + $0x70] sm:$0x3] }
 0x4ac   : > { %4480 = vmatmul.mubr.f32.gmra.mrb[76].mxu1 %v3021_v61 }
 0x4ad   : > { %4484 = vmatprep.mubr.f32.mxu1 %v3086_v56 }
 0x4b0   : > { %4485 = vmatmul.mubr.f32.gmra.mrb[78].mxu1 %v3022_v14 }
 0x4b1   : > { %4489 = vmatprep.mubr.f32.mxu1 %v3087_v53 }
 0x4b4   : > { %4490 = vmatmul.mubr.f32.gmra.mrb[80].mxu1 %v3023_v19  ;;  %v4810_v19 = vsel %vm426_vm0, %v4808_v30, %v4809_v11 }
 0x4b5   : > { %4494 = vmatprep.mubr.f32.mxu1 %v3088_v38  ;;  %v6314_v38 = vld [vmem:[%s6599_s8 + $0x40] sm:$0x3] }
 0x4b8   : > { %4495 = vmatmul.mubr.f32.gmra.mrb[82].mxu1 %v3024_v62  ;;  %v4811_v62 = vrot.slane %v6314_v38, 1 }
 0x4b9   : > { %4499 = vmatprep.mubr.f32.mxu1 %v3089_v60 }
 0x4bc   : > { %4500 = vmatmul.mubr.f32.gmra.mrb[84].mxu1 %v3025_v55 }
 0x4bd   : > { %4504 = vmatprep.mubr.f32.mxu1 %v3090_v32 }
 0x4c0   : > { %4505 = vmatmul.mubr.f32.gmra.mrb[86].mxu1 %v3026_v44 }
 0x4c1   : > { %4509 = vmatprep.mubr.f32.mxu1 %v3091_v27  ;;  %v4812_v27 = vsel %vm426_vm0, %v4809_v11, %v4811_v62  ;;  %v4821_v11 = vrot.slane %v6320_v39, 1  ;;  %v6322_v62 = vld [vmem:[%s6599_s8 + $0x80] sm:$0xff] }
 0x4c4   : > { %4510 = vmatmul.mubr.f32.gmra.mrb[88].mxu1 %v8396_v40  ;;  %v3157_v40 = vld [vmem:[#allocation3 + $0x19a] sm:$0xff] }
 0x4c5   : > { %4514 = vmatprep.mubr.f32.mxu1 %v3092_v33  ;;  %v6315_v33 = vld [vmem:[%s6599_s8 + $0x48] sm:$0xff] }
 0x4c8   : > { %4515 = vmatmul.mubr.f32.gmra.mrb[90].mxu1 %v8404_v47  ;;  %v3158_v47 = vld [vmem:[#allocation3 + $0x1a2] sm:$0xff] }
 0x4c9   : > { %4519 = vmatprep.mubr.f32.mxu1 %v3093_v59  ;;  %v4813_v59 = vrot.slane %v6315_v33, 1  ;;  %v6323_v33 = vld [vmem:[%s6599_s8 + $0x88] sm:$0x3] }
 0x4cc   : > { %4520 = vmatmul.mubr.f32.gmra.mrb[92].mxu1 %v3029_v8  ;;  %v6316_v8 = vld [vmem:[%s6599_s8 + $0x50] sm:$0xff] }
 0x4cd   : > { %4524 = vmatprep.mubr.f32.mxu1 %v3094_v0  ;;  %v4814_v0 = vrot.slane %v6316_v8, 1 }
 0x4d0   : > { %4525 = vmatmul.mubr.f32.gmra.mrb[94].mxu1 %v6308_v16 }
 0x4d1   : > { %5327 = vmatprep.mubr.f32.mxu1 %v8385_v41  ;;  %v8611_v41 = vld [vmem:[%s8841_s4] ss:$0 sm:$0xff] }
 0x4d4   : > { %5328 = vmatmul.mubr.f32.vlgmr.msra.gmra.mrb[96].mxu1 %v8393_v45  ;;  %v6309_v45 = vld [vmem:[%s6599_s8 + $0x18] sm:$0xff] }
 0x4d5   : > { %5330 = vmatprep.mubr.f32.mxu1 %v8399_v50  ;;  %v4803_v42 = vrot.slane %v6309_v45, 1  ;;  %v6310_v50 = vld [vmem:[%s6599_s8 + $0x20] sm:$0xff] }
 0x4d8   : > { %5331 = vmatmul.mubr.f32.gmra.mrb[98].mxu1 %v8409_v22  ;;  %v4804_v22 = vrot.slane %v6310_v50, 1  ;;  %v6317_v50 = vld [vmem:[%s6599_s8 + $0x58] sm:$0x3] }
 0x4d9   : > { %5333 = vmatprep.mubr.f32.mxu1 %v8552_v6 }
 0x4da   : > { %v4805_v57 = vsel %vm426_vm0, %v4803_v42, %v4804_v22  ;;  %v4807_v9 = vsel %vm426_vm0, %v4804_v22, %v4806_v21  ;;  %v4815_v42 = vsel %vm426_vm0, %v4813_v59, %v4814_v0  ;;  %v4816_v22 = vrot.slane %v6317_v50, 1  ;;  %v6318_v21 = vld [vmem:[%s6599_s8 + $0x60] sm:$0xff] }
 0x4db   : > { %v4826_v59 = vrot.slane %v6323_v33, 1 }
 0x4dc   : > { %5334 = vmatmul.mubr.f32.gmra.mrb[100].mxu1 %v8557_v37  ;;  %v4817_v7 = vsel %vm426_vm0, %v4814_v0, %v4816_v22 }
 0x4dd   : > { %5336 = vmatprep.mubr.f32.mxu1 %v3157_v40 }
 0x4e0   : > { %5337 = vmatmul.mubr.f32.gmra.mrb[102].mxu1 %v3158_v47 }
 0x527   : > { %v4371_v6 = vpop.f32.mrb[32].mxu1 }
 0x528   : > { %v5835_v37 = vadd.f32 %v8611_v41, %v4371_v6  ;;  %v4373_v43 = vpop.f32.mrb[33].mxu1 }
 0x52a   : > { %v4597_v52 = vadd.f32 %v5835_v37, %v8380_v34 }
 0x52b   : > { %v4376_v51 = vpop.f32.mrb[34].mxu1 }
 0x52c   : > { %v4915_v18 = vadd.f32 %v4805_v57, %v4597_v52  ;;  %v5836_v49 = vadd.f32 %v8611_v41, %v4376_v51  ;;  %v4378_v25 = vpop.f32.mrb[35].mxu1  ;;  %v4818_v52 = vrot.slane %v6318_v21, 1  ;;  %v6319_v51 = vld [vmem:[%s6599_s8 + $0x68] sm:$0xff] }
 0x52e   : > { %4947 = vst [vmem:[%s8625_s23] sm:$0xff] %v4915_v18  ;;  %v4602_v34 = vadd.f32 %v5836_v49, %v8377_v28  ;;  %v4819_v18 = vrot.slane %v6319_v51, 1 }
 0x52f   : > { %v4381_v61 = vpop.f32.mrb[36].mxu1 }
 0x530   : > { %v4916_v56 = vadd.f32 %v4807_v9, %v4602_v34  ;;  %v5837_v14 = vadd.f32 %v8611_v41, %v4381_v61  ;;  %v4383_v53 = vpop.f32.mrb[37].mxu1  ;;  %v4820_v30 = vsel %vm426_vm0, %v4818_v52, %v4819_v18 }
 0x531   : > { %v4822_v53 = vsel %vm426_vm0, %v4819_v18, %v4821_v11 }
 0x532   : > { %4948 = vst [vmem:[%s8625_s23 + $0x8] sm:$0xff] %v4916_v56  ;;  %v4607_v60 = vadd.f32 %v5837_v14, %v8390_v23 }
 0x533   : > { %v4386_v55 = vpop.f32.mrb[38].mxu1 }
 0x534   : > { %v4917_v32 = vadd.f32 %v4810_v19, %v4607_v60  ;;  %v5838_v44 = vadd.f32 %v8611_v41, %v4386_v55  ;;  %v4388_v28 = vpop.f32.mrb[39].mxu1  ;;  %v6321_v19 = vld [vmem:[%s6599_s8 + $0x78] sm:$0xff]  ;;  %v4824_v60 = vrot.slane %v6322_v62, 1 }
 0x535   : > { %v4823_v38 = vrot.slane %v6321_v19, 1 }
 0x536   : > { %4949 = vst [vmem:[%s8625_s23 + $0x10] sm:$0xff] %v4917_v32  ;;  %v4612_v16 = vadd.f32 %v5838_v44, %v8387_v29 }
 0x537   : > { %v4391_v40 = vpop.f32.mrb[40].mxu1 }
 0x538   : > { %v4918_v23 = vadd.f32 %v4812_v27, %v4612_v16  ;;  %v5839_v47 = vadd.f32 %v8611_v41, %v4391_v40  ;;  %v4393_v45 = vpop.f32.mrb[41].mxu1  ;;  %v4825_v27 = vsel %vm426_vm0, %v4823_v38, %v4824_v60 }
 0x53a   : > { %4950 = vst [vmem:[%s8625_s23 + $0x18] sm:$0xff] %v4918_v23  ;;  %v4617_v6 = vadd.f32 %v5839_v47, %v8406_v4  ;;  %v4827_v23 = vsel %vm426_vm0, %v4824_v60, %v4826_v59  ;;  %v6324_v47 = vld [vmem:[%s6599_s8 + $0x90] sm:$0xff]  ;;  %v6330_v60 = vld [vmem:[%s6599_s8 + $0xc0] sm:$0xff] }
 0x53b   : > { %v4396_v37 = vpop.f32.mrb[42].mxu1  ;;  %v4828_v45 = vrot.slane %v6324_v47, 1 }
 0x53c   : > { %v4919_v43 = vadd.f32 %v4815_v42, %v4617_v6  ;;  %v5840_v57 = vadd.f32 %v8611_v41, %v4396_v37  ;;  %v4398_v29 = vpop.f32.mrb[43].mxu1  ;;  %v6325_v42 = vld [vmem:[%s6599_s8 + $0x98] sm:$0xff] }
 0x53d   : > { %v4829_v50 = vrot.slane %v6325_v42, 1  ;;  %v6326_v29 = vld [vmem:[%s6599_s8 + $0xa0] sm:$0x3] }
 0x53e   : > { %4951 = vst [vmem:[%s8625_s23 + $0x20] sm:$0xff] %v4919_v43  ;;  %v4622_v49 = vadd.f32 %v5840_v57, %v8401_v46 }
 0x53f   : > { %v4401_v25 = vpop.f32.mrb[44].mxu1  ;;  %v4830_v57 = vsel %vm426_vm0, %v4828_v45, %v4829_v50  ;;  %v6333_v45 = vld [vmem:[%s6599_s8 + $0xd8] sm:$0xff] }
 0x540   : > { %v4920_v4 = vadd.f32 %v4817_v7, %v4622_v49  ;;  %v5841_v9 = vadd.f32 %v8611_v41, %v4401_v25  ;;  %v4403_v26 = vpop.f32.mrb[45].mxu1  ;;  %v4831_v7 = vrot.slane %v6326_v29, 1  ;;  %v6327_v25 = vld [vmem:[%s6599_s8 + $0xa8] sm:$0xff]  ;;  %v4843_v42 = vrot.slane %v6333_v45, 1 }
 0x541   : > { %v6335_v29 = vld [vmem:[%s6599_s8 + $0xe8] sm:$0x3] }
 0x542   : > { %4952 = vst [vmem:[%s8625_s23 + $0x28] sm:$0xff] %v4920_v4  ;;  %v4627_v34 = vadd.f32 %v5841_v9, %v8415_v36  ;;  %v4832_v49 = vsel %vm426_vm0, %v4829_v50, %v4831_v7  ;;  %v4833_v4 = vrot.slane %v6327_v25, 1  ;;  %v6328_v9 = vld [vmem:[%s6599_s8 + $0xb0] sm:$0xff]  ;;  %v6334_v50 = vld [vmem:[%s6599_s8 + $0xe0] sm:$0xff]  ;;  %v4846_v7 = vrot.slane %v6335_v29, 1 }
 0x543   : > { %v4406_v61 = vpop.f32.mrb[46].mxu1  ;;  %v4834_v26 = vrot.slane %v6328_v9, 1 }
 0x544   : > { %v4921_v56 = vadd.f32 %v4820_v30, %v4627_v34  ;;  %v5842_v14 = vadd.f32 %v8611_v41, %v4406_v61  ;;  %v4408_v46 = vpop.f32.mrb[47].mxu1 }
 0x545   : > { %v4835_v61 = vsel %vm426_vm0, %v4833_v4, %v4834_v26  ;;  %v6337_v4 = vld [vmem:[%s6599_s8 + $0xf8] sm:$0xff] }
 0x546   : > { %4953 = vst [vmem:[%s8625_s23 + $0x30] sm:$0xff] %v4921_v56  ;;  %v4632_v55 = vadd.f32 %v5842_v14, %v8413_v10  ;;  %v6329_v56 = vld [vmem:[%s6599_s8 + $0xb8] sm:$0x3]  ;;  %v4849_v9 = vrot.slane %v6337_v4, 1 }
 0x547   : > { %v4411_v32 = vpop.f32.mrb[48].mxu1  ;;  %v4836_v14 = vrot.slane %v6329_v56, 1 }
 0x548   : > { %v4922_v36 = vadd.f32 %v4822_v53, %v4632_v55  ;;  %v5843_v44 = vadd.f32 %v8611_v41, %v4411_v32  ;;  %v4413_v28 = vpop.f32.mrb[49].mxu1  ;;  %v4838_v55 = vrot.slane %v6330_v60, 1  ;;  %v6331_v32 = vld [vmem:[%s6599_s8 + $0xc8] sm:$0xff] }
 0x549   : > { %v4837_v62 = vsel %vm426_vm0, %v4834_v26, %v4836_v14 }
 0x54a   : > { %4954 = vst [vmem:[%s8625_s23 + $0x38] sm:$0xff] %v4922_v36  ;;  %v4637_v8 = vadd.f32 %v5843_v44, %v8425_v31  ;;  %v4839_v36 = vrot.slane %v6331_v32, 1 }
 0x54b   : > { %v4416_v0 = vpop.f32.mrb[50].mxu1 }
 0x54c   : > { %v4923_v16 = vadd.f32 %v4825_v27, %v4637_v8  ;;  %v5844_v40 = vadd.f32 %v8611_v41, %v4416_v0  ;;  %v4418_v10 = vpop.f32.mrb[51].mxu1  ;;  %v4840_v59 = vsel %vm426_vm0, %v4838_v55, %v4839_v36  ;;  %v6332_v8 = vld [vmem:[%s6599_s8 + $0xd0] sm:$0x3] }
 0x54d   : > { %v4841_v0 = vrot.slane %v6332_v8, 1 }
 0x54e   : > { %4955 = vst [vmem:[%s8625_s23 + $0x40] sm:$0xff] %v4923_v16  ;;  %v4642_v22 = vadd.f32 %v5844_v40, %v8422_v63 }
 0x54f   : > { %v4421_v6 = vpop.f32.mrb[52].mxu1  ;;  %v4842_v47 = vsel %vm426_vm0, %v4839_v36, %v4841_v0 }
 0x550   : > { %v4924_v31 = vadd.f32 %v4827_v23, %v4642_v22  ;;  %v5845_v37 = vadd.f32 %v8611_v41, %v4421_v6  ;;  %v4423_v43 = vpop.f32.mrb[53].mxu1  ;;  %v4844_v22 = vrot.slane %v6334_v50, 1 }
 0x552   : > { %4956 = vst [vmem:[%s8625_s23 + $0x48] sm:$0xff] %v4924_v31  ;;  %v4647_v21 = vadd.f32 %v5845_v37, %v8437_v3 }
 0x553   : > { %v4426_v52 = vpop.f32.mrb[54].mxu1 }
 0x554   : > { %v4925_v51 = vadd.f32 %v4830_v57, %v4647_v21  ;;  %v5846_v18 = vadd.f32 %v8611_v41, %v4426_v52  ;;  %v4428_v63 = vpop.f32.mrb[55].mxu1  ;;  %v4845_v57 = vsel %vm426_vm0, %v4843_v42, %v4844_v22 }
 0x555   : > { %v4847_v63 = vsel %vm426_vm0, %v4844_v22, %v4846_v7 }
 0x556   : > { %4957 = vst [vmem:[%s8625_s23 + $0x50] sm:$0xff] %v4925_v51  ;;  %v4652_v30 = vadd.f32 %v5846_v18, %v8434_v5 }
 0x557   : > { %v4431_v39 = vpop.f32.mrb[56].mxu1 }
 0x558   : > { %v4926_v3 = vadd.f32 %v4832_v49, %v4652_v30  ;;  %v5847_v11 = vadd.f32 %v8611_v41, %v4431_v39  ;;  %v4433_v34 = vpop.f32.mrb[57].mxu1  ;;  %v6336_v49 = vld [vmem:[%s6599_s8 + $0xf0] sm:$0xff] }
 0x559   : > { %v4848_v25 = vrot.slane %v6336_v49, 1  ;;  %v6338_v34 = vld [vmem:[%s6599_s8 + $0x100] sm:$0x3] }
 0x55a   : > { %4958 = vst [vmem:[%s8625_s23 + $0x58] sm:$0xff] %v4926_v3  ;;  %v4657_v46 = vadd.f32 %v5847_v11, %v8449_v13 }
 0x55b   : > { %v4436_v53 = vpop.f32.mrb[58].mxu1  ;;  %v4850_v11 = vsel %vm426_vm0, %v4848_v25, %v4849_v9 }
 0x55c   : > { %v4927_v19 = vadd.f32 %v4835_v61, %v4657_v46  ;;  %v5848_v38 = vadd.f32 %v8611_v41, %v4436_v53  ;;  %v4438_v5 = vpop.f32.mrb[59].mxu1  ;;  %v4851_v61 = vrot.slane %v6338_v34, 1  ;;  %v6346_v34 = vld [vmem:[%s6599_s8 + $0x148] sm:$0x3] }
 0x55e   : > { %4959 = vst [vmem:[%s8625_s23 + $0x60] sm:$0xff] %v4927_v19  ;;  %v4662_v44 = vadd.f32 %v5848_v38, %v8446_v20  ;;  %v4852_v19 = vsel %vm426_vm0, %v4849_v9, %v4851_v61  ;;  %v6339_v38 = vld [vmem:[%s6599_s8 + $0x108] sm:$0xff]  ;;  %v4866_v61 = vrot.slane %v6346_v34, 1 }
 0x55f   : > { %v4441_v28 = vpop.f32.mrb[60].mxu1  ;;  %v4853_v5 = vrot.slane %v6339_v38, 1 }
 0x560   : > { %v4928_v13 = vadd.f32 %v4837_v62, %v4662_v44  ;;  %v5849_v27 = vadd.f32 %v8611_v41, %v4441_v28  ;;  %v4443_v33 = vpop.f32.mrb[61].mxu1  ;;  %v6340_v62 = vld [vmem:[%s6599_s8 + $0x110] sm:$0xff] }
 0x561   : > { %v4854_v60 = vrot.slane %v6340_v62, 1 }
 0x562   : > { %4960 = vst [vmem:[%s8625_s23 + $0x68] sm:$0xff] %v4928_v13  ;;  %v4667_v16 = vadd.f32 %v5849_v27, %v8461_v24  ;;  %v6341_v13 = vld [vmem:[%s6599_s8 + $0x118] sm:$0x3] }
 0x563   : > { %v4446_v40 = vpop.f32.mrb[62].mxu1  ;;  %v4855_v28 = vsel %vm426_vm0, %v4853_v5, %v4854_v60  ;;  %v4856_v27 = vrot.slane %v6341_v13, 1  ;;  %v6348_v5 = vld [vmem:[%s6599_s8 + $0x158] sm:$0xff] }
 0x564   : > { %v4929_v10 = vadd.f32 %v4840_v59, %v4667_v16  ;;  %v5850_v23 = vadd.f32 %v8611_v41, %v4446_v40  ;;  %v4448_v20 = vpop.f32.mrb[63].mxu1  ;;  %v6342_v40 = vld [vmem:[%s6599_s8 + $0x120] sm:$0xff]  ;;  %v4869_v62 = vrot.slane %v6348_v5, 1 }
 0x565   : > { %v4857_v16 = vsel %vm426_vm0, %v4854_v60, %v4856_v27  ;;  %v6349_v60 = vld [vmem:[%s6599_s8 + $0x160] sm:$0x3] }
 0x566   : > { %4961 = vst [vmem:[%s8625_s23 + $0x70] sm:$0xff] %v4929_v10  ;;  %v4672_v6 = vadd.f32 %v5850_v23, %v8458_v35  ;;  %v4858_v10 = vrot.slane %v6342_v40, 1  ;;  %v6343_v23 = vld [vmem:[%s6599_s8 + $0x128] sm:$0xff] }
 0x567   : > { %v4451_v31 = vpop.f32.mrb[64].mxu1  ;;  %v4859_v20 = vrot.slane %v6343_v23, 1 }
 0x568   : > { %v4930_v24 = vadd.f32 %v4842_v47, %v4672_v6  ;;  %v5851_v37 = vadd.f32 %v8611_v41, %v4451_v31  ;;  %v4453_v43 = vpop.f32.mrb[65].mxu1  ;;  %v6344_v6 = vld [vmem:[%s6599_s8 + $0x130] sm:$0x3] }
 0x569   : > { %v4860_v22 = vsel %vm426_vm0, %v4858_v10, %v4859_v20  ;;  %v4861_v31 = vrot.slane %v6344_v6, 1 }
 0x56a   : > { %4962 = vst [vmem:[%s8625_s23 + $0x78] sm:$0xff] %v4930_v24  ;;  %v4677_v21 = vadd.f32 %v5851_v37, %v8473_v48 }
 0x56b   : > { %v4456_v52 = vpop.f32.mrb[66].mxu1 }
 0x56c   : > { %v4931_v51 = vadd.f32 %v4845_v57, %v4677_v21  ;;  %v5852_v18 = vadd.f32 %v8611_v41, %v4456_v52  ;;  %v4458_v35 = vpop.f32.mrb[67].mxu1 }
 0x56e   : > { %4963 = vst [vmem:[%s8625_s23 + $0x80] sm:$0xff] %v4931_v51  ;;  %v4682_v26 = vadd.f32 %v5852_v18, %v8470_v17 }
 0x56f   : > { %v4461_v30 = vpop.f32.mrb[68].mxu1 }
 0x570   : > { %v4932_v48 = vadd.f32 %v4847_v63, %v4682_v26  ;;  %v5853_v39 = vadd.f32 %v8611_v41, %v4461_v30  ;;  %v4463_v3 = vpop.f32.mrb[69].mxu1 }
 0x571   : > { %v6345_v3 = vld [vmem:[%s6599_s8 + $0x140] sm:$0xff] }
 0x572   : > { %4964 = vst [vmem:[%s8625_s23 + $0x88] sm:$0xff] %v4932_v48  ;;  %v4687_v56 = vadd.f32 %v5853_v39, %v8485_v15 }
 0x573   : > { %v4466_v14 = vpop.f32.mrb[70].mxu1 }
 0x574   : > { %v4933_v46 = vadd.f32 %v4850_v11, %v4687_v56  ;;  %v5854_v53 = vadd.f32 %v8611_v41, %v4466_v14  ;;  %v4468_v17 = vpop.f32.mrb[71].mxu1  ;;  %v4864_v11 = vrot.slane %v6345_v3, 1  ;;  %v6347_v14 = vld [vmem:[%s6599_s8 + $0x138] sm:$0xff] }
 0x576   : > { %4965 = vst [vmem:[%s8625_s23 + $0x90] sm:$0xff] %v4933_v46  ;;  %v4692_v55 = vadd.f32 %v5854_v53, %v8482_v1  ;;  %v4863_v46 = vrot.slane %v6347_v14, 1  ;;  %v4867_v38 = vsel %vm426_vm0, %v4864_v11, %v4866_v61 }
 0x577   : > { %v4471_v32 = vpop.f32.mrb[72].mxu1 }
 0x578   : > { %v4934_v15 = vadd.f32 %v4852_v19, %v4692_v55  ;;  %v5855_v36 = vadd.f32 %v8611_v41, %v4471_v32  ;;  %v4473_v44 = vpop.f32.mrb[73].mxu1  ;;  %v4871_v55 = vrot.slane %v6349_v60, 1 }
 0x579   : > { %v6350_v44 = vld [vmem:[%s6599_s8 + $0x150] sm:$0xff] }
 0x57a   : > { %4966 = vst [vmem:[%s8625_s23 + $0x98] sm:$0xff] %v4934_v15  ;;  %v4697_v33 = vadd.f32 %v5855_v36, %v8497_v12  ;;  %v4865_v36 = vsel %vm426_vm0, %v4863_v46, %v4864_v11  ;;  %v4872_v23 = vsel %vm426_vm0, %v4869_v62, %v4871_v55 }
 0x57b   : > { %v4476_v59 = vpop.f32.mrb[74].mxu1 }
 0x57c   : > { %v4935_v8 = vadd.f32 %v4855_v28, %v4697_v33  ;;  %v5856_v0 = vadd.f32 %v8611_v41, %v4476_v59  ;;  %v4478_v1 = vpop.f32.mrb[75].mxu1  ;;  %v4868_v28 = vrot.slane %v6350_v44, 1  ;;  %v6351_v59 = vld [vmem:[%s6599_s8 + $0x170] sm:$0xff] }
 0x57e   : > { %4967 = vst [vmem:[%s8625_s23 + $0xa0] sm:$0xff] %v4935_v8  ;;  %v4702_v47 = vadd.f32 %v5856_v0, %v8494_v54  ;;  %v4862_v54 = vsel %vm426_vm0, %v4859_v20, %v4861_v31  ;;  %v4874_v8 = vrot.slane %v6351_v59, 1  ;;  %v6352_v0 = vld [vmem:[%s6599_s8 + $0x178] sm:$0x3] }
 0x57f   : > { %v4481_v45 = vpop.f32.mrb[76].mxu1  ;;  %v4876_v1 = vrot.slane %v6352_v0, 1 }
 0x580   : > { %v4936_v42 = vadd.f32 %v4857_v16, %v4702_v47  ;;  %v5857_v12 = vadd.f32 %v8611_v41, %v4481_v45  ;;  %v4483_v50 = vpop.f32.mrb[77].mxu1  ;;  %v4870_v45 = vsel %vm426_vm0, %v4868_v28, %v4869_v62 }
 0x581   : > { %v4877_v31 = vsel %vm426_vm0, %v4874_v8, %v4876_v1 }
 0x582   : > { %4968 = vst [vmem:[%s8625_s23 + $0xa8] sm:$0xff] %v4936_v42  ;;  %v4707_v24 = vadd.f32 %v5857_v12, %v8510_v2  ;;  %v6353_v42 = vld [vmem:[%s6599_s8 + $0x168] sm:$0xff] }
 0x583   : > { %v4486_v37 = vpop.f32.mrb[78].mxu1  ;;  %v4873_v12 = vrot.slane %v6353_v42, 1 }
 0x584   : > { %v4937_v43 = vadd.f32 %v4860_v22, %v4707_v24  ;;  %v5858_v57 = vadd.f32 %v8611_v41, %v4486_v37  ;;  %v4488_v29 = vpop.f32.mrb[79].mxu1 }
 0x586   : > { %4969 = vst [vmem:[%s8625_s23 + $0xb0] sm:$0xff] %v4937_v43  ;;  %v4712_v7 = vadd.f32 %v5858_v57, %v8507_v58  ;;  %v6354_v57 = vld [vmem:[%s6599_s8 + $0x188] sm:$0xff] }
 0x587   : > { %v4491_v21 = vpop.f32.mrb[80].mxu1  ;;  %v4879_v29 = vrot.slane %v6354_v57, 1 }
 0x588   : > { %v4938_v52 = vadd.f32 %v4862_v54, %v4712_v7  ;;  %v4493_v51 = vpop.f32.mrb[81].mxu1  ;;  %v5859_v17 = vadd.f32 %v8611_v41, %v4491_v21  ;;  %v6355_v54 = vld [vmem:[%s6599_s8 + $0x190] sm:$0x3] }
 0x589   : > { %v4881_v7 = vrot.slane %v6355_v54, 1  ;;  %v4875_v51 = vsel %vm426_vm0, %v4873_v12, %v4874_v8 }
 0x58a   : > { %4970 = vst [vmem:[%s8625_s23 + $0xb8] sm:$0xff] %v4938_v52 }
 0x58b   : > { %v4496_v18 = vpop.f32.mrb[82].mxu1 }
 0x58c   : > { %v4498_v35 = vpop.f32.mrb[83].mxu1  ;;  %v5860_v53 = vadd.f32 %v8611_v41, %v4496_v18  ;;  %v6356_v18 = vld [vmem:[%s6599_s8 + $0x180] sm:$0xff] }
 0x58d   : > { %v4878_v35 = vrot.slane %v6356_v18, 1 }
 0x58f   : > { %v4501_v63 = vpop.f32.mrb[84].mxu1  ;;  %v4880_v3 = vsel %vm426_vm0, %v4878_v35, %v4879_v29 }
 0x590   : > { %v4503_v2 = vpop.f32.mrb[85].mxu1  ;;  %v5861_v16 = vadd.f32 %v8611_v41, %v4501_v63 }
 0x593   : > { %v4506_v49 = vpop.f32.mrb[86].mxu1 }
 0x594   : > { %v4508_v25 = vpop.f32.mrb[87].mxu1  ;;  %v5862_v27 = vadd.f32 %v8611_v41, %v4506_v49 }
 0x597   : > { %v4511_v4 = vpop.f32.mrb[88].mxu1 }
 0x598   : > { %v4513_v9 = vpop.f32.mrb[89].mxu1  ;;  %v5863_v24 = vadd.f32 %v8611_v41, %v4511_v4 }
 0x59b   : > { %v4516_v26 = vpop.f32.mrb[90].mxu1 }
 0x59c   : > { %v4518_v30 = vpop.f32.mrb[91].mxu1  ;;  %v5864_v22 = vadd.f32 %v8611_v41, %v4516_v26  ;;  %v4882_v26 = vsel %vm426_vm0, %v4879_v29, %v4881_v7 }
 0x59f   : > { %v4521_v48 = vpop.f32.mrb[92].mxu1 }
 0x5a0   : > { %v4523_v58 = vpop.f32.mrb[93].mxu1  ;;  %v5865_v25 = vadd.f32 %v8611_v41, %v4521_v48 }
 0x5a3   : > { %v4526_v39 = vpop.f32.mrb[94].mxu1 }
 0x5a4   : > { %v4528_v56 = vpop.f32.mrb[95].mxu1  ;;  %v5866_v2 = vadd.f32 %v8611_v41, %v4526_v39 }
 0x5a7   : > { %v5329_v19 = vpop.f32.mrb[96].mxu1 }
 0x5a8   : > { %v4722_v32 = vadd.f32 %v5860_v53, %v5329_v19  ;;  %v4716_v15 = vpop.f32.mrb[97].mxu1 }
 0x5a9   : > { %v4717_v13 = vadd.f32 %v5859_v17, %v4716_v15 }
 0x5aa   : > { %v4940_v33 = vadd.f32 %v4867_v38, %v4722_v32 }
 0x5ab   : > { %v4939_v40 = vadd.f32 %v4865_v36, %v4717_v13  ;;  %v5332_v10 = vpop.f32.mrb[98].mxu1 }
 0x5ac   : > { %4972 = vst [vmem:[%s8625_s23 + $0xc8] sm:$0xff] %v4940_v33  ;;  %v4732_v20 = vadd.f32 %v5862_v27, %v5332_v10  ;;  %v4726_v47 = vpop.f32.mrb[99].mxu1 }
 0x5ad   : > { %4971 = vst [vmem:[%s8625_s23 + $0xc0] sm:$0xff] %v4939_v40  ;;  %v4727_v50 = vadd.f32 %v5861_v16, %v4726_v47 }
 0x5ae   : > { %v4942_v6 = vadd.f32 %v4872_v23, %v4732_v20 }
 0x5af   : > { %v4941_v37 = vadd.f32 %v4870_v45, %v4727_v50  ;;  %v5335_v43 = vpop.f32.mrb[100].mxu1 }
 0x5b0   : > { %4974 = vst [vmem:[%s8625_s23 + $0xd8] sm:$0xff] %v4942_v6  ;;  %v4742_v21 = vadd.f32 %v5864_v22, %v5335_v43  ;;  %v4736_v52 = vpop.f32.mrb[101].mxu1 }
 0x5b1   : > { %4973 = vst [vmem:[%s8625_s23 + $0xd0] sm:$0xff] %v4941_v37  ;;  %v4737_v63 = vadd.f32 %v5863_v24, %v4736_v52 }
 0x5b2   : > { %v4944_v49 = vadd.f32 %v4877_v31, %v4742_v21 }
 0x5b3   : > { %v4943_v4 = vadd.f32 %v4875_v51, %v4737_v63  ;;  %v5338_v9 = vpop.f32.mrb[102].mxu1 }
 0x5b4   : > { %4976 = vst [vmem:[%s8625_s23 + $0xe8] sm:$0xff] %v4944_v49  ;;  %v4752_v30 = vadd.f32 %v5866_v2, %v5338_v9  ;;  %v4746_v58 = vpop.f32.mrb[103].mxu1 }
 0x5b5   : > { %4975 = vst [vmem:[%s8625_s23 + $0xe0] sm:$0xff] %v4943_v4  ;;  %v4747_v39 = vadd.f32 %v5865_v25, %v4746_v58 }
 0x5b6   : > { %v4946_v11 = vadd.f32 %v4882_v26, %v4752_v30 }
 0x5b7   : > { %v4945_v41 = vadd.f32 %v4880_v3, %v4747_v39 }
 0x5b8   : > { %4978 = vst [vmem:[%s8625_s23 + $0xf8] sm:$0xff] %v4946_v11 }
 0x5b9   : > { %4977 = vst [vmem:[%s8625_s23 + $0xf0] sm:$0xff] %v4945_v41 }
 0x5ba   : > { %6398 = shalt.err (!%p6395_p7)
}
 0x5bb   : > { %s6399_s12 = scalar_lea.hbm %s8788_s9, 4096  ;;  %s6403_s15 = scalar_lea.hbm %s8842_s5, 8192 }
 0x5bc   : > { %p6400_p8 = scmp.ne.s32.totalorder %s8788_s9, %s6399_s12  ;;  %p6404_p1 = scmp.lt.u32.totalorder %s8788_s9, %s8842_s5 }
 0x5bd   : > { %p6405_p0 = scmp.lt.u32.totalorder %s6403_s15, %s6399_s12  ;;  %p6407_p6 = scmp.lt.u32.totalorder %s6399_s12, %s8788_s9 }
 0x5be   : > { %p6401_p11 = pnand %p6400_p8, %p9086_p9 }
 0x5bf   : > { %p6406_p5 = por %p6405_p0, %p6404_p1 }
 0x5c0   : > { %p6402_p13 = pneg %p6401_p11 }
 0x5c1   : > { %p6408_p10 = por %p6407_p6, %p6406_p5 }
 0x5c3   : > { %p6409_p12 = pnand %p6408_p10, %p6402_p13 }
 0x5c5   : > { %6412 = shalt.err (!%p6409_p12)
}
 0x5c6   : > { %s6459_s23 = smov 128   ;;  %s6460_s25 = smov 8  }
 0x5c7   : > { %6256 = dma.vmem_to_hbm [thread:$0]  (%p9086_p9), %s8790_s26, 4096, %s8788_s9, %s8796_s22, %s6459_s23, %s6459_s23, %s6460_s25  }
 0x5c8 PF: > { %p6268_p2 = scmp.ge.s32.totalorder %s6451_s21, 2  ;;  %s5008_s8 = sand.u32 1, %s6439_s18  }
 0x5c9   : > { %p9087_p3 = scmp.ne.s32.totalorder %s8954_s29, 0  ;;  %s5009_s6 = scalar_lea.sflag [#allocation6], %s5008_s8 }
 0x5cb   : > { %p6263_p4 = pnand %p6268_p2, %p9087_p3 }
 0x5cd   : > { %6434 = dma.done.wait (!%p6263_p4), %s5009_s6, 4096  }
 0x5ce   : > { %6436 = vsyncadd (!%p6263_p4), %s5009_s6, 4294963200  ;;  %p16_p7 = scmp.ge.s32.totalorder %s6516_s24, 4   ;;  %s9088_s18 = smov %s6443_s19 }
 0x5cf   : > { %s9089_s19 = smov %s6447_s20  ;;  %s9090_s20 = smov %s6527_s27 }
 0x5d0   : > { %s9091_s21 = smov %s6516_s24  ;;  %18 = sbr.rel (!%p16_p7) target bundleno = 4 (0x4), region = 83 }
 0x5d7   :  { %5014 = vsyncpa [#allocation5], 1 }
 0x5d8   :  { %5016 = vsyncpa [#allocation5 + $0x1], 1 }
 0x5d9   :  { %5017 = vsyncpa [#allocation6], 1 }
 0x5da   :  { %5019 = vsyncpa [#allocation6 + $0x1], 1 }

</bundles_post_ra>
